<compile_context>
chip_gen: v7x
topology: tpu7x:2x2x1
jax: 0.10.0
libtpu: 0.0.40
codegen_flags: <defaults>
</compile_context>

<pallas_src>
import jax
import jax.numpy as jnp
from jax.experimental import pallas as pl
from jax.experimental.pallas import tpu as pltpu


# ----------------------------------------------------------------------------
# Fused kernel: masked encoder LSTM + BatchNorm1d + attention decoder + FC head
# ----------------------------------------------------------------------------
def translation_kernel(src_ref, len_ref,
                       enc_wih_ref, enc_whh_ref, enc_b_ref,
                       bn_g_ref, bn_b_ref,
                       wa1_ref, ba1_ref, wa2_ref,
                       dec_wih_ref, dec_whh_ref, dec_b_ref,
                       wf1_ref, bf1_ref, wf2_ref, bf2_ref,
                       dec_out_ref, attn_out_ref):
    # src_ref: (B, enc_n, S)   len_ref: (B, 1) int32
    # enc_wih: (S, 4H)  enc_whh: (H, 4H)  enc_b: (1, 4H)   bn_g/bn_b: (1, H)
    # wa1: (2H, Hd)  ba1: (1, Hd)  wa2: (1, Hd)
    # dec_wih: (Hd+H, 4Hd)  dec_whh: (Hd, 4Hd)  dec_b: (1, 4Hd)
    # wf1: (Hd+H, H+Hd)  bf1: (1, H+Hd)  wf2: (H+Hd, T)  bf2: (1, T)
    # dec_out: (B, n_step, T)   attn_out: (B, n_step, enc_n)
    B, enc_n, S = src_ref.shape
    H4 = enc_wih_ref.shape[1]
    H = H4 // 4
    Hd = dec_whh_ref.shape[0]
    n_step, T = dec_out_ref.shape[1], dec_out_ref.shape[2]

    # ---- validity mask from lengths (pack_padded_sequence / masked_fill equivalents) ----
    pos = jax.lax.broadcasted_iota(jnp.int32, (B, enc_n), 1)
    valid = (pos < len_ref[...]).astype(jnp.float32)              # (B, enc_n) in {0, 1}

    # ---- encoder: hoisted input projection, then unrolled masked LSTM recurrence ----
    xproj = (jnp.dot(src_ref[...].reshape(B * enc_n, S), enc_wih_ref[...],
                     preferred_element_type=jnp.float32)
             + enc_b_ref[...]).reshape(B, enc_n, H4)
    whh = enc_whh_ref[...]

    h = jnp.zeros((B, H), jnp.float32)
    c = jnp.zeros((B, H), jnp.float32)
    enc_steps = []
    for t in range(enc_n):                                        # static trip count, unrolled
        gates = xproj[:, t, :] + jnp.dot(h, whh, preferred_element_type=jnp.float32)  # (B, 4H)
        sg = jax.nn.sigmoid(gates)                                # one full-width EUP push
        tg = jnp.tanh(gates)                                      # one full-width EUP push
        c_new = sg[:, H:2 * H] * c + sg[:, 0:H] * tg[:, 2 * H:3 * H]
        h_new = sg[:, 3 * H:4 * H] * jnp.tanh(c_new)
        v = valid[:, t:t + 1]                                     # (B, 1)
        h = jnp.where(v > 0, h_new, h)                            # state frozen past seq end
        c = jnp.where(v > 0, c_new, c)
        enc_steps.append(h_new * v)                               # padded outputs are exactly 0

    enc = jnp.stack(enc_steps, axis=1)                            # (B, enc_n, H), vreg-resident

    # ---- BatchNorm1d: training-mode batch stats over (batch, time), affine (eps=1e-5) ----
    # stats include the zero-filled padded positions, matching BN on the padded torch output.
    n = float(B * enc_n)
    mean = jnp.sum(enc, axis=(0, 1), keepdims=True) / n
    diff = enc - mean
    var = jnp.sum(diff * diff, axis=(0, 1), keepdims=True) / n
    enc = (diff * jax.lax.rsqrt(var + 1e-5) * bn_g_ref[...].reshape(1, 1, H)
           + bn_b_ref[...].reshape(1, 1, H))

    # ---- attention: encoder contribution to attention_1 is decode-step invariant ----
    wa1_enc = wa1_ref[0:H, :]                                     # rows for the enc part of cat
    wa1_dec = wa1_ref[H:H + Hd, :]                                # rows for the dec part of cat
    enc_att = (jnp.dot(enc.reshape(B * enc_n, H), wa1_enc,
                       preferred_element_type=jnp.float32)
               + ba1_ref[...]).reshape(B, enc_n, Hd)
    wa2 = wa2_ref[...].reshape(1, 1, Hd)

    def attention(dec_h):
        # softmax_over_enc_n(mask * attention_2(tanh(attention_1(cat([enc, dec])))))
        dec_att = jnp.dot(dec_h, wa1_dec, preferred_element_type=jnp.float32)     # (B, Hd)
        tt = jnp.tanh(enc_att + dec_att[:, None, :])              # (B, enc_n, Hd)
        scores = jnp.sum(tt * wa2, axis=-1) * valid               # (B, enc_n), multiplicative mask
        m = jnp.max(scores, axis=-1, keepdims=True)
        e = jnp.exp(scores - m)
        denom = jnp.sum(e, axis=-1, keepdims=True)
        return e * pl.reciprocal(denom, approx=True)              # (B, enc_n), lane-dense

    # ---- decoder weights folded once: gates = h @ (Wih_h + Whh) + ctx @ Wih_c + b ----
    wdh = dec_wih_ref[0:Hd, :] + dec_whh_ref[...]                 # (Hd, 4Hd)
    wdc = dec_wih_ref[Hd:Hd + H, :]                               # (H, 4Hd)
    bd = dec_b_ref[...]

    hd = jnp.zeros((B, Hd), jnp.float32)
    cd = jnp.zeros((B, Hd), jnp.float32)
    aw = attention(hd)                                            # initial attention on zero state
    ctx = jnp.sum(aw[:, :, None] * enc, axis=1)                   # (B, H)

    hs, ctxs, aws = [], [], []
    for _ in range(n_step):                                       # fully unrolled, vreg carries
        gates = (jnp.dot(hd, wdh, preferred_element_type=jnp.float32)
                 + jnp.dot(ctx, wdc, preferred_element_type=jnp.float32) + bd)    # (B, 4Hd)
        sg = jax.nn.sigmoid(gates)
        tg = jnp.tanh(gates)
        cd = sg[:, Hd:2 * Hd] * cd + sg[:, 0:Hd] * tg[:, 2 * Hd:3 * Hd]
        hd = sg[:, 3 * Hd:4 * Hd] * jnp.tanh(cd)
        aw = attention(hd)
        ctx = jnp.sum(aw[:, :, None] * enc, axis=1)               # (B, H)
        hs.append(hd)
        ctxs.append(ctx)
        aws.append(aw)

    # ---- hoisted FC head: fc_2(relu(fc_1([h, ctx]))) as batched matmuls over all steps ----
    h_all = jnp.stack(hs, axis=1).reshape(B * n_step, Hd)         # batch-major stacks
    ctx_all = jnp.stack(ctxs, axis=1).reshape(B * n_step, H)
    h1 = jnp.maximum(
        jnp.dot(h_all, wf1_ref[0:Hd, :], preferred_element_type=jnp.float32)
        + jnp.dot(ctx_all, wf1_ref[Hd:Hd + H, :], preferred_element_type=jnp.float32)
        + bf1_ref[...], 0.0)
    out = (jnp.dot(h1, wf2_ref[...], preferred_element_type=jnp.float32)
           + bf2_ref[...]).reshape(B, n_step, T)

    # ---- final masked_fill fused here; single full-tile batch-major stores ----
    step_valid = valid[:, :, None]                                # (B, n_step, 1); n_step == enc_n
    dec_out_ref[...] = jnp.where(step_valid > 0, out, 0.0).astype(dec_out_ref.dtype)

    attn = jnp.stack(aws, axis=1)                                 # (B, n_step, enc_n)
    attn_valid = step_valid * valid[:, None, :]                   # invalid step OR enc position
    attn_out_ref[...] = jnp.where(attn_valid > 0, attn, 1e-10).astype(attn_out_ref.dtype)


# ----------------------------------------------------------------------------
# Wrapper
# ----------------------------------------------------------------------------
_VMEM = pl.BlockSpec(memory_space=pltpu.MemorySpace.VMEM)


def translation_forward(params, cfg, source, target, lengths):
    """source: (B, enc_n, source_size), target: (B, n_step, target_size), lengths: (B,)."""
    B, enc_n, _ = source.shape
    n_step = target.shape[1]
    H = cfg["encoder_hidden_size"]
    Hd = cfg["decoder_hidden_size"]
    T = cfg["target_size"]
    assert Hd == H, "attention_1 in-dim (2H) requires decoder_hidden_size == encoder_hidden_size"
    assert cfg["decoder_input_size"] == H + Hd
    assert n_step == enc_n, "final masked_fill broadcast requires n_step == enc_n"

    return pl.pallas_call(
        translation_kernel,
        out_shape=(jax.ShapeDtypeStruct((B, n_step, T), jnp.float32),
                   jax.ShapeDtypeStruct((B, n_step, enc_n), jnp.float32)),
        in_specs=[_VMEM] * 17,
        out_specs=(_VMEM, _VMEM),
        compiler_params=pltpu.CompilerParams(vmem_limit_bytes=32 * 1024 * 1024),
    )(source.astype(jnp.float32), lengths.astype(jnp.int32).reshape(B, 1),
      params["enc_wih"], params["enc_whh"], params["enc_b"],
      params["bn_gamma"], params["bn_beta"],
      params["wa1"], params["ba1"], params["wa2"],
      params["dec_wih"], params["dec_whh"], params["dec_b"],
      params["wf1"], params["bf1"], params["wf2"], params["bf2"])


# ----------------------------------------------------------------------------
# Deterministic synthetic parameters (shapes implied by Translation.__init__)
# ----------------------------------------------------------------------------
def init_params(key, cfg):
    S = cfg["source_size"]
    H = cfg["encoder_hidden_size"]
    Hd = cfg["decoder_hidden_size"]
    Din = cfg["decoder_input_size"]
    T = cfg["target_size"]
    ks = jax.random.split(key, 13)

    def w(k, shape, fan_in):
        return jax.random.normal(k, shape, jnp.float32) / jnp.sqrt(float(fan_in))

    return dict(
        enc_wih=w(ks[0], (S, 4 * H), S),          # encoder W_ih^T
        enc_whh=w(ks[1], (H, 4 * H), H),          # encoder W_hh^T
        enc_b=w(ks[2], (1, 4 * H), H),            # b_ih + b_hh combined
        bn_gamma=jnp.ones((1, H), jnp.float32),   # BatchNorm1d affine (PyTorch default init)
        bn_beta=jnp.zeros((1, H), jnp.float32),
        wa1=w(ks[3], (2 * H, Hd), 2 * H),         # attention_1 weight^T (rows: [enc | dec])
        ba1=w(ks[4], (1, Hd), 2 * H),
        wa2=w(ks[5], (1, Hd), Hd),                # attention_2 (no bias)
        dec_wih=w(ks[6], (Din, 4 * Hd), Din),     # decoder W_ih^T (rows: [h | ctx])
        dec_whh=w(ks[7], (Hd, 4 * Hd), Hd),
        dec_b=w(ks[8], (1, 4 * Hd), Hd),          # b_ih + b_hh combined
        wf1=w(ks[9], (H + Hd, H + Hd), H + Hd),   # fc_1^T (rows: [h | ctx])
        bf1=w(ks[10], (1, H + Hd), H + Hd),
        wf2=w(ks[11], (H + Hd, T), H + Hd),       # fc_2^T
        bf2=w(ks[12], (1, T), H + Hd),
    )


if __name__ == "__main__":
    cfg = dict(source_size=16, encoder_hidden_size=32, encoder_num_layers=1,
               encoder_dropout=0.0, decoder_input_size=64, decoder_hidden_size=32,
               decoder_num_layers=1, decoder_dropout=0.0, target_size=16)

    key = jax.random.PRNGKey(0)
    kp, ksrc, ktgt = jax.random.split(key, 3)
    params = init_params(kp, cfg)

    B, enc_n = 2, 8
    source = jax.random.normal(ksrc, (B, enc_n, cfg["source_size"]), jnp.float32)
    target = jax.random.normal(ktgt, (B, enc_n, cfg["target_size"]), jnp.float32)
    lengths = jnp.array([8, 5], dtype=jnp.int32)   # sorted descending (pack_padded_sequence)

    all_dec_out, all_attn_weights = translation_forward(params, cfg, source, target, lengths)
    jax.block_until_ready((all_dec_out, all_attn_weights))

    assert all_dec_out.shape == (B, enc_n, cfg["target_size"])
    assert all_attn_weights.shape == (B, enc_n, enc_n)
    print("KERNEL_OK")
</pallas_src>

<mosaic_0001>
module attributes {stable_mosaic.version = 11 : i64} {
  func.func @translation_kernel(%arg0: memref<2x8x16xf32, #tpu.memory_space<vmem>>, %arg1: memref<2x1xi32, #tpu.memory_space<vmem>>, %arg2: memref<16x128xf32, #tpu.memory_space<vmem>>, %arg3: memref<32x128xf32, #tpu.memory_space<vmem>>, %arg4: memref<1x128xf32, #tpu.memory_space<vmem>>, %arg5: memref<1x32xf32, #tpu.memory_space<vmem>>, %arg6: memref<1x32xf32, #tpu.memory_space<vmem>>, %arg7: memref<64x32xf32, #tpu.memory_space<vmem>>, %arg8: memref<1x32xf32, #tpu.memory_space<vmem>>, %arg9: memref<1x32xf32, #tpu.memory_space<vmem>>, %arg10: memref<64x128xf32, #tpu.memory_space<vmem>>, %arg11: memref<32x128xf32, #tpu.memory_space<vmem>>, %arg12: memref<1x128xf32, #tpu.memory_space<vmem>>, %arg13: memref<64x64xf32, #tpu.memory_space<vmem>>, %arg14: memref<1x64xf32, #tpu.memory_space<vmem>>, %arg15: memref<64x16xf32, #tpu.memory_space<vmem>>, %arg16: memref<1x16xf32, #tpu.memory_space<vmem>>, %arg17: memref<2x8x16xf32, #tpu.memory_space<vmem>>, %arg18: memref<2x8x8xf32, #tpu.memory_space<vmem>>) attributes {dimension_semantics = [], scalar_prefetch = 0 : i64, scratch_operands = 0 : i64, tpu.core_type = #tpu.core_type<tc>} {
    %0 = tpu.iota {dimensions = array<i32: 1>} : vector<2x8xi32>
    %c0 = arith.constant 0 : index
    %c0_0 = arith.constant 0 : index
    %1 = vector.load %arg1[%c0, %c0_0] : memref<2x1xi32, #tpu.memory_space<vmem>>, vector<2x1xi32>
    %2 = vector.broadcast %1 : vector<2x1xi32> to vector<2x8xi32>
    %3 = arith.cmpi slt, %0, %2 : vector<2x8xi32>
    %4 = arith.extui %3 : vector<2x8xi1> to vector<2x8xi32>
    %5 = arith.sitofp %4 : vector<2x8xi32> to vector<2x8xf32>
    %c0_1 = arith.constant 0 : index
    %c0_2 = arith.constant 0 : index
    %c0_3 = arith.constant 0 : index
    %6 = vector.load %arg0[%c0_1, %c0_2, %c0_3] : memref<2x8x16xf32, #tpu.memory_space<vmem>>, vector<2x8x16xf32>
    %7 = vector.shape_cast %6 : vector<2x8x16xf32> to vector<16x16xf32>
    %c0_4 = arith.constant 0 : index
    %c0_5 = arith.constant 0 : index
    %8 = vector.load %arg2[%c0_4, %c0_5] : memref<16x128xf32, #tpu.memory_space<vmem>>, vector<16x128xf32>
    %cst = arith.constant dense<0.000000e+00> : vector<16x128xf32>
    %9 = tpu.matmul %7, %8, %cst {dimension_numbers = #tpu.dot_dimension_numbers<[1], [0], [0], [1], [0, 0, 1, 1], [], []>} : vector<16x16xf32>, vector<16x128xf32>, vector<16x128xf32> -> vector<16x128xf32>
    %c0_6 = arith.constant 0 : index
    %c0_7 = arith.constant 0 : index
    %10 = vector.load %arg4[%c0_6, %c0_7] : memref<1x128xf32, #tpu.memory_space<vmem>>, vector<1x128xf32>
    %11 = vector.broadcast %10 : vector<1x128xf32> to vector<16x128xf32>
    %12 = arith.addf %9, %11 : vector<16x128xf32>
    %13 = vector.shape_cast %12 : vector<16x128xf32> to vector<2x8x128xf32>
    %c0_8 = arith.constant 0 : index
    %c0_9 = arith.constant 0 : index
    %14 = vector.load %arg3[%c0_8, %c0_9] : memref<32x128xf32, #tpu.memory_space<vmem>>, vector<32x128xf32>
    %cst_10 = arith.constant 0.000000e+00 : f32
    %15 = vector.broadcast %cst_10 : f32 to vector<2x32xf32>
    %cst_11 = arith.constant 0.000000e+00 : f32
    %16 = vector.broadcast %cst_11 : f32 to vector<2x32xf32>
    %17 = vector.extract_strided_slice %13 {offsets = [0, 0, 0], sizes = [2, 1, 128], strides = [1, 1, 1]} : vector<2x8x128xf32> to vector<2x1x128xf32>
    %18 = vector.shape_cast %17 : vector<2x1x128xf32> to vector<2x128xf32>
    %cst_12 = arith.constant dense<0.000000e+00> : vector<2x128xf32>
    %19 = tpu.matmul %15, %14, %cst_12 {dimension_numbers = #tpu.dot_dimension_numbers<[1], [0], [0], [1], [0, 0, 1, 1], [], []>} : vector<2x32xf32>, vector<32x128xf32>, vector<2x128xf32> -> vector<2x128xf32>
    %20 = arith.addf %18, %19 : vector<2x128xf32>
    %21 = arith.negf %20 : vector<2x128xf32>
    %22 = math.exp %21 : vector<2x128xf32>
    %cst_13 = arith.constant 1.000000e+00 : f32
    %23 = vector.broadcast %cst_13 : f32 to vector<2x128xf32>
    %24 = arith.addf %23, %22 : vector<2x128xf32>
    %25 = arith.divf %23, %24 : vector<2x128xf32>
    %26 = math.tanh %20 : vector<2x128xf32>
    %27 = vector.extract_strided_slice %25 {offsets = [0, 32], sizes = [2, 32], strides = [1, 1]} : vector<2x128xf32> to vector<2x32xf32>
    %28 = arith.mulf %27, %16 : vector<2x32xf32>
    %29 = vector.extract_strided_slice %25 {offsets = [0, 0], sizes = [2, 32], strides = [1, 1]} : vector<2x128xf32> to vector<2x32xf32>
    %30 = vector.extract_strided_slice %26 {offsets = [0, 64], sizes = [2, 32], strides = [1, 1]} : vector<2x128xf32> to vector<2x32xf32>
    %31 = arith.mulf %29, %30 : vector<2x32xf32>
    %32 = arith.addf %28, %31 : vector<2x32xf32>
    %33 = vector.extract_strided_slice %25 {offsets = [0, 96], sizes = [2, 32], strides = [1, 1]} : vector<2x128xf32> to vector<2x32xf32>
    %34 = math.tanh %32 : vector<2x32xf32>
    %35 = arith.mulf %33, %34 : vector<2x32xf32>
    %36 = vector.extract_strided_slice %5 {offsets = [0, 0], sizes = [2, 1], strides = [1, 1]} : vector<2x8xf32> to vector<2x1xf32>
    %cst_14 = arith.constant 0.000000e+00 : f32
    %37 = vector.broadcast %cst_14 : f32 to vector<2x1xf32>
    %38 = arith.cmpf ogt, %36, %37 : vector<2x1xf32>
    %39 = vector.shape_cast %38 : vector<2x1xi1> to vector<2x1xi1>
    %40 = vector.broadcast %39 : vector<2x1xi1> to vector<2x32xi1>
    %41 = arith.select %40, %35, %15 : vector<2x32xi1>, vector<2x32xf32>
    %cst_15 = arith.constant 0.000000e+00 : f32
    %42 = vector.broadcast %cst_15 : f32 to vector<2x1xf32>
    %43 = arith.cmpf ogt, %36, %42 : vector<2x1xf32>
    %44 = vector.shape_cast %43 : vector<2x1xi1> to vector<2x1xi1>
    %45 = vector.broadcast %44 : vector<2x1xi1> to vector<2x32xi1>
    %46 = arith.select %45, %32, %16 : vector<2x32xi1>, vector<2x32xf32>
    %47 = vector.broadcast %36 : vector<2x1xf32> to vector<2x32xf32>
    %48 = arith.mulf %35, %47 : vector<2x32xf32>
    %49 = vector.extract_strided_slice %13 {offsets = [0, 1, 0], sizes = [2, 1, 128], strides = [1, 1, 1]} : vector<2x8x128xf32> to vector<2x1x128xf32>
    %50 = vector.shape_cast %49 : vector<2x1x128xf32> to vector<2x128xf32>
    %cst_16 = arith.constant dense<0.000000e+00> : vector<2x128xf32>
    %51 = tpu.matmul %41, %14, %cst_16 {dimension_numbers = #tpu.dot_dimension_numbers<[1], [0], [0], [1], [0, 0, 1, 1], [], []>} : vector<2x32xf32>, vector<32x128xf32>, vector<2x128xf32> -> vector<2x128xf32>
    %52 = arith.addf %50, %51 : vector<2x128xf32>
    %53 = arith.negf %52 : vector<2x128xf32>
    %54 = math.exp %53 : vector<2x128xf32>
    %cst_17 = arith.constant 1.000000e+00 : f32
    %55 = vector.broadcast %cst_17 : f32 to vector<2x128xf32>
    %56 = arith.addf %55, %54 : vector<2x128xf32>
    %57 = arith.divf %55, %56 : vector<2x128xf32>
    %58 = math.tanh %52 : vector<2x128xf32>
    %59 = vector.extract_strided_slice %57 {offsets = [0, 32], sizes = [2, 32], strides = [1, 1]} : vector<2x128xf32> to vector<2x32xf32>
    %60 = arith.mulf %59, %46 : vector<2x32xf32>
    %61 = vector.extract_strided_slice %57 {offsets = [0, 0], sizes = [2, 32], strides = [1, 1]} : vector<2x128xf32> to vector<2x32xf32>
    %62 = vector.extract_strided_slice %58 {offsets = [0, 64], sizes = [2, 32], strides = [1, 1]} : vector<2x128xf32> to vector<2x32xf32>
    %63 = arith.mulf %61, %62 : vector<2x32xf32>
    %64 = arith.addf %60, %63 : vector<2x32xf32>
    %65 = vector.extract_strided_slice %57 {offsets = [0, 96], sizes = [2, 32], strides = [1, 1]} : vector<2x128xf32> to vector<2x32xf32>
    %66 = math.tanh %64 : vector<2x32xf32>
    %67 = arith.mulf %65, %66 : vector<2x32xf32>
    %68 = vector.extract_strided_slice %5 {offsets = [0, 1], sizes = [2, 1], strides = [1, 1]} : vector<2x8xf32> to vector<2x1xf32>
    %cst_18 = arith.constant 0.000000e+00 : f32
    %69 = vector.broadcast %cst_18 : f32 to vector<2x1xf32>
    %70 = arith.cmpf ogt, %68, %69 : vector<2x1xf32>
    %71 = vector.shape_cast %70 : vector<2x1xi1> to vector<2x1xi1>
    %72 = vector.broadcast %71 : vector<2x1xi1> to vector<2x32xi1>
    %73 = arith.select %72, %67, %41 : vector<2x32xi1>, vector<2x32xf32>
    %cst_19 = arith.constant 0.000000e+00 : f32
    %74 = vector.broadcast %cst_19 : f32 to vector<2x1xf32>
    %75 = arith.cmpf ogt, %68, %74 : vector<2x1xf32>
    %76 = vector.shape_cast %75 : vector<2x1xi1> to vector<2x1xi1>
    %77 = vector.broadcast %76 : vector<2x1xi1> to vector<2x32xi1>
    %78 = arith.select %77, %64, %46 : vector<2x32xi1>, vector<2x32xf32>
    %79 = vector.broadcast %68 : vector<2x1xf32> to vector<2x32xf32>
    %80 = arith.mulf %67, %79 : vector<2x32xf32>
    %81 = vector.extract_strided_slice %13 {offsets = [0, 2, 0], sizes = [2, 1, 128], strides = [1, 1, 1]} : vector<2x8x128xf32> to vector<2x1x128xf32>
    %82 = vector.shape_cast %81 : vector<2x1x128xf32> to vector<2x128xf32>
    %cst_20 = arith.constant dense<0.000000e+00> : vector<2x128xf32>
    %83 = tpu.matmul %73, %14, %cst_20 {dimension_numbers = #tpu.dot_dimension_numbers<[1], [0], [0], [1], [0, 0, 1, 1], [], []>} : vector<2x32xf32>, vector<32x128xf32>, vector<2x128xf32> -> vector<2x128xf32>
    %84 = arith.addf %82, %83 : vector<2x128xf32>
    %85 = arith.negf %84 : vector<2x128xf32>
    %86 = math.exp %85 : vector<2x128xf32>
    %cst_21 = arith.constant 1.000000e+00 : f32
    %87 = vector.broadcast %cst_21 : f32 to vector<2x128xf32>
    %88 = arith.addf %87, %86 : vector<2x128xf32>
    %89 = arith.divf %87, %88 : vector<2x128xf32>
    %90 = math.tanh %84 : vector<2x128xf32>
    %91 = vector.extract_strided_slice %89 {offsets = [0, 32], sizes = [2, 32], strides = [1, 1]} : vector<2x128xf32> to vector<2x32xf32>
    %92 = arith.mulf %91, %78 : vector<2x32xf32>
    %93 = vector.extract_strided_slice %89 {offsets = [0, 0], sizes = [2, 32], strides = [1, 1]} : vector<2x128xf32> to vector<2x32xf32>
    %94 = vector.extract_strided_slice %90 {offsets = [0, 64], sizes = [2, 32], strides = [1, 1]} : vector<2x128xf32> to vector<2x32xf32>
    %95 = arith.mulf %93, %94 : vector<2x32xf32>
    %96 = arith.addf %92, %95 : vector<2x32xf32>
    %97 = vector.extract_strided_slice %89 {offsets = [0, 96], sizes = [2, 32], strides = [1, 1]} : vector<2x128xf32> to vector<2x32xf32>
    %98 = math.tanh %96 : vector<2x32xf32>
    %99 = arith.mulf %97, %98 : vector<2x32xf32>
    %100 = vector.extract_strided_slice %5 {offsets = [0, 2], sizes = [2, 1], strides = [1, 1]} : vector<2x8xf32> to vector<2x1xf32>
    %cst_22 = arith.constant 0.000000e+00 : f32
    %101 = vector.broadcast %cst_22 : f32 to vector<2x1xf32>
    %102 = arith.cmpf ogt, %100, %101 : vector<2x1xf32>
    %103 = vector.shape_cast %102 : vector<2x1xi1> to vector<2x1xi1>
    %104 = vector.broadcast %103 : vector<2x1xi1> to vector<2x32xi1>
    %105 = arith.select %104, %99, %73 : vector<2x32xi1>, vector<2x32xf32>
    %cst_23 = arith.constant 0.000000e+00 : f32
    %106 = vector.broadcast %cst_23 : f32 to vector<2x1xf32>
    %107 = arith.cmpf ogt, %100, %106 : vector<2x1xf32>
    %108 = vector.shape_cast %107 : vector<2x1xi1> to vector<2x1xi1>
    %109 = vector.broadcast %108 : vector<2x1xi1> to vector<2x32xi1>
    %110 = arith.select %109, %96, %78 : vector<2x32xi1>, vector<2x32xf32>
    %111 = vector.broadcast %100 : vector<2x1xf32> to vector<2x32xf32>
    %112 = arith.mulf %99, %111 : vector<2x32xf32>
    %113 = vector.extract_strided_slice %13 {offsets = [0, 3, 0], sizes = [2, 1, 128], strides = [1, 1, 1]} : vector<2x8x128xf32> to vector<2x1x128xf32>
    %114 = vector.shape_cast %113 : vector<2x1x128xf32> to vector<2x128xf32>
    %cst_24 = arith.constant dense<0.000000e+00> : vector<2x128xf32>
    %115 = tpu.matmul %105, %14, %cst_24 {dimension_numbers = #tpu.dot_dimension_numbers<[1], [0], [0], [1], [0, 0, 1, 1], [], []>} : vector<2x32xf32>, vector<32x128xf32>, vector<2x128xf32> -> vector<2x128xf32>
    %116 = arith.addf %114, %115 : vector<2x128xf32>
    %117 = arith.negf %116 : vector<2x128xf32>
    %118 = math.exp %117 : vector<2x128xf32>
    %cst_25 = arith.constant 1.000000e+00 : f32
    %119 = vector.broadcast %cst_25 : f32 to vector<2x128xf32>
    %120 = arith.addf %119, %118 : vector<2x128xf32>
    %121 = arith.divf %119, %120 : vector<2x128xf32>
    %122 = math.tanh %116 : vector<2x128xf32>
    %123 = vector.extract_strided_slice %121 {offsets = [0, 32], sizes = [2, 32], strides = [1, 1]} : vector<2x128xf32> to vector<2x32xf32>
    %124 = arith.mulf %123, %110 : vector<2x32xf32>
    %125 = vector.extract_strided_slice %121 {offsets = [0, 0], sizes = [2, 32], strides = [1, 1]} : vector<2x128xf32> to vector<2x32xf32>
    %126 = vector.extract_strided_slice %122 {offsets = [0, 64], sizes = [2, 32], strides = [1, 1]} : vector<2x128xf32> to vector<2x32xf32>
    %127 = arith.mulf %125, %126 : vector<2x32xf32>
    %128 = arith.addf %124, %127 : vector<2x32xf32>
    %129 = vector.extract_strided_slice %121 {offsets = [0, 96], sizes = [2, 32], strides = [1, 1]} : vector<2x128xf32> to vector<2x32xf32>
    %130 = math.tanh %128 : vector<2x32xf32>
    %131 = arith.mulf %129, %130 : vector<2x32xf32>
    %132 = vector.extract_strided_slice %5 {offsets = [0, 3], sizes = [2, 1], strides = [1, 1]} : vector<2x8xf32> to vector<2x1xf32>
    %cst_26 = arith.constant 0.000000e+00 : f32
    %133 = vector.broadcast %cst_26 : f32 to vector<2x1xf32>
    %134 = arith.cmpf ogt, %132, %133 : vector<2x1xf32>
    %135 = vector.shape_cast %134 : vector<2x1xi1> to vector<2x1xi1>
    %136 = vector.broadcast %135 : vector<2x1xi1> to vector<2x32xi1>
    %137 = arith.select %136, %131, %105 : vector<2x32xi1>, vector<2x32xf32>
    %cst_27 = arith.constant 0.000000e+00 : f32
    %138 = vector.broadcast %cst_27 : f32 to vector<2x1xf32>
    %139 = arith.cmpf ogt, %132, %138 : vector<2x1xf32>
    %140 = vector.shape_cast %139 : vector<2x1xi1> to vector<2x1xi1>
    %141 = vector.broadcast %140 : vector<2x1xi1> to vector<2x32xi1>
    %142 = arith.select %141, %128, %110 : vector<2x32xi1>, vector<2x32xf32>
    %143 = vector.broadcast %132 : vector<2x1xf32> to vector<2x32xf32>
    %144 = arith.mulf %131, %143 : vector<2x32xf32>
    %145 = vector.extract_strided_slice %13 {offsets = [0, 4, 0], sizes = [2, 1, 128], strides = [1, 1, 1]} : vector<2x8x128xf32> to vector<2x1x128xf32>
    %146 = vector.shape_cast %145 : vector<2x1x128xf32> to vector<2x128xf32>
    %cst_28 = arith.constant dense<0.000000e+00> : vector<2x128xf32>
    %147 = tpu.matmul %137, %14, %cst_28 {dimension_numbers = #tpu.dot_dimension_numbers<[1], [0], [0], [1], [0, 0, 1, 1], [], []>} : vector<2x32xf32>, vector<32x128xf32>, vector<2x128xf32> -> vector<2x128xf32>
    %148 = arith.addf %146, %147 : vector<2x128xf32>
    %149 = arith.negf %148 : vector<2x128xf32>
    %150 = math.exp %149 : vector<2x128xf32>
    %cst_29 = arith.constant 1.000000e+00 : f32
    %151 = vector.broadcast %cst_29 : f32 to vector<2x128xf32>
    %152 = arith.addf %151, %150 : vector<2x128xf32>
    %153 = arith.divf %151, %152 : vector<2x128xf32>
    %154 = math.tanh %148 : vector<2x128xf32>
    %155 = vector.extract_strided_slice %153 {offsets = [0, 32], sizes = [2, 32], strides = [1, 1]} : vector<2x128xf32> to vector<2x32xf32>
    %156 = arith.mulf %155, %142 : vector<2x32xf32>
    %157 = vector.extract_strided_slice %153 {offsets = [0, 0], sizes = [2, 32], strides = [1, 1]} : vector<2x128xf32> to vector<2x32xf32>
    %158 = vector.extract_strided_slice %154 {offsets = [0, 64], sizes = [2, 32], strides = [1, 1]} : vector<2x128xf32> to vector<2x32xf32>
    %159 = arith.mulf %157, %158 : vector<2x32xf32>
    %160 = arith.addf %156, %159 : vector<2x32xf32>
    %161 = vector.extract_strided_slice %153 {offsets = [0, 96], sizes = [2, 32], strides = [1, 1]} : vector<2x128xf32> to vector<2x32xf32>
    %162 = math.tanh %160 : vector<2x32xf32>
    %163 = arith.mulf %161, %162 : vector<2x32xf32>
    %164 = vector.extract_strided_slice %5 {offsets = [0, 4], sizes = [2, 1], strides = [1, 1]} : vector<2x8xf32> to vector<2x1xf32>
    %cst_30 = arith.constant 0.000000e+00 : f32
    %165 = vector.broadcast %cst_30 : f32 to vector<2x1xf32>
    %166 = arith.cmpf ogt, %164, %165 : vector<2x1xf32>
    %167 = vector.shape_cast %166 : vector<2x1xi1> to vector<2x1xi1>
    %168 = vector.broadcast %167 : vector<2x1xi1> to vector<2x32xi1>
    %169 = arith.select %168, %163, %137 : vector<2x32xi1>, vector<2x32xf32>
    %cst_31 = arith.constant 0.000000e+00 : f32
    %170 = vector.broadcast %cst_31 : f32 to vector<2x1xf32>
    %171 = arith.cmpf ogt, %164, %170 : vector<2x1xf32>
    %172 = vector.shape_cast %171 : vector<2x1xi1> to vector<2x1xi1>
    %173 = vector.broadcast %172 : vector<2x1xi1> to vector<2x32xi1>
    %174 = arith.select %173, %160, %142 : vector<2x32xi1>, vector<2x32xf32>
    %175 = vector.broadcast %164 : vector<2x1xf32> to vector<2x32xf32>
    %176 = arith.mulf %163, %175 : vector<2x32xf32>
    %177 = vector.extract_strided_slice %13 {offsets = [0, 5, 0], sizes = [2, 1, 128], strides = [1, 1, 1]} : vector<2x8x128xf32> to vector<2x1x128xf32>
    %178 = vector.shape_cast %177 : vector<2x1x128xf32> to vector<2x128xf32>
    %cst_32 = arith.constant dense<0.000000e+00> : vector<2x128xf32>
    %179 = tpu.matmul %169, %14, %cst_32 {dimension_numbers = #tpu.dot_dimension_numbers<[1], [0], [0], [1], [0, 0, 1, 1], [], []>} : vector<2x32xf32>, vector<32x128xf32>, vector<2x128xf32> -> vector<2x128xf32>
    %180 = arith.addf %178, %179 : vector<2x128xf32>
    %181 = arith.negf %180 : vector<2x128xf32>
    %182 = math.exp %181 : vector<2x128xf32>
    %cst_33 = arith.constant 1.000000e+00 : f32
    %183 = vector.broadcast %cst_33 : f32 to vector<2x128xf32>
    %184 = arith.addf %183, %182 : vector<2x128xf32>
    %185 = arith.divf %183, %184 : vector<2x128xf32>
    %186 = math.tanh %180 : vector<2x128xf32>
    %187 = vector.extract_strided_slice %185 {offsets = [0, 32], sizes = [2, 32], strides = [1, 1]} : vector<2x128xf32> to vector<2x32xf32>
    %188 = arith.mulf %187, %174 : vector<2x32xf32>
    %189 = vector.extract_strided_slice %185 {offsets = [0, 0], sizes = [2, 32], strides = [1, 1]} : vector<2x128xf32> to vector<2x32xf32>
    %190 = vector.extract_strided_slice %186 {offsets = [0, 64], sizes = [2, 32], strides = [1, 1]} : vector<2x128xf32> to vector<2x32xf32>
    %191 = arith.mulf %189, %190 : vector<2x32xf32>
    %192 = arith.addf %188, %191 : vector<2x32xf32>
    %193 = vector.extract_strided_slice %185 {offsets = [0, 96], sizes = [2, 32], strides = [1, 1]} : vector<2x128xf32> to vector<2x32xf32>
    %194 = math.tanh %192 : vector<2x32xf32>
    %195 = arith.mulf %193, %194 : vector<2x32xf32>
    %196 = vector.extract_strided_slice %5 {offsets = [0, 5], sizes = [2, 1], strides = [1, 1]} : vector<2x8xf32> to vector<2x1xf32>
    %cst_34 = arith.constant 0.000000e+00 : f32
    %197 = vector.broadcast %cst_34 : f32 to vector<2x1xf32>
    %198 = arith.cmpf ogt, %196, %197 : vector<2x1xf32>
    %199 = vector.shape_cast %198 : vector<2x1xi1> to vector<2x1xi1>
    %200 = vector.broadcast %199 : vector<2x1xi1> to vector<2x32xi1>
    %201 = arith.select %200, %195, %169 : vector<2x32xi1>, vector<2x32xf32>
    %cst_35 = arith.constant 0.000000e+00 : f32
    %202 = vector.broadcast %cst_35 : f32 to vector<2x1xf32>
    %203 = arith.cmpf ogt, %196, %202 : vector<2x1xf32>
    %204 = vector.shape_cast %203 : vector<2x1xi1> to vector<2x1xi1>
    %205 = vector.broadcast %204 : vector<2x1xi1> to vector<2x32xi1>
    %206 = arith.select %205, %192, %174 : vector<2x32xi1>, vector<2x32xf32>
    %207 = vector.broadcast %196 : vector<2x1xf32> to vector<2x32xf32>
    %208 = arith.mulf %195, %207 : vector<2x32xf32>
    %209 = vector.extract_strided_slice %13 {offsets = [0, 6, 0], sizes = [2, 1, 128], strides = [1, 1, 1]} : vector<2x8x128xf32> to vector<2x1x128xf32>
    %210 = vector.shape_cast %209 : vector<2x1x128xf32> to vector<2x128xf32>
    %cst_36 = arith.constant dense<0.000000e+00> : vector<2x128xf32>
    %211 = tpu.matmul %201, %14, %cst_36 {dimension_numbers = #tpu.dot_dimension_numbers<[1], [0], [0], [1], [0, 0, 1, 1], [], []>} : vector<2x32xf32>, vector<32x128xf32>, vector<2x128xf32> -> vector<2x128xf32>
    %212 = arith.addf %210, %211 : vector<2x128xf32>
    %213 = arith.negf %212 : vector<2x128xf32>
    %214 = math.exp %213 : vector<2x128xf32>
    %cst_37 = arith.constant 1.000000e+00 : f32
    %215 = vector.broadcast %cst_37 : f32 to vector<2x128xf32>
    %216 = arith.addf %215, %214 : vector<2x128xf32>
    %217 = arith.divf %215, %216 : vector<2x128xf32>
    %218 = math.tanh %212 : vector<2x128xf32>
    %219 = vector.extract_strided_slice %217 {offsets = [0, 32], sizes = [2, 32], strides = [1, 1]} : vector<2x128xf32> to vector<2x32xf32>
    %220 = arith.mulf %219, %206 : vector<2x32xf32>
    %221 = vector.extract_strided_slice %217 {offsets = [0, 0], sizes = [2, 32], strides = [1, 1]} : vector<2x128xf32> to vector<2x32xf32>
    %222 = vector.extract_strided_slice %218 {offsets = [0, 64], sizes = [2, 32], strides = [1, 1]} : vector<2x128xf32> to vector<2x32xf32>
    %223 = arith.mulf %221, %222 : vector<2x32xf32>
    %224 = arith.addf %220, %223 : vector<2x32xf32>
    %225 = vector.extract_strided_slice %217 {offsets = [0, 96], sizes = [2, 32], strides = [1, 1]} : vector<2x128xf32> to vector<2x32xf32>
    %226 = math.tanh %224 : vector<2x32xf32>
    %227 = arith.mulf %225, %226 : vector<2x32xf32>
    %228 = vector.extract_strided_slice %5 {offsets = [0, 6], sizes = [2, 1], strides = [1, 1]} : vector<2x8xf32> to vector<2x1xf32>
    %cst_38 = arith.constant 0.000000e+00 : f32
    %229 = vector.broadcast %cst_38 : f32 to vector<2x1xf32>
    %230 = arith.cmpf ogt, %228, %229 : vector<2x1xf32>
    %231 = vector.shape_cast %230 : vector<2x1xi1> to vector<2x1xi1>
    %232 = vector.broadcast %231 : vector<2x1xi1> to vector<2x32xi1>
    %233 = arith.select %232, %227, %201 : vector<2x32xi1>, vector<2x32xf32>
    %cst_39 = arith.constant 0.000000e+00 : f32
    %234 = vector.broadcast %cst_39 : f32 to vector<2x1xf32>
    %235 = arith.cmpf ogt, %228, %234 : vector<2x1xf32>
    %236 = vector.shape_cast %235 : vector<2x1xi1> to vector<2x1xi1>
    %237 = vector.broadcast %236 : vector<2x1xi1> to vector<2x32xi1>
    %238 = arith.select %237, %224, %206 : vector<2x32xi1>, vector<2x32xf32>
    %239 = vector.broadcast %228 : vector<2x1xf32> to vector<2x32xf32>
    %240 = arith.mulf %227, %239 : vector<2x32xf32>
    %241 = vector.extract_strided_slice %13 {offsets = [0, 7, 0], sizes = [2, 1, 128], strides = [1, 1, 1]} : vector<2x8x128xf32> to vector<2x1x128xf32>
    %242 = vector.shape_cast %241 : vector<2x1x128xf32> to vector<2x128xf32>
    %cst_40 = arith.constant dense<0.000000e+00> : vector<2x128xf32>
    %243 = tpu.matmul %233, %14, %cst_40 {dimension_numbers = #tpu.dot_dimension_numbers<[1], [0], [0], [1], [0, 0, 1, 1], [], []>} : vector<2x32xf32>, vector<32x128xf32>, vector<2x128xf32> -> vector<2x128xf32>
    %244 = arith.addf %242, %243 : vector<2x128xf32>
    %245 = arith.negf %244 : vector<2x128xf32>
    %246 = math.exp %245 : vector<2x128xf32>
    %cst_41 = arith.constant 1.000000e+00 : f32
    %247 = vector.broadcast %cst_41 : f32 to vector<2x128xf32>
    %248 = arith.addf %247, %246 : vector<2x128xf32>
    %249 = arith.divf %247, %248 : vector<2x128xf32>
    %250 = math.tanh %244 : vector<2x128xf32>
    %251 = vector.extract_strided_slice %249 {offsets = [0, 32], sizes = [2, 32], strides = [1, 1]} : vector<2x128xf32> to vector<2x32xf32>
    %252 = arith.mulf %251, %238 : vector<2x32xf32>
    %253 = vector.extract_strided_slice %249 {offsets = [0, 0], sizes = [2, 32], strides = [1, 1]} : vector<2x128xf32> to vector<2x32xf32>
    %254 = vector.extract_strided_slice %250 {offsets = [0, 64], sizes = [2, 32], strides = [1, 1]} : vector<2x128xf32> to vector<2x32xf32>
    %255 = arith.mulf %253, %254 : vector<2x32xf32>
    %256 = arith.addf %252, %255 : vector<2x32xf32>
    %257 = vector.extract_strided_slice %249 {offsets = [0, 96], sizes = [2, 32], strides = [1, 1]} : vector<2x128xf32> to vector<2x32xf32>
    %258 = math.tanh %256 : vector<2x32xf32>
    %259 = arith.mulf %257, %258 : vector<2x32xf32>
    %260 = vector.extract_strided_slice %5 {offsets = [0, 7], sizes = [2, 1], strides = [1, 1]} : vector<2x8xf32> to vector<2x1xf32>
    %261 = vector.broadcast %260 : vector<2x1xf32> to vector<2x32xf32>
    %262 = arith.mulf %259, %261 : vector<2x32xf32>
    %263 = vector.shape_cast %48 : vector<2x32xf32> to vector<2x1x32xf32>
    %264 = vector.shape_cast %80 : vector<2x32xf32> to vector<2x1x32xf32>
    %265 = vector.shape_cast %112 : vector<2x32xf32> to vector<2x1x32xf32>
    %266 = vector.shape_cast %144 : vector<2x32xf32> to vector<2x1x32xf32>
    %267 = vector.shape_cast %176 : vector<2x32xf32> to vector<2x1x32xf32>
    %268 = vector.shape_cast %208 : vector<2x32xf32> to vector<2x1x32xf32>
    %269 = vector.shape_cast %240 : vector<2x32xf32> to vector<2x1x32xf32>
    %270 = vector.shape_cast %262 : vector<2x32xf32> to vector<2x1x32xf32>
    %271 = tpu.concatenate %263, %264, %265, %266, %267, %268, %269, %270 in 1 : vector<2x1x32xf32>, vector<2x1x32xf32>, vector<2x1x32xf32>, vector<2x1x32xf32>, vector<2x1x32xf32>, vector<2x1x32xf32>, vector<2x1x32xf32>, vector<2x1x32xf32> -> vector<2x8x32xf32>
    %cst_42 = arith.constant dense<0.000000e+00> : vector<32xf32>
    %272 = vector.multi_reduction <add>, %271, %cst_42 [0, 1] : vector<2x8x32xf32> to vector<32xf32>
    %273 = vector.shape_cast %272 : vector<32xf32> to vector<1x1x32xf32>
    %cst_43 = arith.constant 1.600000e+01 : f32
    %274 = vector.broadcast %cst_43 : f32 to vector<1x1x32xf32>
    %275 = arith.divf %273, %274 : vector<1x1x32xf32>
    %276 = vector.broadcast %275 : vector<1x1x32xf32> to vector<2x8x32xf32>
    %277 = arith.subf %271, %276 : vector<2x8x32xf32>
    %278 = arith.mulf %277, %277 : vector<2x8x32xf32>
    %cst_44 = arith.constant dense<0.000000e+00> : vector<32xf32>
    %279 = vector.multi_reduction <add>, %278, %cst_44 [0, 1] : vector<2x8x32xf32> to vector<32xf32>
    %280 = vector.shape_cast %279 : vector<32xf32> to vector<1x1x32xf32>
    %cst_45 = arith.constant 1.600000e+01 : f32
    %281 = vector.broadcast %cst_45 : f32 to vector<1x1x32xf32>
    %282 = arith.divf %280, %281 : vector<1x1x32xf32>
    %cst_46 = arith.constant 9.99999974E-6 : f32
    %283 = vector.broadcast %cst_46 : f32 to vector<1x1x32xf32>
    %284 = arith.addf %282, %283 : vector<1x1x32xf32>
    %285 = math.rsqrt %284 : vector<1x1x32xf32>
    %286 = vector.broadcast %285 : vector<1x1x32xf32> to vector<2x8x32xf32>
    %287 = arith.mulf %277, %286 : vector<2x8x32xf32>
    %c0_47 = arith.constant 0 : index
    %c0_48 = arith.constant 0 : index
    %288 = vector.load %arg5[%c0_47, %c0_48] : memref<1x32xf32, #tpu.memory_space<vmem>>, vector<1x32xf32>
    %289 = vector.shape_cast %288 : vector<1x32xf32> to vector<1x1x32xf32>
    %290 = vector.broadcast %289 : vector<1x1x32xf32> to vector<2x8x32xf32>
    %291 = arith.mulf %287, %290 : vector<2x8x32xf32>
    %c0_49 = arith.constant 0 : index
    %c0_50 = arith.constant 0 : index
    %292 = vector.load %arg6[%c0_49, %c0_50] : memref<1x32xf32, #tpu.memory_space<vmem>>, vector<1x32xf32>
    %293 = vector.shape_cast %292 : vector<1x32xf32> to vector<1x1x32xf32>
    %294 = vector.broadcast %293 : vector<1x1x32xf32> to vector<2x8x32xf32>
    %295 = arith.addf %291, %294 : vector<2x8x32xf32>
    %c0_51 = arith.constant 0 : index
    %c0_52 = arith.constant 0 : index
    %296 = vector.load %arg7[%c0_51, %c0_52] : memref<64x32xf32, #tpu.memory_space<vmem>>, vector<32x32xf32>
    %c32 = arith.constant 32 : index
    %c0_53 = arith.constant 0 : index
    %297 = vector.load %arg7[%c32, %c0_53] : memref<64x32xf32, #tpu.memory_space<vmem>>, vector<32x32xf32>
    %298 = vector.shape_cast %295 : vector<2x8x32xf32> to vector<16x32xf32>
    %cst_54 = arith.constant dense<0.000000e+00> : vector<16x32xf32>
    %299 = tpu.matmul %298, %296, %cst_54 {dimension_numbers = #tpu.dot_dimension_numbers<[1], [0], [0], [1], [0, 0, 1, 1], [], []>} : vector<16x32xf32>, vector<32x32xf32>, vector<16x32xf32> -> vector<16x32xf32>
    %c0_55 = arith.constant 0 : index
    %c0_56 = arith.constant 0 : index
    %300 = vector.load %arg8[%c0_55, %c0_56] : memref<1x32xf32, #tpu.memory_space<vmem>>, vector<1x32xf32>
    %301 = vector.broadcast %300 : vector<1x32xf32> to vector<16x32xf32>
    %302 = arith.addf %299, %301 : vector<16x32xf32>
    %303 = vector.shape_cast %302 : vector<16x32xf32> to vector<2x8x32xf32>
    %c0_57 = arith.constant 0 : index
    %c0_58 = arith.constant 0 : index
    %304 = vector.load %arg9[%c0_57, %c0_58] : memref<1x32xf32, #tpu.memory_space<vmem>>, vector<1x32xf32>
    %305 = vector.shape_cast %304 : vector<1x32xf32> to vector<1x1x32xf32>
    %c0_59 = arith.constant 0 : index
    %c0_60 = arith.constant 0 : index
    %306 = vector.load %arg10[%c0_59, %c0_60] : memref<64x128xf32, #tpu.memory_space<vmem>>, vector<32x128xf32>
    %c0_61 = arith.constant 0 : index
    %c0_62 = arith.constant 0 : index
    %307 = vector.load %arg11[%c0_61, %c0_62] : memref<32x128xf32, #tpu.memory_space<vmem>>, vector<32x128xf32>
    %308 = arith.addf %306, %307 : vector<32x128xf32>
    %c32_63 = arith.constant 32 : index
    %c0_64 = arith.constant 0 : index
    %309 = vector.load %arg10[%c32_63, %c0_64] : memref<64x128xf32, #tpu.memory_space<vmem>>, vector<32x128xf32>
    %c0_65 = arith.constant 0 : index
    %c0_66 = arith.constant 0 : index
    %310 = vector.load %arg12[%c0_65, %c0_66] : memref<1x128xf32, #tpu.memory_space<vmem>>, vector<1x128xf32>
    %cst_67 = arith.constant 0.000000e+00 : f32
    %311 = vector.broadcast %cst_67 : f32 to vector<2x32xf32>
    %cst_68 = arith.constant 0.000000e+00 : f32
    %312 = vector.broadcast %cst_68 : f32 to vector<2x32xf32>
    %cst_69 = arith.constant dense<0.000000e+00> : vector<2x32xf32>
    %313 = tpu.matmul %311, %297, %cst_69 {dimension_numbers = #tpu.dot_dimension_numbers<[1], [0], [0], [1], [0, 0, 1, 1], [], []>} : vector<2x32xf32>, vector<32x32xf32>, vector<2x32xf32> -> vector<2x32xf32>
    %314 = vector.shape_cast %313 : vector<2x32xf32> to vector<2x1x32xf32>
    %315 = vector.broadcast %314 : vector<2x1x32xf32> to vector<2x8x32xf32>
    %316 = arith.addf %303, %315 : vector<2x8x32xf32>
    %317 = math.tanh %316 : vector<2x8x32xf32>
    %318 = vector.broadcast %305 : vector<1x1x32xf32> to vector<2x8x32xf32>
    %319 = arith.mulf %317, %318 : vector<2x8x32xf32>
    %cst_70 = arith.constant dense<0.000000e+00> : vector<2x8xf32>
    %320 = vector.multi_reduction <add>, %319, %cst_70 [2] : vector<2x8x32xf32> to vector<2x8xf32>
    %321 = arith.mulf %320, %5 : vector<2x8xf32>
    %cst_71 = arith.constant dense<0xFF800000> : vector<2xf32>
    %322 = vector.multi_reduction <maximumf>, %321, %cst_71 [1] : vector<2x8xf32> to vector<2xf32>
    %323 = vector.shape_cast %322 : vector<2xf32> to vector<2x1xf32>
    %324 = vector.broadcast %323 : vector<2x1xf32> to vector<2x8xf32>
    %325 = arith.subf %321, %324 : vector<2x8xf32>
    %326 = math.exp %325 : vector<2x8xf32>
    %cst_72 = arith.constant dense<0.000000e+00> : vector<2xf32>
    %327 = vector.multi_reduction <add>, %326, %cst_72 [1] : vector<2x8xf32> to vector<2xf32>
    %328 = vector.shape_cast %327 : vector<2xf32> to vector<2x1xf32>
    %329 = tpu.reciprocal %328 {approx = true} : vector<2x1xf32> -> vector<2x1xf32>
    %330 = vector.broadcast %329 : vector<2x1xf32> to vector<2x8xf32>
    %331 = arith.mulf %326, %330 : vector<2x8xf32>
    %332 = vector.shape_cast %331 : vector<2x8xf32> to vector<2x8x1xf32>
    %333 = vector.broadcast %332 : vector<2x8x1xf32> to vector<2x8x32xf32>
    %334 = arith.mulf %333, %295 : vector<2x8x32xf32>
    %cst_73 = arith.constant dense<0.000000e+00> : vector<2x32xf32>
    %335 = vector.multi_reduction <add>, %334, %cst_73 [1] : vector<2x8x32xf32> to vector<2x32xf32>
    %cst_74 = arith.constant dense<0.000000e+00> : vector<2x128xf32>
    %336 = tpu.matmul %311, %308, %cst_74 {dimension_numbers = #tpu.dot_dimension_numbers<[1], [0], [0], [1], [0, 0, 1, 1], [], []>} : vector<2x32xf32>, vector<32x128xf32>, vector<2x128xf32> -> vector<2x128xf32>
    %cst_75 = arith.constant dense<0.000000e+00> : vector<2x128xf32>
    %337 = tpu.matmul %335, %309, %cst_75 {dimension_numbers = #tpu.dot_dimension_numbers<[1], [0], [0], [1], [0, 0, 1, 1], [], []>} : vector<2x32xf32>, vector<32x128xf32>, vector<2x128xf32> -> vector<2x128xf32>
    %338 = arith.addf %336, %337 : vector<2x128xf32>
    %339 = vector.broadcast %310 : vector<1x128xf32> to vector<2x128xf32>
    %340 = arith.addf %338, %339 : vector<2x128xf32>
    %341 = arith.negf %340 : vector<2x128xf32>
    %342 = math.exp %341 : vector<2x128xf32>
    %cst_76 = arith.constant 1.000000e+00 : f32
    %343 = vector.broadcast %cst_76 : f32 to vector<2x128xf32>
    %344 = arith.addf %343, %342 : vector<2x128xf32>
    %345 = arith.divf %343, %344 : vector<2x128xf32>
    %346 = math.tanh %340 : vector<2x128xf32>
    %347 = vector.extract_strided_slice %345 {offsets = [0, 32], sizes = [2, 32], strides = [1, 1]} : vector<2x128xf32> to vector<2x32xf32>
    %348 = arith.mulf %347, %312 : vector<2x32xf32>
    %349 = vector.extract_strided_slice %345 {offsets = [0, 0], sizes = [2, 32], strides = [1, 1]} : vector<2x128xf32> to vector<2x32xf32>
    %350 = vector.extract_strided_slice %346 {offsets = [0, 64], sizes = [2, 32], strides = [1, 1]} : vector<2x128xf32> to vector<2x32xf32>
    %351 = arith.mulf %349, %350 : vector<2x32xf32>
    %352 = arith.addf %348, %351 : vector<2x32xf32>
    %353 = vector.extract_strided_slice %345 {offsets = [0, 96], sizes = [2, 32], strides = [1, 1]} : vector<2x128xf32> to vector<2x32xf32>
    %354 = math.tanh %352 : vector<2x32xf32>
    %355 = arith.mulf %353, %354 : vector<2x32xf32>
    %cst_77 = arith.constant dense<0.000000e+00> : vector<2x32xf32>
    %356 = tpu.matmul %355, %297, %cst_77 {dimension_numbers = #tpu.dot_dimension_numbers<[1], [0], [0], [1], [0, 0, 1, 1], [], []>} : vector<2x32xf32>, vector<32x32xf32>, vector<2x32xf32> -> vector<2x32xf32>
    %357 = vector.shape_cast %356 : vector<2x32xf32> to vector<2x1x32xf32>
    %358 = vector.broadcast %357 : vector<2x1x32xf32> to vector<2x8x32xf32>
    %359 = arith.addf %303, %358 : vector<2x8x32xf32>
    %360 = math.tanh %359 : vector<2x8x32xf32>
    %361 = vector.broadcast %305 : vector<1x1x32xf32> to vector<2x8x32xf32>
    %362 = arith.mulf %360, %361 : vector<2x8x32xf32>
    %cst_78 = arith.constant dense<0.000000e+00> : vector<2x8xf32>
    %363 = vector.multi_reduction <add>, %362, %cst_78 [2] : vector<2x8x32xf32> to vector<2x8xf32>
    %364 = arith.mulf %363, %5 : vector<2x8xf32>
    %cst_79 = arith.constant dense<0xFF800000> : vector<2xf32>
    %365 = vector.multi_reduction <maximumf>, %364, %cst_79 [1] : vector<2x8xf32> to vector<2xf32>
    %366 = vector.shape_cast %365 : vector<2xf32> to vector<2x1xf32>
    %367 = vector.broadcast %366 : vector<2x1xf32> to vector<2x8xf32>
    %368 = arith.subf %364, %367 : vector<2x8xf32>
    %369 = math.exp %368 : vector<2x8xf32>
    %cst_80 = arith.constant dense<0.000000e+00> : vector<2xf32>
    %370 = vector.multi_reduction <add>, %369, %cst_80 [1] : vector<2x8xf32> to vector<2xf32>
    %371 = vector.shape_cast %370 : vector<2xf32> to vector<2x1xf32>
    %372 = tpu.reciprocal %371 {approx = true} : vector<2x1xf32> -> vector<2x1xf32>
    %373 = vector.broadcast %372 : vector<2x1xf32> to vector<2x8xf32>
    %374 = arith.mulf %369, %373 : vector<2x8xf32>
    %375 = vector.shape_cast %374 : vector<2x8xf32> to vector<2x8x1xf32>
    %376 = vector.broadcast %375 : vector<2x8x1xf32> to vector<2x8x32xf32>
    %377 = arith.mulf %376, %295 : vector<2x8x32xf32>
    %cst_81 = arith.constant dense<0.000000e+00> : vector<2x32xf32>
    %378 = vector.multi_reduction <add>, %377, %cst_81 [1] : vector<2x8x32xf32> to vector<2x32xf32>
    %cst_82 = arith.constant dense<0.000000e+00> : vector<2x128xf32>
    %379 = tpu.matmul %355, %308, %cst_82 {dimension_numbers = #tpu.dot_dimension_numbers<[1], [0], [0], [1], [0, 0, 1, 1], [], []>} : vector<2x32xf32>, vector<32x128xf32>, vector<2x128xf32> -> vector<2x128xf32>
    %cst_83 = arith.constant dense<0.000000e+00> : vector<2x128xf32>
    %380 = tpu.matmul %378, %309, %cst_83 {dimension_numbers = #tpu.dot_dimension_numbers<[1], [0], [0], [1], [0, 0, 1, 1], [], []>} : vector<2x32xf32>, vector<32x128xf32>, vector<2x128xf32> -> vector<2x128xf32>
    %381 = arith.addf %379, %380 : vector<2x128xf32>
    %382 = vector.broadcast %310 : vector<1x128xf32> to vector<2x128xf32>
    %383 = arith.addf %381, %382 : vector<2x128xf32>
    %384 = arith.negf %383 : vector<2x128xf32>
    %385 = math.exp %384 : vector<2x128xf32>
    %cst_84 = arith.constant 1.000000e+00 : f32
    %386 = vector.broadcast %cst_84 : f32 to vector<2x128xf32>
    %387 = arith.addf %386, %385 : vector<2x128xf32>
    %388 = arith.divf %386, %387 : vector<2x128xf32>
    %389 = math.tanh %383 : vector<2x128xf32>
    %390 = vector.extract_strided_slice %388 {offsets = [0, 32], sizes = [2, 32], strides = [1, 1]} : vector<2x128xf32> to vector<2x32xf32>
    %391 = arith.mulf %390, %352 : vector<2x32xf32>
    %392 = vector.extract_strided_slice %388 {offsets = [0, 0], sizes = [2, 32], strides = [1, 1]} : vector<2x128xf32> to vector<2x32xf32>
    %393 = vector.extract_strided_slice %389 {offsets = [0, 64], sizes = [2, 32], strides = [1, 1]} : vector<2x128xf32> to vector<2x32xf32>
    %394 = arith.mulf %392, %393 : vector<2x32xf32>
    %395 = arith.addf %391, %394 : vector<2x32xf32>
    %396 = vector.extract_strided_slice %388 {offsets = [0, 96], sizes = [2, 32], strides = [1, 1]} : vector<2x128xf32> to vector<2x32xf32>
    %397 = math.tanh %395 : vector<2x32xf32>
    %398 = arith.mulf %396, %397 : vector<2x32xf32>
    %cst_85 = arith.constant dense<0.000000e+00> : vector<2x32xf32>
    %399 = tpu.matmul %398, %297, %cst_85 {dimension_numbers = #tpu.dot_dimension_numbers<[1], [0], [0], [1], [0, 0, 1, 1], [], []>} : vector<2x32xf32>, vector<32x32xf32>, vector<2x32xf32> -> vector<2x32xf32>
    %400 = vector.shape_cast %399 : vector<2x32xf32> to vector<2x1x32xf32>
    %401 = vector.broadcast %400 : vector<2x1x32xf32> to vector<2x8x32xf32>
    %402 = arith.addf %303, %401 : vector<2x8x32xf32>
    %403 = math.tanh %402 : vector<2x8x32xf32>
    %404 = vector.broadcast %305 : vector<1x1x32xf32> to vector<2x8x32xf32>
    %405 = arith.mulf %403, %404 : vector<2x8x32xf32>
    %cst_86 = arith.constant dense<0.000000e+00> : vector<2x8xf32>
    %406 = vector.multi_reduction <add>, %405, %cst_86 [2] : vector<2x8x32xf32> to vector<2x8xf32>
    %407 = arith.mulf %406, %5 : vector<2x8xf32>
    %cst_87 = arith.constant dense<0xFF800000> : vector<2xf32>
    %408 = vector.multi_reduction <maximumf>, %407, %cst_87 [1] : vector<2x8xf32> to vector<2xf32>
    %409 = vector.shape_cast %408 : vector<2xf32> to vector<2x1xf32>
    %410 = vector.broadcast %409 : vector<2x1xf32> to vector<2x8xf32>
    %411 = arith.subf %407, %410 : vector<2x8xf32>
    %412 = math.exp %411 : vector<2x8xf32>
    %cst_88 = arith.constant dense<0.000000e+00> : vector<2xf32>
    %413 = vector.multi_reduction <add>, %412, %cst_88 [1] : vector<2x8xf32> to vector<2xf32>
    %414 = vector.shape_cast %413 : vector<2xf32> to vector<2x1xf32>
    %415 = tpu.reciprocal %414 {approx = true} : vector<2x1xf32> -> vector<2x1xf32>
    %416 = vector.broadcast %415 : vector<2x1xf32> to vector<2x8xf32>
    %417 = arith.mulf %412, %416 : vector<2x8xf32>
    %418 = vector.shape_cast %417 : vector<2x8xf32> to vector<2x8x1xf32>
    %419 = vector.broadcast %418 : vector<2x8x1xf32> to vector<2x8x32xf32>
    %420 = arith.mulf %419, %295 : vector<2x8x32xf32>
    %cst_89 = arith.constant dense<0.000000e+00> : vector<2x32xf32>
    %421 = vector.multi_reduction <add>, %420, %cst_89 [1] : vector<2x8x32xf32> to vector<2x32xf32>
    %cst_90 = arith.constant dense<0.000000e+00> : vector<2x128xf32>
    %422 = tpu.matmul %398, %308, %cst_90 {dimension_numbers = #tpu.dot_dimension_numbers<[1], [0], [0], [1], [0, 0, 1, 1], [], []>} : vector<2x32xf32>, vector<32x128xf32>, vector<2x128xf32> -> vector<2x128xf32>
    %cst_91 = arith.constant dense<0.000000e+00> : vector<2x128xf32>
    %423 = tpu.matmul %421, %309, %cst_91 {dimension_numbers = #tpu.dot_dimension_numbers<[1], [0], [0], [1], [0, 0, 1, 1], [], []>} : vector<2x32xf32>, vector<32x128xf32>, vector<2x128xf32> -> vector<2x128xf32>
    %424 = arith.addf %422, %423 : vector<2x128xf32>
    %425 = vector.broadcast %310 : vector<1x128xf32> to vector<2x128xf32>
    %426 = arith.addf %424, %425 : vector<2x128xf32>
    %427 = arith.negf %426 : vector<2x128xf32>
    %428 = math.exp %427 : vector<2x128xf32>
    %cst_92 = arith.constant 1.000000e+00 : f32
    %429 = vector.broadcast %cst_92 : f32 to vector<2x128xf32>
    %430 = arith.addf %429, %428 : vector<2x128xf32>
    %431 = arith.divf %429, %430 : vector<2x128xf32>
    %432 = math.tanh %426 : vector<2x128xf32>
    %433 = vector.extract_strided_slice %431 {offsets = [0, 32], sizes = [2, 32], strides = [1, 1]} : vector<2x128xf32> to vector<2x32xf32>
    %434 = arith.mulf %433, %395 : vector<2x32xf32>
    %435 = vector.extract_strided_slice %431 {offsets = [0, 0], sizes = [2, 32], strides = [1, 1]} : vector<2x128xf32> to vector<2x32xf32>
    %436 = vector.extract_strided_slice %432 {offsets = [0, 64], sizes = [2, 32], strides = [1, 1]} : vector<2x128xf32> to vector<2x32xf32>
    %437 = arith.mulf %435, %436 : vector<2x32xf32>
    %438 = arith.addf %434, %437 : vector<2x32xf32>
    %439 = vector.extract_strided_slice %431 {offsets = [0, 96], sizes = [2, 32], strides = [1, 1]} : vector<2x128xf32> to vector<2x32xf32>
    %440 = math.tanh %438 : vector<2x32xf32>
    %441 = arith.mulf %439, %440 : vector<2x32xf32>
    %cst_93 = arith.constant dense<0.000000e+00> : vector<2x32xf32>
    %442 = tpu.matmul %441, %297, %cst_93 {dimension_numbers = #tpu.dot_dimension_numbers<[1], [0], [0], [1], [0, 0, 1, 1], [], []>} : vector<2x32xf32>, vector<32x32xf32>, vector<2x32xf32> -> vector<2x32xf32>
    %443 = vector.shape_cast %442 : vector<2x32xf32> to vector<2x1x32xf32>
    %444 = vector.broadcast %443 : vector<2x1x32xf32> to vector<2x8x32xf32>
    %445 = arith.addf %303, %444 : vector<2x8x32xf32>
    %446 = math.tanh %445 : vector<2x8x32xf32>
    %447 = vector.broadcast %305 : vector<1x1x32xf32> to vector<2x8x32xf32>
    %448 = arith.mulf %446, %447 : vector<2x8x32xf32>
    %cst_94 = arith.constant dense<0.000000e+00> : vector<2x8xf32>
    %449 = vector.multi_reduction <add>, %448, %cst_94 [2] : vector<2x8x32xf32> to vector<2x8xf32>
    %450 = arith.mulf %449, %5 : vector<2x8xf32>
    %cst_95 = arith.constant dense<0xFF800000> : vector<2xf32>
    %451 = vector.multi_reduction <maximumf>, %450, %cst_95 [1] : vector<2x8xf32> to vector<2xf32>
    %452 = vector.shape_cast %451 : vector<2xf32> to vector<2x1xf32>
    %453 = vector.broadcast %452 : vector<2x1xf32> to vector<2x8xf32>
    %454 = arith.subf %450, %453 : vector<2x8xf32>
    %455 = math.exp %454 : vector<2x8xf32>
    %cst_96 = arith.constant dense<0.000000e+00> : vector<2xf32>
    %456 = vector.multi_reduction <add>, %455, %cst_96 [1] : vector<2x8xf32> to vector<2xf32>
    %457 = vector.shape_cast %456 : vector<2xf32> to vector<2x1xf32>
    %458 = tpu.reciprocal %457 {approx = true} : vector<2x1xf32> -> vector<2x1xf32>
    %459 = vector.broadcast %458 : vector<2x1xf32> to vector<2x8xf32>
    %460 = arith.mulf %455, %459 : vector<2x8xf32>
    %461 = vector.shape_cast %460 : vector<2x8xf32> to vector<2x8x1xf32>
    %462 = vector.broadcast %461 : vector<2x8x1xf32> to vector<2x8x32xf32>
    %463 = arith.mulf %462, %295 : vector<2x8x32xf32>
    %cst_97 = arith.constant dense<0.000000e+00> : vector<2x32xf32>
    %464 = vector.multi_reduction <add>, %463, %cst_97 [1] : vector<2x8x32xf32> to vector<2x32xf32>
    %cst_98 = arith.constant dense<0.000000e+00> : vector<2x128xf32>
    %465 = tpu.matmul %441, %308, %cst_98 {dimension_numbers = #tpu.dot_dimension_numbers<[1], [0], [0], [1], [0, 0, 1, 1], [], []>} : vector<2x32xf32>, vector<32x128xf32>, vector<2x128xf32> -> vector<2x128xf32>
    %cst_99 = arith.constant dense<0.000000e+00> : vector<2x128xf32>
    %466 = tpu.matmul %464, %309, %cst_99 {dimension_numbers = #tpu.dot_dimension_numbers<[1], [0], [0], [1], [0, 0, 1, 1], [], []>} : vector<2x32xf32>, vector<32x128xf32>, vector<2x128xf32> -> vector<2x128xf32>
    %467 = arith.addf %465, %466 : vector<2x128xf32>
    %468 = vector.broadcast %310 : vector<1x128xf32> to vector<2x128xf32>
    %469 = arith.addf %467, %468 : vector<2x128xf32>
    %470 = arith.negf %469 : vector<2x128xf32>
    %471 = math.exp %470 : vector<2x128xf32>
    %cst_100 = arith.constant 1.000000e+00 : f32
    %472 = vector.broadcast %cst_100 : f32 to vector<2x128xf32>
    %473 = arith.addf %472, %471 : vector<2x128xf32>
    %474 = arith.divf %472, %473 : vector<2x128xf32>
    %475 = math.tanh %469 : vector<2x128xf32>
    %476 = vector.extract_strided_slice %474 {offsets = [0, 32], sizes = [2, 32], strides = [1, 1]} : vector<2x128xf32> to vector<2x32xf32>
    %477 = arith.mulf %476, %438 : vector<2x32xf32>
    %478 = vector.extract_strided_slice %474 {offsets = [0, 0], sizes = [2, 32], strides = [1, 1]} : vector<2x128xf32> to vector<2x32xf32>
    %479 = vector.extract_strided_slice %475 {offsets = [0, 64], sizes = [2, 32], strides = [1, 1]} : vector<2x128xf32> to vector<2x32xf32>
    %480 = arith.mulf %478, %479 : vector<2x32xf32>
    %481 = arith.addf %477, %480 : vector<2x32xf32>
    %482 = vector.extract_strided_slice %474 {offsets = [0, 96], sizes = [2, 32], strides = [1, 1]} : vector<2x128xf32> to vector<2x32xf32>
    %483 = math.tanh %481 : vector<2x32xf32>
    %484 = arith.mulf %482, %483 : vector<2x32xf32>
    %cst_101 = arith.constant dense<0.000000e+00> : vector<2x32xf32>
    %485 = tpu.matmul %484, %297, %cst_101 {dimension_numbers = #tpu.dot_dimension_numbers<[1], [0], [0], [1], [0, 0, 1, 1], [], []>} : vector<2x32xf32>, vector<32x32xf32>, vector<2x32xf32> -> vector<2x32xf32>
    %486 = vector.shape_cast %485 : vector<2x32xf32> to vector<2x1x32xf32>
    %487 = vector.broadcast %486 : vector<2x1x32xf32> to vector<2x8x32xf32>
    %488 = arith.addf %303, %487 : vector<2x8x32xf32>
    %489 = math.tanh %488 : vector<2x8x32xf32>
    %490 = vector.broadcast %305 : vector<1x1x32xf32> to vector<2x8x32xf32>
    %491 = arith.mulf %489, %490 : vector<2x8x32xf32>
    %cst_102 = arith.constant dense<0.000000e+00> : vector<2x8xf32>
    %492 = vector.multi_reduction <add>, %491, %cst_102 [2] : vector<2x8x32xf32> to vector<2x8xf32>
    %493 = arith.mulf %492, %5 : vector<2x8xf32>
    %cst_103 = arith.constant dense<0xFF800000> : vector<2xf32>
    %494 = vector.multi_reduction <maximumf>, %493, %cst_103 [1] : vector<2x8xf32> to vector<2xf32>
    %495 = vector.shape_cast %494 : vector<2xf32> to vector<2x1xf32>
    %496 = vector.broadcast %495 : vector<2x1xf32> to vector<2x8xf32>
    %497 = arith.subf %493, %496 : vector<2x8xf32>
    %498 = math.exp %497 : vector<2x8xf32>
    %cst_104 = arith.constant dense<0.000000e+00> : vector<2xf32>
    %499 = vector.multi_reduction <add>, %498, %cst_104 [1] : vector<2x8xf32> to vector<2xf32>
    %500 = vector.shape_cast %499 : vector<2xf32> to vector<2x1xf32>
    %501 = tpu.reciprocal %500 {approx = true} : vector<2x1xf32> -> vector<2x1xf32>
    %502 = vector.broadcast %501 : vector<2x1xf32> to vector<2x8xf32>
    %503 = arith.mulf %498, %502 : vector<2x8xf32>
    %504 = vector.shape_cast %503 : vector<2x8xf32> to vector<2x8x1xf32>
    %505 = vector.broadcast %504 : vector<2x8x1xf32> to vector<2x8x32xf32>
    %506 = arith.mulf %505, %295 : vector<2x8x32xf32>
    %cst_105 = arith.constant dense<0.000000e+00> : vector<2x32xf32>
    %507 = vector.multi_reduction <add>, %506, %cst_105 [1] : vector<2x8x32xf32> to vector<2x32xf32>
    %cst_106 = arith.constant dense<0.000000e+00> : vector<2x128xf32>
    %508 = tpu.matmul %484, %308, %cst_106 {dimension_numbers = #tpu.dot_dimension_numbers<[1], [0], [0], [1], [0, 0, 1, 1], [], []>} : vector<2x32xf32>, vector<32x128xf32>, vector<2x128xf32> -> vector<2x128xf32>
    %cst_107 = arith.constant dense<0.000000e+00> : vector<2x128xf32>
    %509 = tpu.matmul %507, %309, %cst_107 {dimension_numbers = #tpu.dot_dimension_numbers<[1], [0], [0], [1], [0, 0, 1, 1], [], []>} : vector<2x32xf32>, vector<32x128xf32>, vector<2x128xf32> -> vector<2x128xf32>
    %510 = arith.addf %508, %509 : vector<2x128xf32>
    %511 = vector.broadcast %310 : vector<1x128xf32> to vector<2x128xf32>
    %512 = arith.addf %510, %511 : vector<2x128xf32>
    %513 = arith.negf %512 : vector<2x128xf32>
    %514 = math.exp %513 : vector<2x128xf32>
    %cst_108 = arith.constant 1.000000e+00 : f32
    %515 = vector.broadcast %cst_108 : f32 to vector<2x128xf32>
    %516 = arith.addf %515, %514 : vector<2x128xf32>
    %517 = arith.divf %515, %516 : vector<2x128xf32>
    %518 = math.tanh %512 : vector<2x128xf32>
    %519 = vector.extract_strided_slice %517 {offsets = [0, 32], sizes = [2, 32], strides = [1, 1]} : vector<2x128xf32> to vector<2x32xf32>
    %520 = arith.mulf %519, %481 : vector<2x32xf32>
    %521 = vector.extract_strided_slice %517 {offsets = [0, 0], sizes = [2, 32], strides = [1, 1]} : vector<2x128xf32> to vector<2x32xf32>
    %522 = vector.extract_strided_slice %518 {offsets = [0, 64], sizes = [2, 32], strides = [1, 1]} : vector<2x128xf32> to vector<2x32xf32>
    %523 = arith.mulf %521, %522 : vector<2x32xf32>
    %524 = arith.addf %520, %523 : vector<2x32xf32>
    %525 = vector.extract_strided_slice %517 {offsets = [0, 96], sizes = [2, 32], strides = [1, 1]} : vector<2x128xf32> to vector<2x32xf32>
    %526 = math.tanh %524 : vector<2x32xf32>
    %527 = arith.mulf %525, %526 : vector<2x32xf32>
    %cst_109 = arith.constant dense<0.000000e+00> : vector<2x32xf32>
    %528 = tpu.matmul %527, %297, %cst_109 {dimension_numbers = #tpu.dot_dimension_numbers<[1], [0], [0], [1], [0, 0, 1, 1], [], []>} : vector<2x32xf32>, vector<32x32xf32>, vector<2x32xf32> -> vector<2x32xf32>
    %529 = vector.shape_cast %528 : vector<2x32xf32> to vector<2x1x32xf32>
    %530 = vector.broadcast %529 : vector<2x1x32xf32> to vector<2x8x32xf32>
    %531 = arith.addf %303, %530 : vector<2x8x32xf32>
    %532 = math.tanh %531 : vector<2x8x32xf32>
    %533 = vector.broadcast %305 : vector<1x1x32xf32> to vector<2x8x32xf32>
    %534 = arith.mulf %532, %533 : vector<2x8x32xf32>
    %cst_110 = arith.constant dense<0.000000e+00> : vector<2x8xf32>
    %535 = vector.multi_reduction <add>, %534, %cst_110 [2] : vector<2x8x32xf32> to vector<2x8xf32>
    %536 = arith.mulf %535, %5 : vector<2x8xf32>
    %cst_111 = arith.constant dense<0xFF800000> : vector<2xf32>
    %537 = vector.multi_reduction <maximumf>, %536, %cst_111 [1] : vector<2x8xf32> to vector<2xf32>
    %538 = vector.shape_cast %537 : vector<2xf32> to vector<2x1xf32>
    %539 = vector.broadcast %538 : vector<2x1xf32> to vector<2x8xf32>
    %540 = arith.subf %536, %539 : vector<2x8xf32>
    %541 = math.exp %540 : vector<2x8xf32>
    %cst_112 = arith.constant dense<0.000000e+00> : vector<2xf32>
    %542 = vector.multi_reduction <add>, %541, %cst_112 [1] : vector<2x8xf32> to vector<2xf32>
    %543 = vector.shape_cast %542 : vector<2xf32> to vector<2x1xf32>
    %544 = tpu.reciprocal %543 {approx = true} : vector<2x1xf32> -> vector<2x1xf32>
    %545 = vector.broadcast %544 : vector<2x1xf32> to vector<2x8xf32>
    %546 = arith.mulf %541, %545 : vector<2x8xf32>
    %547 = vector.shape_cast %546 : vector<2x8xf32> to vector<2x8x1xf32>
    %548 = vector.broadcast %547 : vector<2x8x1xf32> to vector<2x8x32xf32>
    %549 = arith.mulf %548, %295 : vector<2x8x32xf32>
    %cst_113 = arith.constant dense<0.000000e+00> : vector<2x32xf32>
    %550 = vector.multi_reduction <add>, %549, %cst_113 [1] : vector<2x8x32xf32> to vector<2x32xf32>
    %cst_114 = arith.constant dense<0.000000e+00> : vector<2x128xf32>
    %551 = tpu.matmul %527, %308, %cst_114 {dimension_numbers = #tpu.dot_dimension_numbers<[1], [0], [0], [1], [0, 0, 1, 1], [], []>} : vector<2x32xf32>, vector<32x128xf32>, vector<2x128xf32> -> vector<2x128xf32>
    %cst_115 = arith.constant dense<0.000000e+00> : vector<2x128xf32>
    %552 = tpu.matmul %550, %309, %cst_115 {dimension_numbers = #tpu.dot_dimension_numbers<[1], [0], [0], [1], [0, 0, 1, 1], [], []>} : vector<2x32xf32>, vector<32x128xf32>, vector<2x128xf32> -> vector<2x128xf32>
    %553 = arith.addf %551, %552 : vector<2x128xf32>
    %554 = vector.broadcast %310 : vector<1x128xf32> to vector<2x128xf32>
    %555 = arith.addf %553, %554 : vector<2x128xf32>
    %556 = arith.negf %555 : vector<2x128xf32>
    %557 = math.exp %556 : vector<2x128xf32>
    %cst_116 = arith.constant 1.000000e+00 : f32
    %558 = vector.broadcast %cst_116 : f32 to vector<2x128xf32>
    %559 = arith.addf %558, %557 : vector<2x128xf32>
    %560 = arith.divf %558, %559 : vector<2x128xf32>
    %561 = math.tanh %555 : vector<2x128xf32>
    %562 = vector.extract_strided_slice %560 {offsets = [0, 32], sizes = [2, 32], strides = [1, 1]} : vector<2x128xf32> to vector<2x32xf32>
    %563 = arith.mulf %562, %524 : vector<2x32xf32>
    %564 = vector.extract_strided_slice %560 {offsets = [0, 0], sizes = [2, 32], strides = [1, 1]} : vector<2x128xf32> to vector<2x32xf32>
    %565 = vector.extract_strided_slice %561 {offsets = [0, 64], sizes = [2, 32], strides = [1, 1]} : vector<2x128xf32> to vector<2x32xf32>
    %566 = arith.mulf %564, %565 : vector<2x32xf32>
    %567 = arith.addf %563, %566 : vector<2x32xf32>
    %568 = vector.extract_strided_slice %560 {offsets = [0, 96], sizes = [2, 32], strides = [1, 1]} : vector<2x128xf32> to vector<2x32xf32>
    %569 = math.tanh %567 : vector<2x32xf32>
    %570 = arith.mulf %568, %569 : vector<2x32xf32>
    %cst_117 = arith.constant dense<0.000000e+00> : vector<2x32xf32>
    %571 = tpu.matmul %570, %297, %cst_117 {dimension_numbers = #tpu.dot_dimension_numbers<[1], [0], [0], [1], [0, 0, 1, 1], [], []>} : vector<2x32xf32>, vector<32x32xf32>, vector<2x32xf32> -> vector<2x32xf32>
    %572 = vector.shape_cast %571 : vector<2x32xf32> to vector<2x1x32xf32>
    %573 = vector.broadcast %572 : vector<2x1x32xf32> to vector<2x8x32xf32>
    %574 = arith.addf %303, %573 : vector<2x8x32xf32>
    %575 = math.tanh %574 : vector<2x8x32xf32>
    %576 = vector.broadcast %305 : vector<1x1x32xf32> to vector<2x8x32xf32>
    %577 = arith.mulf %575, %576 : vector<2x8x32xf32>
    %cst_118 = arith.constant dense<0.000000e+00> : vector<2x8xf32>
    %578 = vector.multi_reduction <add>, %577, %cst_118 [2] : vector<2x8x32xf32> to vector<2x8xf32>
    %579 = arith.mulf %578, %5 : vector<2x8xf32>
    %cst_119 = arith.constant dense<0xFF800000> : vector<2xf32>
    %580 = vector.multi_reduction <maximumf>, %579, %cst_119 [1] : vector<2x8xf32> to vector<2xf32>
    %581 = vector.shape_cast %580 : vector<2xf32> to vector<2x1xf32>
    %582 = vector.broadcast %581 : vector<2x1xf32> to vector<2x8xf32>
    %583 = arith.subf %579, %582 : vector<2x8xf32>
    %584 = math.exp %583 : vector<2x8xf32>
    %cst_120 = arith.constant dense<0.000000e+00> : vector<2xf32>
    %585 = vector.multi_reduction <add>, %584, %cst_120 [1] : vector<2x8xf32> to vector<2xf32>
    %586 = vector.shape_cast %585 : vector<2xf32> to vector<2x1xf32>
    %587 = tpu.reciprocal %586 {approx = true} : vector<2x1xf32> -> vector<2x1xf32>
    %588 = vector.broadcast %587 : vector<2x1xf32> to vector<2x8xf32>
    %589 = arith.mulf %584, %588 : vector<2x8xf32>
    %590 = vector.shape_cast %589 : vector<2x8xf32> to vector<2x8x1xf32>
    %591 = vector.broadcast %590 : vector<2x8x1xf32> to vector<2x8x32xf32>
    %592 = arith.mulf %591, %295 : vector<2x8x32xf32>
    %cst_121 = arith.constant dense<0.000000e+00> : vector<2x32xf32>
    %593 = vector.multi_reduction <add>, %592, %cst_121 [1] : vector<2x8x32xf32> to vector<2x32xf32>
    %cst_122 = arith.constant dense<0.000000e+00> : vector<2x128xf32>
    %594 = tpu.matmul %570, %308, %cst_122 {dimension_numbers = #tpu.dot_dimension_numbers<[1], [0], [0], [1], [0, 0, 1, 1], [], []>} : vector<2x32xf32>, vector<32x128xf32>, vector<2x128xf32> -> vector<2x128xf32>
    %cst_123 = arith.constant dense<0.000000e+00> : vector<2x128xf32>
    %595 = tpu.matmul %593, %309, %cst_123 {dimension_numbers = #tpu.dot_dimension_numbers<[1], [0], [0], [1], [0, 0, 1, 1], [], []>} : vector<2x32xf32>, vector<32x128xf32>, vector<2x128xf32> -> vector<2x128xf32>
    %596 = arith.addf %594, %595 : vector<2x128xf32>
    %597 = vector.broadcast %310 : vector<1x128xf32> to vector<2x128xf32>
    %598 = arith.addf %596, %597 : vector<2x128xf32>
    %599 = arith.negf %598 : vector<2x128xf32>
    %600 = math.exp %599 : vector<2x128xf32>
    %cst_124 = arith.constant 1.000000e+00 : f32
    %601 = vector.broadcast %cst_124 : f32 to vector<2x128xf32>
    %602 = arith.addf %601, %600 : vector<2x128xf32>
    %603 = arith.divf %601, %602 : vector<2x128xf32>
    %604 = math.tanh %598 : vector<2x128xf32>
    %605 = vector.extract_strided_slice %603 {offsets = [0, 32], sizes = [2, 32], strides = [1, 1]} : vector<2x128xf32> to vector<2x32xf32>
    %606 = arith.mulf %605, %567 : vector<2x32xf32>
    %607 = vector.extract_strided_slice %603 {offsets = [0, 0], sizes = [2, 32], strides = [1, 1]} : vector<2x128xf32> to vector<2x32xf32>
    %608 = vector.extract_strided_slice %604 {offsets = [0, 64], sizes = [2, 32], strides = [1, 1]} : vector<2x128xf32> to vector<2x32xf32>
    %609 = arith.mulf %607, %608 : vector<2x32xf32>
    %610 = arith.addf %606, %609 : vector<2x32xf32>
    %611 = vector.extract_strided_slice %603 {offsets = [0, 96], sizes = [2, 32], strides = [1, 1]} : vector<2x128xf32> to vector<2x32xf32>
    %612 = math.tanh %610 : vector<2x32xf32>
    %613 = arith.mulf %611, %612 : vector<2x32xf32>
    %cst_125 = arith.constant dense<0.000000e+00> : vector<2x32xf32>
    %614 = tpu.matmul %613, %297, %cst_125 {dimension_numbers = #tpu.dot_dimension_numbers<[1], [0], [0], [1], [0, 0, 1, 1], [], []>} : vector<2x32xf32>, vector<32x32xf32>, vector<2x32xf32> -> vector<2x32xf32>
    %615 = vector.shape_cast %614 : vector<2x32xf32> to vector<2x1x32xf32>
    %616 = vector.broadcast %615 : vector<2x1x32xf32> to vector<2x8x32xf32>
    %617 = arith.addf %303, %616 : vector<2x8x32xf32>
    %618 = math.tanh %617 : vector<2x8x32xf32>
    %619 = vector.broadcast %305 : vector<1x1x32xf32> to vector<2x8x32xf32>
    %620 = arith.mulf %618, %619 : vector<2x8x32xf32>
    %cst_126 = arith.constant dense<0.000000e+00> : vector<2x8xf32>
    %621 = vector.multi_reduction <add>, %620, %cst_126 [2] : vector<2x8x32xf32> to vector<2x8xf32>
    %622 = arith.mulf %621, %5 : vector<2x8xf32>
    %cst_127 = arith.constant dense<0xFF800000> : vector<2xf32>
    %623 = vector.multi_reduction <maximumf>, %622, %cst_127 [1] : vector<2x8xf32> to vector<2xf32>
    %624 = vector.shape_cast %623 : vector<2xf32> to vector<2x1xf32>
    %625 = vector.broadcast %624 : vector<2x1xf32> to vector<2x8xf32>
    %626 = arith.subf %622, %625 : vector<2x8xf32>
    %627 = math.exp %626 : vector<2x8xf32>
    %cst_128 = arith.constant dense<0.000000e+00> : vector<2xf32>
    %628 = vector.multi_reduction <add>, %627, %cst_128 [1] : vector<2x8xf32> to vector<2xf32>
    %629 = vector.shape_cast %628 : vector<2xf32> to vector<2x1xf32>
    %630 = tpu.reciprocal %629 {approx = true} : vector<2x1xf32> -> vector<2x1xf32>
    %631 = vector.broadcast %630 : vector<2x1xf32> to vector<2x8xf32>
    %632 = arith.mulf %627, %631 : vector<2x8xf32>
    %633 = vector.shape_cast %632 : vector<2x8xf32> to vector<2x8x1xf32>
    %634 = vector.broadcast %633 : vector<2x8x1xf32> to vector<2x8x32xf32>
    %635 = arith.mulf %634, %295 : vector<2x8x32xf32>
    %cst_129 = arith.constant dense<0.000000e+00> : vector<2x32xf32>
    %636 = vector.multi_reduction <add>, %635, %cst_129 [1] : vector<2x8x32xf32> to vector<2x32xf32>
    %cst_130 = arith.constant dense<0.000000e+00> : vector<2x128xf32>
    %637 = tpu.matmul %613, %308, %cst_130 {dimension_numbers = #tpu.dot_dimension_numbers<[1], [0], [0], [1], [0, 0, 1, 1], [], []>} : vector<2x32xf32>, vector<32x128xf32>, vector<2x128xf32> -> vector<2x128xf32>
    %cst_131 = arith.constant dense<0.000000e+00> : vector<2x128xf32>
    %638 = tpu.matmul %636, %309, %cst_131 {dimension_numbers = #tpu.dot_dimension_numbers<[1], [0], [0], [1], [0, 0, 1, 1], [], []>} : vector<2x32xf32>, vector<32x128xf32>, vector<2x128xf32> -> vector<2x128xf32>
    %639 = arith.addf %637, %638 : vector<2x128xf32>
    %640 = vector.broadcast %310 : vector<1x128xf32> to vector<2x128xf32>
    %641 = arith.addf %639, %640 : vector<2x128xf32>
    %642 = arith.negf %641 : vector<2x128xf32>
    %643 = math.exp %642 : vector<2x128xf32>
    %cst_132 = arith.constant 1.000000e+00 : f32
    %644 = vector.broadcast %cst_132 : f32 to vector<2x128xf32>
    %645 = arith.addf %644, %643 : vector<2x128xf32>
    %646 = arith.divf %644, %645 : vector<2x128xf32>
    %647 = math.tanh %641 : vector<2x128xf32>
    %648 = vector.extract_strided_slice %646 {offsets = [0, 32], sizes = [2, 32], strides = [1, 1]} : vector<2x128xf32> to vector<2x32xf32>
    %649 = arith.mulf %648, %610 : vector<2x32xf32>
    %650 = vector.extract_strided_slice %646 {offsets = [0, 0], sizes = [2, 32], strides = [1, 1]} : vector<2x128xf32> to vector<2x32xf32>
    %651 = vector.extract_strided_slice %647 {offsets = [0, 64], sizes = [2, 32], strides = [1, 1]} : vector<2x128xf32> to vector<2x32xf32>
    %652 = arith.mulf %650, %651 : vector<2x32xf32>
    %653 = arith.addf %649, %652 : vector<2x32xf32>
    %654 = vector.extract_strided_slice %646 {offsets = [0, 96], sizes = [2, 32], strides = [1, 1]} : vector<2x128xf32> to vector<2x32xf32>
    %655 = math.tanh %653 : vector<2x32xf32>
    %656 = arith.mulf %654, %655 : vector<2x32xf32>
    %cst_133 = arith.constant dense<0.000000e+00> : vector<2x32xf32>
    %657 = tpu.matmul %656, %297, %cst_133 {dimension_numbers = #tpu.dot_dimension_numbers<[1], [0], [0], [1], [0, 0, 1, 1], [], []>} : vector<2x32xf32>, vector<32x32xf32>, vector<2x32xf32> -> vector<2x32xf32>
    %658 = vector.shape_cast %657 : vector<2x32xf32> to vector<2x1x32xf32>
    %659 = vector.broadcast %658 : vector<2x1x32xf32> to vector<2x8x32xf32>
    %660 = arith.addf %303, %659 : vector<2x8x32xf32>
    %661 = math.tanh %660 : vector<2x8x32xf32>
    %662 = vector.broadcast %305 : vector<1x1x32xf32> to vector<2x8x32xf32>
    %663 = arith.mulf %661, %662 : vector<2x8x32xf32>
    %cst_134 = arith.constant dense<0.000000e+00> : vector<2x8xf32>
    %664 = vector.multi_reduction <add>, %663, %cst_134 [2] : vector<2x8x32xf32> to vector<2x8xf32>
    %665 = arith.mulf %664, %5 : vector<2x8xf32>
    %cst_135 = arith.constant dense<0xFF800000> : vector<2xf32>
    %666 = vector.multi_reduction <maximumf>, %665, %cst_135 [1] : vector<2x8xf32> to vector<2xf32>
    %667 = vector.shape_cast %666 : vector<2xf32> to vector<2x1xf32>
    %668 = vector.broadcast %667 : vector<2x1xf32> to vector<2x8xf32>
    %669 = arith.subf %665, %668 : vector<2x8xf32>
    %670 = math.exp %669 : vector<2x8xf32>
    %cst_136 = arith.constant dense<0.000000e+00> : vector<2xf32>
    %671 = vector.multi_reduction <add>, %670, %cst_136 [1] : vector<2x8xf32> to vector<2xf32>
    %672 = vector.shape_cast %671 : vector<2xf32> to vector<2x1xf32>
    %673 = tpu.reciprocal %672 {approx = true} : vector<2x1xf32> -> vector<2x1xf32>
    %674 = vector.broadcast %673 : vector<2x1xf32> to vector<2x8xf32>
    %675 = arith.mulf %670, %674 : vector<2x8xf32>
    %676 = vector.shape_cast %675 : vector<2x8xf32> to vector<2x8x1xf32>
    %677 = vector.broadcast %676 : vector<2x8x1xf32> to vector<2x8x32xf32>
    %678 = arith.mulf %677, %295 : vector<2x8x32xf32>
    %cst_137 = arith.constant dense<0.000000e+00> : vector<2x32xf32>
    %679 = vector.multi_reduction <add>, %678, %cst_137 [1] : vector<2x8x32xf32> to vector<2x32xf32>
    %680 = vector.shape_cast %355 : vector<2x32xf32> to vector<2x1x32xf32>
    %681 = vector.shape_cast %398 : vector<2x32xf32> to vector<2x1x32xf32>
    %682 = vector.shape_cast %441 : vector<2x32xf32> to vector<2x1x32xf32>
    %683 = vector.shape_cast %484 : vector<2x32xf32> to vector<2x1x32xf32>
    %684 = vector.shape_cast %527 : vector<2x32xf32> to vector<2x1x32xf32>
    %685 = vector.shape_cast %570 : vector<2x32xf32> to vector<2x1x32xf32>
    %686 = vector.shape_cast %613 : vector<2x32xf32> to vector<2x1x32xf32>
    %687 = vector.shape_cast %656 : vector<2x32xf32> to vector<2x1x32xf32>
    %688 = tpu.concatenate %680, %681, %682, %683, %684, %685, %686, %687 in 1 : vector<2x1x32xf32>, vector<2x1x32xf32>, vector<2x1x32xf32>, vector<2x1x32xf32>, vector<2x1x32xf32>, vector<2x1x32xf32>, vector<2x1x32xf32>, vector<2x1x32xf32> -> vector<2x8x32xf32>
    %689 = vector.shape_cast %688 : vector<2x8x32xf32> to vector<16x32xf32>
    %690 = vector.shape_cast %378 : vector<2x32xf32> to vector<2x1x32xf32>
    %691 = vector.shape_cast %421 : vector<2x32xf32> to vector<2x1x32xf32>
    %692 = vector.shape_cast %464 : vector<2x32xf32> to vector<2x1x32xf32>
    %693 = vector.shape_cast %507 : vector<2x32xf32> to vector<2x1x32xf32>
    %694 = vector.shape_cast %550 : vector<2x32xf32> to vector<2x1x32xf32>
    %695 = vector.shape_cast %593 : vector<2x32xf32> to vector<2x1x32xf32>
    %696 = vector.shape_cast %636 : vector<2x32xf32> to vector<2x1x32xf32>
    %697 = vector.shape_cast %679 : vector<2x32xf32> to vector<2x1x32xf32>
    %698 = tpu.concatenate %690, %691, %692, %693, %694, %695, %696, %697 in 1 : vector<2x1x32xf32>, vector<2x1x32xf32>, vector<2x1x32xf32>, vector<2x1x32xf32>, vector<2x1x32xf32>, vector<2x1x32xf32>, vector<2x1x32xf32>, vector<2x1x32xf32> -> vector<2x8x32xf32>
    %699 = vector.shape_cast %698 : vector<2x8x32xf32> to vector<16x32xf32>
    %c0_138 = arith.constant 0 : index
    %c0_139 = arith.constant 0 : index
    %700 = vector.load %arg13[%c0_138, %c0_139] : memref<64x64xf32, #tpu.memory_space<vmem>>, vector<32x64xf32>
    %cst_140 = arith.constant dense<0.000000e+00> : vector<16x64xf32>
    %701 = tpu.matmul %689, %700, %cst_140 {dimension_numbers = #tpu.dot_dimension_numbers<[1], [0], [0], [1], [0, 0, 1, 1], [], []>} : vector<16x32xf32>, vector<32x64xf32>, vector<16x64xf32> -> vector<16x64xf32>
    %c32_141 = arith.constant 32 : index
    %c0_142 = arith.constant 0 : index
    %702 = vector.load %arg13[%c32_141, %c0_142] : memref<64x64xf32, #tpu.memory_space<vmem>>, vector<32x64xf32>
    %cst_143 = arith.constant dense<0.000000e+00> : vector<16x64xf32>
    %703 = tpu.matmul %699, %702, %cst_143 {dimension_numbers = #tpu.dot_dimension_numbers<[1], [0], [0], [1], [0, 0, 1, 1], [], []>} : vector<16x32xf32>, vector<32x64xf32>, vector<16x64xf32> -> vector<16x64xf32>
    %704 = arith.addf %701, %703 : vector<16x64xf32>
    %c0_144 = arith.constant 0 : index
    %c0_145 = arith.constant 0 : index
    %705 = vector.load %arg14[%c0_144, %c0_145] : memref<1x64xf32, #tpu.memory_space<vmem>>, vector<1x64xf32>
    %706 = vector.broadcast %705 : vector<1x64xf32> to vector<16x64xf32>
    %707 = arith.addf %704, %706 : vector<16x64xf32>
    %cst_146 = arith.constant 0.000000e+00 : f32
    %708 = vector.broadcast %cst_146 : f32 to vector<16x64xf32>
    %709 = arith.maximumf %707, %708 : vector<16x64xf32>
    %c0_147 = arith.constant 0 : index
    %c0_148 = arith.constant 0 : index
    %710 = vector.load %arg15[%c0_147, %c0_148] : memref<64x16xf32, #tpu.memory_space<vmem>>, vector<64x16xf32>
    %cst_149 = arith.constant dense<0.000000e+00> : vector<16x16xf32>
    %711 = tpu.matmul %709, %710, %cst_149 {dimension_numbers = #tpu.dot_dimension_numbers<[1], [0], [0], [1], [0, 0, 1, 1], [], []>} : vector<16x64xf32>, vector<64x16xf32>, vector<16x16xf32> -> vector<16x16xf32>
    %c0_150 = arith.constant 0 : index
    %c0_151 = arith.constant 0 : index
    %712 = vector.load %arg16[%c0_150, %c0_151] : memref<1x16xf32, #tpu.memory_space<vmem>>, vector<1x16xf32>
    %713 = vector.broadcast %712 : vector<1x16xf32> to vector<16x16xf32>
    %714 = arith.addf %711, %713 : vector<16x16xf32>
    %715 = vector.shape_cast %714 : vector<16x16xf32> to vector<2x8x16xf32>
    %716 = vector.shape_cast %5 : vector<2x8xf32> to vector<2x8x1xf32>
    %cst_152 = arith.constant 0.000000e+00 : f32
    %717 = vector.broadcast %cst_152 : f32 to vector<2x8x1xf32>
    %718 = arith.cmpf ogt, %716, %717 : vector<2x8x1xf32>
    %cst_153 = arith.constant 0.000000e+00 : f32
    %719 = vector.shape_cast %718 : vector<2x8x1xi1> to vector<2x8x1xi1>
    %720 = vector.broadcast %719 : vector<2x8x1xi1> to vector<2x8x16xi1>
    %721 = vector.broadcast %cst_153 : f32 to vector<2x8x16xf32>
    %722 = arith.select %720, %715, %721 : vector<2x8x16xi1>, vector<2x8x16xf32>
    %c0_154 = arith.constant 0 : index
    %c0_155 = arith.constant 0 : index
    %c0_156 = arith.constant 0 : index
    %723 = vector.load %arg17[%c0_154, %c0_155, %c0_156] : memref<2x8x16xf32, #tpu.memory_space<vmem>>, vector<2x8x16xf32>
    tpu.vector_store %arg17[%c0_154, %c0_155, %c0_156], %722 {strides = array<i32>} : memref<2x8x16xf32, #tpu.memory_space<vmem>>, vector<2x8x16xf32>,
    %724 = vector.shape_cast %374 : vector<2x8xf32> to vector<2x1x8xf32>
    %725 = vector.shape_cast %417 : vector<2x8xf32> to vector<2x1x8xf32>
    %726 = vector.shape_cast %460 : vector<2x8xf32> to vector<2x1x8xf32>
    %727 = vector.shape_cast %503 : vector<2x8xf32> to vector<2x1x8xf32>
    %728 = vector.shape_cast %546 : vector<2x8xf32> to vector<2x1x8xf32>
    %729 = vector.shape_cast %589 : vector<2x8xf32> to vector<2x1x8xf32>
    %730 = vector.shape_cast %632 : vector<2x8xf32> to vector<2x1x8xf32>
    %731 = vector.shape_cast %675 : vector<2x8xf32> to vector<2x1x8xf32>
    %732 = tpu.concatenate %724, %725, %726, %727, %728, %729, %730, %731 in 1 : vector<2x1x8xf32>, vector<2x1x8xf32>, vector<2x1x8xf32>, vector<2x1x8xf32>, vector<2x1x8xf32>, vector<2x1x8xf32>, vector<2x1x8xf32>, vector<2x1x8xf32> -> vector<2x8x8xf32>
    %733 = vector.shape_cast %5 : vector<2x8xf32> to vector<2x1x8xf32>
    %734 = vector.broadcast %716 : vector<2x8x1xf32> to vector<2x8x8xf32>
    %735 = vector.broadcast %733 : vector<2x1x8xf32> to vector<2x8x8xf32>
    %736 = arith.mulf %734, %735 : vector<2x8x8xf32>
    %cst_157 = arith.constant 0.000000e+00 : f32
    %737 = vector.broadcast %cst_157 : f32 to vector<2x8x8xf32>
    %738 = arith.cmpf ogt, %736, %737 : vector<2x8x8xf32>
    %cst_158 = arith.constant 1.000000e-10 : f32
    %739 = vector.broadcast %cst_158 : f32 to vector<2x8x8xf32>
    %740 = arith.select %738, %732, %739 : vector<2x8x8xi1>, vector<2x8x8xf32>
    %c0_159 = arith.constant 0 : index
    %c0_160 = arith.constant 0 : index
    %c0_161 = arith.constant 0 : index
    %741 = vector.load %arg18[%c0_159, %c0_160, %c0_161] : memref<2x8x8xf32, #tpu.memory_space<vmem>>, vector<2x8x8xf32>
    tpu.vector_store %arg18[%c0_159, %c0_160, %c0_161], %740 {strides = array<i32>} : memref<2x8x8xf32, #tpu.memory_space<vmem>>, vector<2x8x8xf32>,
    return
  }
}

</mosaic_0001>

<bundles_post_ra>
// kernel: tpu_custom_call.1
= control target key start
LH: loop header
LB: loop body
LE: loop exit
PB: predicated region body
PF: predicated region fallthrough
CT: control target
= control target key end

     0   :  { %s8864_s0 = inlined_call_operand.hbm [shape: f32[2,8,16], index: 0, kind: input, shape index: {}]   ;;  %s8865_s1 = inlined_call_operand.vmem [shape: s32[2,1], index: 1, kind: input, shape index: {}]   ;;  %s8866_s2 = inlined_call_operand.hbm [shape: f32[16,128], index: 2, kind: input, shape index: {}]   ;;  %s8867_s3 = inlined_call_operand.vmem [shape: f32[32,128], index: 3, kind: input, shape index: {}]   ;;  %s8868_s4 = inlined_call_operand.vmem [shape: f32[1,128], index: 4, kind: input, shape index: {}]   ;;  %s8869_s5 = inlined_call_operand.vmem [shape: f32[1,32], index: 5, kind: input, shape index: {}]   ;;  %s8870_s6 = inlined_call_operand.hbm [shape: f32[1,32], index: 6, kind: input, shape index: {}]   ;;  %s8871_s7 = inlined_call_operand.vmem [shape: f32[64,32], index: 7, kind: input, shape index: {}]   ;;  %s8872_s8 = inlined_call_operand.hbm [shape: f32[1,32], index: 8, kind: input, shape index: {}]   ;;  %s8873_s9 = inlined_call_operand.vmem [shape: f32[1,32], index: 9, kind: input, shape index: {}]   ;;  %s8874_s10 = inlined_call_operand.vmem [shape: f32[64,128], index: 10, kind: input, shape index: {}]   ;;  %s8875_s11 = inlined_call_operand.vmem [shape: f32[32,128], index: 11, kind: input, shape index: {}]   ;;  %s8876_s12 = inlined_call_operand.vmem [shape: f32[1,128], index: 12, kind: input, shape index: {}]   ;;  %s8877_s13 = inlined_call_operand.vmem [shape: f32[64,64], index: 13, kind: input, shape index: {}]   ;;  %s8878_s14 = inlined_call_operand.vmem [shape: f32[1,64], index: 14, kind: input, shape index: {}]   ;;  %s8879_s15 = inlined_call_operand.vmem [shape: f32[64,16], index: 15, kind: input, shape index: {}]   ;;  %s8880_s16 = inlined_call_operand.vmem [shape: f32[1,16], index: 16, kind: input, shape index: {}]   ;;  %s8881_s17 = inlined_call_operand.hbm [shape: f32[2,8,16], index: 17, kind: output, shape index: {0}]   ;;  %s8882_s18 = inlined_call_operand.hbm [shape: f32[2,8,8], index: 18, kind: output, shape index: {1}]  }
   0x1   :  { %8886 = sst [smem:[#allocation18_spill]] %s8864_s0 }
   0x2   :  { %8887 = sst [smem:[#allocation19_spill]] %s8865_s1 }
   0x3   :  { %8888 = sst [smem:[#allocation20_spill]] %s8866_s2 }
   0x4   :  { %8889 = sst [smem:[#allocation21_spill]] %s8880_s16 }
   0x5   :  { %8890 = sst [smem:[#allocation22_spill]] %s8881_s17 }
   0x6   :  { %24 = vsyncpa [#allocation3], 0 }
   0x7   :  { %25 = vsyncpa [#allocation6], 0 }
   0x8   :  { %26 = vsyncpa [#allocation9], 0 }
   0x9   :  { %27 = vsyncpa [#allocation4], 0 }
   0xa   :  { %28 = vsyncpa [#allocation12], 0  ;;  %s7266_s27 = smov [#allocation5]   ;;  %s7267_s29 = smov [#allocation2]  }
   0xb   :  { %s48_s28 = sshll.u32 %s7266_s27, 4  ;;  %s34_s30 = sshll.u32 %s7267_s29, 4  ;;  %s49_s28 = int_to_ptr.vmem [resolvable:$true] %s48_s28  ;;  %s7384_s30 = int_to_ptr.vmem [resolvable:$true] %s34_s30 }
   0xc   :  { %s8891_s1 = sld [smem:[#allocation20_spill]] }
  0x12   :  { %s7124_s20 = scalar_lea.hbm %s8891_s1, 256 }
  0x13   :  { %p7125_p0 = scmp.ne.s32.totalorder %s8891_s1, %s7124_s20  ;;  %p7128_p1 = scmp.lt.u32.totalorder %s7124_s20, %s8891_s1 }
  0x15   :  { %p7130_p2 = pnand %p7128_p1, %p7125_p0 }
  0x17   :  { %7133 = shalt.err (!%p7130_p2)
}
  0x18   :  { %s7134_s24 = scalar_lea.vmem %s49_s28, 256  ;;  %p7139_p4 = scmp.lt.s32.totalorder %s49_s28, %s49_s28 }
  0x19   :  { %p7135_p3 = scmp.ne.s32.totalorder %s49_s28, %s7134_s24  ;;  %p7140_p5 = scmp.lt.s32.totalorder %s7134_s24, %s7134_s24 }
  0x1b   :  { %p7141_p6 = por %p7140_p5, %p7139_p4 }
  0x1d   :  { %p7142_p7 = pnand %p7141_p6, %p7135_p3 }
  0x1f   :  { %7145 = shalt.err (!%p7142_p7)
}
  0x20   :  { %s7268_s25 = smov 128   ;;  %s7269_s26 = smov 8  }
  0x21   :  { %54 = dma.hbm_to_vmem [thread:$0]  %s8891_s1, 256, %s49_s28, [#allocation6], %s7268_s25, %s7268_s25, %s7269_s26  }
  0x22   :  { %s8892_s20 = sld [smem:[#allocation18_spill]] }
  0x28   :  { %s7146_s21 = scalar_lea.hbm %s8892_s20, 256 }
  0x29   :  { %p7147_p8 = scmp.ne.s32.totalorder %s8892_s20, %s7146_s21  ;;  %p7150_p9 = scmp.lt.u32.totalorder %s7146_s21, %s8892_s20 }
  0x2b   :  { %p7152_p10 = pnand %p7150_p9, %p7147_p8 }
  0x2d   :  { %7155 = shalt.err (!%p7152_p10)
}
  0x2e   :  { %s7156_s17 = scalar_lea.vmem %s7384_s30, 256  ;;  %p7161_p12 = scmp.lt.s32.totalorder %s7384_s30, %s7384_s30 }
  0x2f   :  { %p7157_p11 = scmp.ne.s32.totalorder %s7384_s30, %s7156_s17  ;;  %p7162_p13 = scmp.lt.s32.totalorder %s7156_s17, %s7156_s17 }
  0x31   :  { %p7163_p0 = por %p7162_p13, %p7161_p12 }
  0x33   :  { %p7164_p1 = pnand %p7163_p0, %p7157_p11 }
  0x35   :  { %7167 = shalt.err (!%p7164_p1)
}
  0x36   :  { %40 = dma.hbm_to_vmem [thread:$0]  %s8892_s20, 256, %s7384_s30, [#allocation3], %s7268_s25, %s7268_s25, %s7269_s26  }
  0x37   :  { %s7270_s27 = smov [#allocation7]   ;;  %s7271_s0 = smov [#allocation8]  }
  0x38   :  { %s67_s29 = sshll.u32 %s7270_s27, 4  ;;  %s79_s19 = sshll.u32 %s7271_s0, 4  ;;  %s68_s29 = int_to_ptr.vmem [resolvable:$true] %s67_s29  ;;  %s80_s19 = int_to_ptr.vmem [resolvable:$true] %s79_s19 }
  0x39   :  { %s7168_s17 = scalar_lea.hbm %s8870_s6, 16 }
  0x3a   :  { %p7169_p2 = scmp.ne.s32.totalorder %s8870_s6, %s7168_s17  ;;  %p7172_p3 = scmp.lt.u32.totalorder %s7168_s17, %s8870_s6 }
  0x3c   :  { %p7174_p4 = pnand %p7172_p3, %p7169_p2 }
  0x3e   :  { %7177 = shalt.err (!%p7174_p4)
}
  0x3f   :  { %s7178_s30 = scalar_lea.vmem %s68_s29, 16  ;;  %s7182_s20 = scalar_lea.vmem %s68_s29, 32 }
  0x40   :  { %p7179_p5 = scmp.ne.s32.totalorder %s68_s29, %s7178_s30  ;;  %p7183_p6 = scmp.lt.s32.totalorder %s68_s29, %s68_s29 }
  0x41   :  { %p7184_p7 = scmp.lt.s32.totalorder %s7182_s20, %s7178_s30 }
  0x43   :  { %p7185_p8 = por %p7184_p7, %p7183_p6 }
  0x45   :  { %p7186_p9 = pnand %p7185_p8, %p7179_p5 }
  0x47   :  { %7189 = shalt.err (!%p7186_p9)
}
  0x48   :  { %70 = dma.hbm_to_vmem [thread:$0]  %s8870_s6, 16, %s68_s29, [#allocation6]  }
  0x49   :  { %s7190_s21 = scalar_lea.hbm %s8872_s8, 16 }
  0x4a   :  { %p7191_p10 = scmp.ne.s32.totalorder %s8872_s8, %s7190_s21  ;;  %p7194_p11 = scmp.lt.u32.totalorder %s7190_s21, %s8872_s8 }
  0x4c   :  { %p7196_p12 = pnand %p7194_p11, %p7191_p10 }
  0x4e   :  { %7199 = shalt.err (!%p7196_p12)
}
  0x4f   :  { %s7200_s23 = scalar_lea.vmem %s80_s19, 16  ;;  %s7204_s24 = scalar_lea.vmem %s80_s19, 32 }
  0x50   :  { %p7201_p13 = scmp.ne.s32.totalorder %s80_s19, %s7200_s23  ;;  %p7205_p0 = scmp.lt.s32.totalorder %s80_s19, %s80_s19 }
  0x51   :  { %p7206_p1 = scmp.lt.s32.totalorder %s7204_s24, %s7200_s23 }
  0x53   :  { %p7207_p2 = por %p7206_p1, %p7205_p0 }
  0x55   :  { %p7208_p3 = pnand %p7207_p2, %p7201_p13 }
  0x57   :  { %7211 = shalt.err (!%p7208_p3)
}
  0x58   :  { %82 = dma.hbm_to_vmem [thread:$0]  %s8872_s8, 16, %s80_s19, [#allocation9]  }
  0x59   :  { %7256 = dma.done.wait [#allocation3], 256  }
  0x5a   :  { %7257 = vsyncadd [#allocation3], 4294967040 }
  0x5b   :  { %7258 = dma.done.wait [#allocation6], 272  }
  0x5c   :  { %7259 = vsyncadd [#allocation6], 4294967024 }
  0x5d   :  { %7260 = dma.done.wait [#allocation9], 16  }
  0x5e   :  { %7261 = vsyncadd [#allocation9], 4294967280  ;;  %v7272_v0 = vmov 0.0|0.0   ;;  %vm7273_vm0 = vmmov 0   ;;  %v7274_v1 = vmov 0.0   ;;  %vm131_vm1 = vcmask 130048  }
  0x5f   :  { %6558 = vmatprep.subr.bf16.mxu1 %v7272_v0  ;;  %6147 = vmatprep.mubr.msk.f32.mxu1 %vm7273_vm0, %v7274_v1  ;;  %v122_v2 = vld [vmem:[#allocation5] sm:$0xff]  ;;  %v123_v3 = vld [vmem:[#allocation5 + $0x8] sm:$0xff]  ;;  %v213_v4 = vld [vmem:[%s8867_s3] sm:$0xff]  ;;  %v7275_v13 = vmov 0   ;;  %s7276_s16 = smov 64   ;;  %s8893_s17 = sld [smem:[#allocation19_spill]]  ;;  %v111_v39 = vlaneseq }
  0x60   :  { %v6554_v5 = vpack.c.bf16 %v123_v3, %v122_v2  ;;  %v214_v6 = vld [vmem:[%s8867_s3 + $0x8] sm:$0xff]  ;;  %v120_v7 = vld [vmem:[#allocation2] sm:$0xff]  ;;  %v215_v9 = vld [vmem:[%s8867_s3 + $0x10] sm:$0xff]  ;;  %6821 = vset.pattern.permute.xlu0 %v7275_v13  ;;  %s7277_s2 = smov 32   ;;  %vm354_vm4 = vcmask 1041409   ;;  %s7278_s23 = smov 96  }
  0x61   :  { %v7454_v8 = vpack.c.bf16 %v214_v6, %v213_v4  ;;  %6136 = vmatprep.mubr.msk.f32.mxu0 %vm131_vm1, %v120_v7  ;;  %v216_v10 = vld [vmem:[%s8867_s3 + $0x18] sm:$0xff]  ;;  %v121_v11 = vld [vmem:[#allocation2 + $0x8] sm:$0xff]  ;;  %v5863_v16 = vld [vmem:[%s8868_s4] ss:$0 sm:$0xff]  ;;  %v7502_v40 = vand.u32 127, %v111_v39  ;;  %vm217_vm5 = vcmask 261120  }
  0x62   :  { %6555 = vmatprep.subr.bf16.mxu0 %v6554_v5  ;;  %v7464_v12 = vpack.c.bf16 %v216_v10, %v215_v9  ;;  %vm1526_vm13 = vcmask 1040384   ;;  %vm1529_vm14 = vcmask 1041408   ;;  %vm1532_vm15 = vcmask 1042432  }
  0x63   :  { %6560 = vmatpush3.bf16.msra.mxu1 %v7454_v8  ;;  %6557 = vmatpush3.bf16.msra.mxu0 %v6554_v5 }
  0x64   :  { %6561 = vmatprep.subr.bf16.mxu1 %v7272_v0  ;;  %6564 = vmatprep.subr.bf16.mxu0 %v7272_v0 }
  0x65   :  { %v113_v26 = vld [vmem:[%s8893_s17] sm:$0x3] }
  0x66   :  { %6137 = vmatmul.mubr.msk.f32.vlgmr.msra.gmra.mrb[0].mxu0 %vm131_vm1, %v121_v11 }
  0x67   :  { %6563 = vmatpush3.bf16.msra.mxu1 %v7464_v12  ;;  %6566 = vmatpush3.bf16.msra.mxu0 %v7454_v8 }
  0x68   :  { %6567 = vmatprep.subr.bf16.mxu0 %v7272_v0  ;;  %6158 = vmatprep.mubr.msk.f32.mxu0 %vm7273_vm0, %v7274_v1 }
  0x69   :  { %6570 = vmatprep.subr.bf16.mxu1 %v7272_v0 }
  0x6a   :  { %6148 = vmatmul.mubr.f32.vlgmr.msra.gmra.mrb[0].mxu1 %v7274_v1 }
  0x6b   :  { %6569 = vmatpush3.bf16.msra.mxu0 %v7464_v12  ;;  %6572 = vmatpush3.bf16.msra.mxu1 %v7454_v8 }
  0x6c   :  { %6573 = vmatprep.subr.bf16.mxu1 %v7272_v0  ;;  %6169 = vmatprep.mubr.msk.f32.mxu1 %vm7273_vm0, %v7274_v1 }
  0x6d   :  { %6576 = vmatprep.subr.bf16.mxu0 %v7272_v0 }
  0x6f   :  { %6575 = vmatpush3.bf16.msra.mxu1 %v7464_v12 }
  0x70   :  { %6582 = vmatprep.subr.bf16.mxu1 %v7272_v0 }
 0x139   :  { %v6138_v14 = vpop.f32.mrb[0].mxu0 }
 0x13a   :  { %v204_v15 = vpop.f32.mrb[1].mxu0  ;;  %v7488_v17 = vadd.f32 %v6138_v14, %v5863_v16 }
 0x13b   :  { %v7490_v21 = vadd.f32 %v5863_v16, %v204_v15 }
 0x13d   :  { %v287_v18 = vpop.f32.mrb[0].mxu1 }
 0x13e   :  { %v292_v19 = vrot.slane %v287_v18, 1  ;;  %v6149_v20 = vpop.f32.mrb[1].mxu1  ;;  %v295_v23 = vadd.f32 %v287_v18, %v7490_v21 }
 0x140   :  { %v296_v22 = vadd.f32 %v292_v19, %v7488_v17  ;;  %v5866_v28 = vmul.f32 -1.442695, %v295_v23 }
 0x142   :  { %6837 = vtanh.f32 %v296_v22  ;;  %v5867_v27 = vmul.f32 -1.442695, %v296_v22 }
 0x143   :  { %6839 = vtanh.f32 %v295_v23 }
 0x144   :  { %6841 = vpow2.f32 %v5867_v27 }
 0x145   :  { %6843 = vpow2.f32 %v5866_v28  ;;  %v7279_v28 = vmov 1  }
 0x146   :  { %6822 = vset.pattern.permute.xlu1 %v7279_v28 }
 0x14c   :  { %v6838_v24 = vpop.eup %6837 }
 0x14d   :  { %317 = vrot.lane.b32.xlu0 %v6838_v24, %s7276_s16  ;;  %v6840_v25 = vpop.eup %6839 }
 0x14e   :  { %v6842_v29 = vpop.eup %6841 }
 0x14f   :  { %v304_v30 = vadd.f32 1.0, %v6842_v29  ;;  %v6844_v31 = vpop.eup %6843 }
 0x150   :  { %v303_v32 = vadd.f32 1.0, %v6844_v31 }
 0x151   :  { %315 = vrot.lane.b32.xlu0 %v6840_v25, %s7276_s16  ;;  %6845 = vrcp.f32 %v304_v30 }
 0x152   :  { %6847 = vrcp.f32 %v303_v32 }
 0x155   :  { %115 = vperm.xlu0 %6821, %v113_v26  }
 0x15b   :  { %v6846_v33 = vpop.eup %6845 }
 0x15c   :  { %v6848_v36 = vpop.eup %6847  ;;  %v312_v44 = vmul.f32 0.0, %v6846_v33 }
 0x15d   :  { %v311_v47 = vmul.f32 0.0, %v6848_v36 }
 0x1bf   :  { %v318_v34 = vpop.permute.xlu0 %317 }
 0x1c0   :  { %v322_v35 = vmul.f32 %v6846_v33, %v318_v34 }
 0x1c2   :  { %327 = vrot.lane.b32.xlu1 %v322_v35, %s7277_s2 }
 0x1c3   :  { %v316_v37 = vpop.permute.xlu0 %315 }
 0x1c4   :  { %v321_v38 = vmul.f32 %v6848_v36, %v316_v37 }
 0x1c6   :  { %325 = vrot.lane.b32.xlu1 %v321_v38, %s7277_s2 }
 0x1d4   :  { %v116_v41 = vpop.permute.xlu0 %115 }
 0x1d5   :  { %vm117_vm2 = vcmp.lt.s32.totalorder %v7502_v40, %v116_v41 }
 0x1d6   :  { %v7506_v42 = vsel %vm117_vm2, 1.0, %v7274_v1  ;;  %vm1535_vm2 = vcmask 1043456  }
 0x1d7   :  { %vm345_vm3 = vcmp.gt.f32.partialorder %v7506_v42, 0.0 }
 0x1d8   :  { %v7510_v43 = vsel %vm345_vm3, 1, %v7275_v13  ;;  %vm1538_vm3 = vcmask 1044480  }
 0x1d9   :  { %348 = vperm.xlu0 %6821, %v7510_v43  }
 0x234   :  { %v328_v45 = vpop.permute.xlu1 %327 }
 0x235   :  { %v332_v46 = vadd.f32 %v328_v45, %v312_v44 }
 0x237   :  { %6849 = vtanh.f32 %v332_v46  ;;  %v362_v49 = vrot.slane %v332_v46, 7 }
 0x238   :  { %v326_v48 = vpop.permute.xlu1 %325 }
 0x239   :  { %v331_v50 = vadd.f32 %v326_v48, %v311_v47 }
 0x23b   :  { %6851 = vtanh.f32 %v331_v50  ;;  %v363_v51 = vsel %vm354_vm4, %v362_v49, %v331_v50 }
 0x23c   :  { %364 = vrot.lane.b32.xlu0 %v363_v51, %s7278_s23 }
 0x241   :  { %v6850_v52 = vpop.eup %6849 }
 0x242   :  { %339 = vrot.lane.b32.xlu1 %v6850_v52, %s7276_s16 }
 0x245   :  { %v6852_v53 = vpop.eup %6851 }
 0x246   :  { %337 = vrot.lane.b32.xlu1 %v6852_v53, %s7276_s16 }
 0x258   :  { %v349_v60 = vpop.permute.xlu0 %348 }
 0x259   :  { %vm350_vm6 = vcmp.eq.s32.totalorder %v349_v60, 1 }
 0x2ae   :  { %v365_v7 = vpop.permute.xlu0 %364 }
 0x2af   :  { %v7540_v10 = vsel %vm350_vm6, %v365_v7, 0.0 }
 0x2b0   :  { %v471_v11 = vrot.slane %v7540_v10, 7 }
 0x2b4   :  { %v340_v54 = vpop.permute.xlu1 %339 }
 0x2b5   :  { %v7517_v55 = vmul.f32 %v6846_v33, %v340_v54 }
 0x2b7   :  { %v353_v57 = vrot.slane %v7517_v55, 7 }
 0x2b8   :  { %v338_v56 = vpop.permute.xlu1 %337 }
 0x2b9   :  { %v7520_v58 = vmul.f32 %v6848_v36, %v338_v56 }
 0x2bb   :  { %v355_v59 = vsel %vm354_vm4, %v353_v57, %v7520_v58 }
 0x2bc   :  { %356 = vrot.lane.b32.xlu1 %v355_v59, %s7277_s2 }
 0x32e   :  { %v357_v61 = vpop.permute.xlu1 %356 }
 0x32f   :  { %v7526_v62 = vsel %vm350_vm6, %v357_v61, 0.0  ;;  %vm1541_vm6 = vcmask 1045504  }
 0x330   :  { %6159 = vmatmul.mubr.msk.f32.vlgmr.msra.gmra.mrb[2].mxu0 %vm217_vm5, %v7526_v62 }
 0x331   :  { %6578 = vmatpush3.bf16.msra.mxu0 %v7454_v8  ;;  %6180 = vmatprep.mubr.msk.f32.mxu0 %vm7273_vm0, %v7274_v1 }
 0x332   :  { %6579 = vmatprep.subr.bf16.mxu0 %v7272_v0 }
 0x335   :  { %6581 = vmatpush3.bf16.msra.mxu0 %v7464_v12 }
 0x336   :  { %6588 = vmatprep.subr.bf16.mxu0 %v7272_v0 }
 0x403   :  { %v446_v63 = vpop.f32.mrb[2].mxu0 }
 0x404   :  { %v451_v2 = vrot.slane %v446_v63, 7  ;;  %v455_v3 = vadd.f32 %v446_v63, %v7488_v17  ;;  %v6160_v4 = vpop.f32.mrb[3].mxu0 }
 0x406   :  { %v454_v5 = vadd.f32 %v451_v2, %v7490_v21  ;;  %6853 = vtanh.f32 %v455_v3  ;;  %v5870_v14 = vmul.f32 -1.442695, %v455_v3 }
 0x408   :  { %6855 = vtanh.f32 %v454_v5  ;;  %v5869_v15 = vmul.f32 -1.442695, %v454_v5 }
 0x409   :  { %6857 = vpow2.f32 %v5870_v14 }
 0x40a   :  { %6859 = vpow2.f32 %v5869_v15 }
 0x410   :  { %v6854_v6 = vpop.eup %6853 }
 0x411   :  { %484 = vrot.lane.b32.xlu0 %v6854_v6, %s7276_s16 }
 0x412   :  { %v6856_v9 = vpop.eup %6855 }
 0x413   :  { %482 = vrot.lane.b32.xlu1 %v6856_v9, %s7276_s16  ;;  %v6858_v16 = vpop.eup %6857 }
 0x414   :  { %v6860_v18 = vpop.eup %6859  ;;  %v463_v19 = vadd.f32 1.0, %v6858_v16 }
 0x415   :  { %474 = vrot.lane.b32.xlu0 %v7540_v10, %s7277_s2  ;;  %v462_v20 = vadd.f32 1.0, %v6860_v18 }
 0x416   :  { %6861 = vrcp.f32 %v463_v19 }
 0x417   :  { %472 = vrot.lane.b32.xlu1 %v471_v11, %s7277_s2  ;;  %6863 = vrcp.f32 %v462_v20 }
 0x420   :  { %v6862_v22 = vpop.eup %6861 }
 0x421   :  { %v6864_v25 = vpop.eup %6863 }
 0x483   :  { %v485_v23 = vpop.permute.xlu0 %484 }
 0x484   :  { %v489_v24 = vmul.f32 %v6862_v22, %v485_v23  ;;  %v7280_v23 = vmov 2  }
 0x485   :  { %v483_v26 = vpop.permute.xlu1 %482  ;;  %6823 = vset.pattern.permute.xlu0 %v7280_v23 }
 0x486   :  { %494 = vrot.lane.b32.xlu0 %v489_v24, %s7277_s2  ;;  %v488_v27 = vmul.f32 %v6864_v25, %v483_v26 }
 0x487   :  { %v475_v29 = vpop.permute.xlu0 %474 }
 0x488   :  { %492 = vrot.lane.b32.xlu1 %v488_v27, %s7277_s2  ;;  %v479_v30 = vmul.f32 %v6862_v22, %v475_v29 }
 0x489   :  { %v473_v31 = vpop.permute.xlu1 %472 }
 0x48a   :  { %v478_v34 = vmul.f32 %v6864_v25, %v473_v31 }
 0x4f8   :  { %v495_v32 = vpop.permute.xlu0 %494 }
 0x4f9   :  { %v499_v33 = vadd.f32 %v495_v32, %v479_v30 }
 0x4fa   :  { %v493_v35 = vpop.permute.xlu1 %492 }
 0x4fb   :  { %6865 = vtanh.f32 %v499_v33  ;;  %v498_v36 = vadd.f32 %v493_v35, %v478_v34 }
 0x4fd   :  { %6867 = vtanh.f32 %v498_v36  ;;  %v526_v41 = vrot.slane %v498_v36, 1 }
 0x4ff   :  { %v527_v44 = vsel %vm354_vm4, %v499_v33, %v526_v41 }
 0x505   :  { %v6866_v37 = vpop.eup %6865 }
 0x506   :  { %506 = vrot.lane.b32.xlu0 %v6866_v37, %s7276_s16 }
 0x507   :  { %v6868_v38 = vpop.eup %6867 }
 0x508   :  { %504 = vrot.lane.b32.xlu1 %v6868_v38, %s7276_s16 }
 0x50c   :  { %513 = vperm.xlu1 %6822, %v7510_v43  }
 0x510   :  { %528 = vrot.lane.b32.xlu1 %v527_v44, %s7278_s23 }
 0x578   :  { %v507_v45 = vpop.permute.xlu0 %506 }
 0x579   :  { %v7556_v48 = vmul.f32 %v6862_v22, %v507_v45 }
 0x57a   :  { %v505_v46 = vpop.permute.xlu1 %504 }
 0x57b   :  { %v7554_v47 = vmul.f32 %v6864_v25, %v505_v46 }
 0x57d   :  { %v518_v49 = vrot.slane %v7554_v47, 1 }
 0x57f   :  { %v519_v50 = vsel %vm354_vm4, %v7556_v48, %v518_v49 }
 0x580   :  { %520 = vrot.lane.b32.xlu0 %v519_v50, %s7277_s2 }
 0x58b   :  { %v514_v51 = vpop.permute.xlu1 %513 }
 0x58c   :  { %vm515_vm7 = vcmp.eq.s32.totalorder %v514_v51, 1 }
 0x5f2   :  { %v521_v52 = vpop.permute.xlu0 %520 }
 0x5f3   :  { %v7564_v53 = vsel %vm515_vm7, %v521_v52, %v7526_v62  ;;  %v529_v62 = vpop.permute.xlu1 %528 }
 0x5f4   :  { %6170 = vmatmul.mubr.msk.f32.vlgmr.msra.gmra.mrb[2].mxu1 %vm217_vm5, %v7564_v53  ;;  %v7578_v2 = vsel %vm515_vm7, %v529_v62, %v7540_v10  ;;  %vm1544_vm7 = vcmask 1046528  }
 0x5f5   :  { %6584 = vmatpush3.bf16.msra.mxu1 %v7454_v8  ;;  %6191 = vmatprep.mubr.msk.f32.mxu1 %vm7273_vm0, %v7274_v1  ;;  %v635_v4 = vrot.slane %v7578_v2, 6  ;;  %v636_v5 = vrot.slane %v7578_v2, 7 }
 0x5f6   :  { %6585 = vmatprep.subr.bf16.mxu1 %v7272_v0 }
 0x5f9   :  { %6587 = vmatpush3.bf16.msra.mxu1 %v7464_v12 }
 0x5fa   :  { %6594 = vmatprep.subr.bf16.mxu1 %v7272_v0 }
 0x6c7   :  { %v609_v54 = vpop.f32.mrb[2].mxu1 }
 0x6c8   :  { %v614_v56 = vrot.slane %v609_v54, 6  ;;  %v615_v57 = vrot.slane %v609_v54, 7  ;;  %v6171_v59 = vpop.f32.mrb[3].mxu1 }
 0x6ca   :  { %v618_v60 = vadd.f32 %v614_v56, %v7490_v21  ;;  %v619_v61 = vadd.f32 %v615_v57, %v7488_v17 }
 0x6cc   :  { %6869 = vtanh.f32 %v618_v60  ;;  %v5872_v6 = vmul.f32 -1.442695, %v618_v60  ;;  %v5873_v7 = vmul.f32 -1.442695, %v619_v61 }
 0x6cd   :  { %6871 = vtanh.f32 %v619_v61 }
 0x6ce   :  { %6873 = vpow2.f32 %v5872_v6 }
 0x6cf   :  { %6875 = vpow2.f32 %v5873_v7 }
 0x6d6   :  { %v6870_v63 = vpop.eup %6869 }
 0x6d7   :  { %v6872_v3 = vpop.eup %6871  ;;  %647 = vrot.lane.b32.xlu0 %v6870_v63, %s7276_s16 }
 0x6d8   :  { %649 = vrot.lane.b32.xlu1 %v6872_v3, %s7276_s16  ;;  %v6874_v9 = vpop.eup %6873 }
 0x6d9   :  { %v6876_v10 = vpop.eup %6875  ;;  %v626_v11 = vadd.f32 1.0, %v6874_v9 }
 0x6da   :  { %v627_v14 = vadd.f32 1.0, %v6876_v10 }
 0x6db   :  { %637 = vrot.lane.b32.xlu0 %v635_v4, %s7277_s2  ;;  %6877 = vrcp.f32 %v626_v11 }
 0x6dc   :  { %639 = vrot.lane.b32.xlu1 %v636_v5, %s7277_s2  ;;  %6879 = vrcp.f32 %v627_v14 }
 0x6e5   :  { %v6878_v15 = vpop.eup %6877 }
 0x6e6   :  { %v6880_v18 = vpop.eup %6879 }
 0x749   :  { %v648_v16 = vpop.permute.xlu0 %647 }
 0x74a   :  { %v650_v19 = vpop.permute.xlu1 %649  ;;  %v653_v20 = vmul.f32 %v6878_v15, %v648_v16 }
 0x74b   :  { %v654_v22 = vmul.f32 %v6880_v18, %v650_v19 }
 0x74c   :  { %657 = vrot.lane.b32.xlu0 %v653_v20, %s7277_s2 }
 0x74d   :  { %659 = vrot.lane.b32.xlu1 %v654_v22, %s7277_s2  ;;  %v638_v24 = vpop.permute.xlu0 %637  ;;  %v7281_v22 = vmov 3  }
 0x74e   :  { %v640_v25 = vpop.permute.xlu1 %639  ;;  %v643_v26 = vmul.f32 %v6878_v15, %v638_v24 }
 0x74f   :  { %v644_v27 = vmul.f32 %v6880_v18, %v640_v25 }
 0x7be   :  { %v658_v28 = vpop.permute.xlu0 %657 }
 0x7bf   :  { %v660_v29 = vpop.permute.xlu1 %659  ;;  %v663_v30 = vadd.f32 %v658_v28, %v643_v26 }
 0x7c0   :  { %v664_v31 = vadd.f32 %v660_v29, %v644_v27 }
 0x7c1   :  { %6881 = vtanh.f32 %v663_v30  ;;  %v692_v32 = vrot.slane %v663_v30, 2 }
 0x7c2   :  { %6883 = vtanh.f32 %v664_v31  ;;  %v693_v33 = vrot.slane %v664_v31, 1 }
 0x7c4   :  { %v694_v34 = vsel %vm354_vm4, %v693_v33, %v692_v32 }
 0x7cb   :  { %v6882_v35 = vpop.eup %6881 }
 0x7cc   :  { %v6884_v36 = vpop.eup %6883  ;;  %669 = vrot.lane.b32.xlu0 %v6882_v35, %s7276_s16 }
 0x7cd   :  { %671 = vrot.lane.b32.xlu1 %v6884_v36, %s7276_s16 }
 0x7d0   :  { %678 = vperm.xlu0 %6823, %v7510_v43  }
 0x7d4   :  { %6824 = vset.pattern.permute.xlu0 %v7281_v22 }
 0x83e   :  { %v670_v37 = vpop.permute.xlu0 %669 }
 0x83f   :  { %v672_v38 = vpop.permute.xlu1 %671  ;;  %v7593_v41 = vmul.f32 %v6878_v15, %v670_v37 }
 0x840   :  { %v7595_v44 = vmul.f32 %v6880_v18, %v672_v38 }
 0x841   :  { %v683_v45 = vrot.slane %v7593_v41, 2 }
 0x842   :  { %v684_v46 = vrot.slane %v7595_v44, 1 }
 0x844   :  { %v685_v49 = vsel %vm354_vm4, %v684_v46, %v683_v45 }
 0x845   :  { %686 = vrot.lane.b32.xlu1 %v685_v49, %s7277_s2 }
 0x849   :  { %695 = vrot.lane.b32.xlu1 %v694_v34, %s7278_s23 }
 0x84f   :  { %v679_v50 = vpop.permute.xlu0 %678 }
 0x850   :  { %vm680_vm8 = vcmp.eq.s32.totalorder %v679_v50, 1 }
 0x8b7   :  { %v687_v51 = vpop.permute.xlu1 %686 }
 0x8b8   :  { %v7604_v52 = vsel %vm680_vm8, %v687_v51, %v7564_v53 }
 0x8b9   :  { %6181 = vmatmul.mubr.msk.f32.vlgmr.msra.gmra.mrb[4].mxu0 %vm217_vm5, %v7604_v52 }
 0x8ba   :  { %6590 = vmatpush3.bf16.msra.mxu0 %v7454_v8  ;;  %6202 = vmatprep.mubr.msk.f32.mxu0 %vm7273_vm0, %v7274_v1 }
 0x8bb   :  { %6591 = vmatprep.subr.bf16.mxu0 %v7272_v0  ;;  %v696_v61 = vpop.permute.xlu1 %695 }
 0x8bc   :  { %v7618_v63 = vsel %vm680_vm8, %v696_v61, %v7578_v2  ;;  %vm1547_vm8 = vcmask 1048320  }
 0x8bd   :  { %v803_v4 = vrot.slane %v7618_v63, 5  ;;  %v804_v5 = vrot.slane %v7618_v63, 6 }
 0x8be   :  { %6593 = vmatpush3.bf16.msra.mxu0 %v7464_v12 }
 0x8bf   :  { %6600 = vmatprep.subr.bf16.mxu0 %v7272_v0 }
 0x98c   :  { %v777_v54 = vpop.f32.mrb[4].mxu0 }
 0x98d   :  { %v782_v56 = vrot.slane %v777_v54, 5  ;;  %v783_v57 = vrot.slane %v777_v54, 6  ;;  %v6182_v59 = vpop.f32.mrb[5].mxu0 }
 0x98f   :  { %v786_v53 = vadd.f32 %v782_v56, %v7490_v21  ;;  %v787_v60 = vadd.f32 %v783_v57, %v7488_v17 }
 0x991   :  { %6885 = vtanh.f32 %v786_v53  ;;  %v5875_v6 = vmul.f32 -1.442695, %v786_v53  ;;  %v5876_v7 = vmul.f32 -1.442695, %v787_v60 }
 0x992   :  { %6887 = vtanh.f32 %v787_v60 }
 0x993   :  { %6889 = vpow2.f32 %v5875_v6 }
 0x994   :  { %6891 = vpow2.f32 %v5876_v7 }
 0x99b   :  { %v6886_v62 = vpop.eup %6885 }
 0x99c   :  { %v6888_v3 = vpop.eup %6887  ;;  %815 = vrot.lane.b32.xlu0 %v6886_v62, %s7276_s16 }
 0x99d   :  { %817 = vrot.lane.b32.xlu1 %v6888_v3, %s7276_s16  ;;  %v6890_v9 = vpop.eup %6889 }
 0x99e   :  { %v6892_v2 = vpop.eup %6891  ;;  %v794_v10 = vadd.f32 1.0, %v6890_v9 }
 0x99f   :  { %v795_v11 = vadd.f32 1.0, %v6892_v2 }
 0x9a0   :  { %805 = vrot.lane.b32.xlu0 %v803_v4, %s7277_s2  ;;  %6893 = vrcp.f32 %v794_v10 }
 0x9a1   :  { %807 = vrot.lane.b32.xlu1 %v804_v5, %s7277_s2  ;;  %6895 = vrcp.f32 %v795_v11 }
 0x9aa   :  { %v6894_v14 = vpop.eup %6893 }
 0x9ab   :  { %v6896_v16 = vpop.eup %6895 }
 0xa0e   :  { %v816_v15 = vpop.permute.xlu0 %815 }
 0xa0f   :  { %v818_v18 = vpop.permute.xlu1 %817  ;;  %v821_v19 = vmul.f32 %v6894_v14, %v816_v15 }
 0xa10   :  { %v822_v20 = vmul.f32 %v6896_v16, %v818_v18 }
 0xa11   :  { %825 = vrot.lane.b32.xlu0 %v821_v19, %s7277_s2 }
 0xa12   :  { %827 = vrot.lane.b32.xlu1 %v822_v20, %s7277_s2  ;;  %v806_v24 = vpop.permute.xlu0 %805 }
 0xa13   :  { %v808_v25 = vpop.permute.xlu1 %807  ;;  %v811_v26 = vmul.f32 %v6894_v14, %v806_v24 }
 0xa14   :  { %v812_v27 = vmul.f32 %v6896_v16, %v808_v25 }
 0xa83   :  { %v826_v28 = vpop.permute.xlu0 %825 }
 0xa84   :  { %v828_v29 = vpop.permute.xlu1 %827  ;;  %v831_v30 = vadd.f32 %v826_v28, %v811_v26  ;;  %v7282_v26 = vmov 4  }
 0xa85   :  { %v832_v31 = vadd.f32 %v828_v29, %v812_v27 }
 0xa86   :  { %6897 = vtanh.f32 %v831_v30  ;;  %v860_v32 = vrot.slane %v831_v30, 3 }
 0xa87   :  { %6899 = vtanh.f32 %v832_v31  ;;  %v861_v33 = vrot.slane %v832_v31, 2 }
 0xa89   :  { %v862_v34 = vsel %vm354_vm4, %v861_v33, %v860_v32 }
 0xa90   :  { %v6898_v35 = vpop.eup %6897 }
 0xa91   :  { %v6900_v36 = vpop.eup %6899  ;;  %837 = vrot.lane.b32.xlu0 %v6898_v35, %s7276_s16 }
 0xa92   :  { %839 = vrot.lane.b32.xlu1 %v6900_v36, %s7276_s16 }
 0xa95   :  { %846 = vperm.xlu0 %6824, %v7510_v43  }
 0xa99   :  { %6825 = vset.pattern.permute.xlu0 %v7282_v26 }
 0xb03   :  { %v838_v37 = vpop.permute.xlu0 %837 }
 0xb04   :  { %v840_v38 = vpop.permute.xlu1 %839  ;;  %v7633_v45 = vmul.f32 %v6894_v14, %v838_v37 }
 0xb05   :  { %v7635_v46 = vmul.f32 %v6896_v16, %v840_v38 }
 0xb06   :  { %v851_v49 = vrot.slane %v7633_v45, 3 }
 0xb07   :  { %v852_v50 = vrot.slane %v7635_v46, 2 }
 0xb09   :  { %v853_v51 = vsel %vm354_vm4, %v852_v50, %v851_v49 }
 0xb0a   :  { %854 = vrot.lane.b32.xlu1 %v853_v51, %s7277_s2 }
 0xb0e   :  { %863 = vrot.lane.b32.xlu1 %v862_v34, %s7278_s23 }
 0xb14   :  { %v847_v54 = vpop.permute.xlu0 %846 }
 0xb15   :  { %vm848_vm9 = vcmp.eq.s32.totalorder %v847_v54, 1 }
 0xb7c   :  { %v855_v56 = vpop.permute.xlu1 %854 }
 0xb7d   :  { %v7644_v57 = vsel %vm848_vm9, %v855_v56, %v7604_v52 }
 0xb7e   :  { %6192 = vmatmul.mubr.msk.f32.vlgmr.msra.gmra.mrb[4].mxu1 %vm217_vm5, %v7644_v57 }
 0xb7f   :  { %6596 = vmatpush3.bf16.msra.mxu1 %v7454_v8  ;;  %6213 = vmatprep.mubr.msk.f32.mxu1 %vm7273_vm0, %v7274_v1 }
 0xb80   :  { %6597 = vmatprep.subr.bf16.mxu1 %v7272_v0  ;;  %v864_v3 = vpop.permute.xlu1 %863 }
 0xb81   :  { %v7657_v5 = vsel %vm848_vm9, %v864_v3, %v7618_v63  ;;  %vm1874_vm9 = vcmask 58368  }
 0xb82   :  { %v971_v7 = vrot.slane %v7657_v5, 4  ;;  %v972_v9 = vrot.slane %v7657_v5, 5 }
 0xb83   :  { %6599 = vmatpush3.bf16.msra.mxu1 %v7464_v12 }
 0xc51   :  { %v945_v59 = vpop.f32.mrb[4].mxu1 }
 0xc52   :  { %v950_v53 = vrot.slane %v945_v59, 4  ;;  %v951_v60 = vrot.slane %v945_v59, 5  ;;  %v6193_v61 = vpop.f32.mrb[5].mxu1 }
 0xc54   :  { %v954_v62 = vadd.f32 %v950_v53, %v7490_v21  ;;  %v955_v52 = vadd.f32 %v951_v60, %v7488_v17 }
 0xc56   :  { %6901 = vtanh.f32 %v954_v62  ;;  %v5878_v2 = vmul.f32 -1.442695, %v954_v62  ;;  %v5879_v10 = vmul.f32 -1.442695, %v955_v52 }
 0xc57   :  { %6903 = vtanh.f32 %v955_v52 }
 0xc58   :  { %6905 = vpow2.f32 %v5878_v2 }
 0xc59   :  { %6907 = vpow2.f32 %v5879_v10 }
 0xc60   :  { %v6902_v4 = vpop.eup %6901 }
 0xc61   :  { %v6904_v6 = vpop.eup %6903  ;;  %983 = vrot.lane.b32.xlu0 %v6902_v4, %s7276_s16 }
 0xc62   :  { %985 = vrot.lane.b32.xlu1 %v6904_v6, %s7276_s16  ;;  %v6906_v11 = vpop.eup %6905 }
 0xc63   :  { %v6908_v63 = vpop.eup %6907  ;;  %v962_v14 = vadd.f32 1.0, %v6906_v11 }
 0xc64   :  { %v963_v15 = vadd.f32 1.0, %v6908_v63 }
 0xc65   :  { %973 = vrot.lane.b32.xlu0 %v971_v7, %s7277_s2  ;;  %6909 = vrcp.f32 %v962_v14 }
 0xc66   :  { %975 = vrot.lane.b32.xlu1 %v972_v9, %s7277_s2  ;;  %6911 = vrcp.f32 %v963_v15 }
 0xc6f   :  { %v6910_v16 = vpop.eup %6909 }
 0xc70   :  { %v6912_v19 = vpop.eup %6911 }
 0xcd3   :  { %v984_v18 = vpop.permute.xlu0 %983 }
 0xcd4   :  { %v986_v20 = vpop.permute.xlu1 %985  ;;  %v989_v24 = vmul.f32 %v6910_v16, %v984_v18 }
 0xcd5   :  { %v990_v25 = vmul.f32 %v6912_v19, %v986_v20 }
 0xcd6   :  { %993 = vrot.lane.b32.xlu0 %v989_v24, %s7277_s2 }
 0xcd7   :  { %995 = vrot.lane.b32.xlu1 %v990_v25, %s7277_s2  ;;  %v974_v27 = vpop.permute.xlu0 %973 }
 0xcd8   :  { %v976_v28 = vpop.permute.xlu1 %975  ;;  %v979_v29 = vmul.f32 %v6910_v16, %v974_v27 }
 0xcd9   :  { %v980_v30 = vmul.f32 %v6912_v19, %v976_v28 }
 0xd48   :  { %v994_v31 = vpop.permute.xlu0 %993 }
 0xd49   :  { %v996_v32 = vpop.permute.xlu1 %995  ;;  %v999_v33 = vadd.f32 %v994_v31, %v979_v29 }
 0xd4a   :  { %v1000_v34 = vadd.f32 %v996_v32, %v980_v30  ;;  %v7283_v30 = vmov 5  }
 0xd4b   :  { %6913 = vtanh.f32 %v999_v33  ;;  %v1028_v35 = vrot.slane %v999_v33, 4 }
 0xd4c   :  { %6915 = vtanh.f32 %v1000_v34  ;;  %v1029_v36 = vrot.slane %v1000_v34, 3 }
 0xd4e   :  { %v1030_v37 = vsel %vm354_vm4, %v1029_v36, %v1028_v35 }
 0xd55   :  { %v6914_v38 = vpop.eup %6913 }
 0xd56   :  { %v6916_v49 = vpop.eup %6915  ;;  %1005 = vrot.lane.b32.xlu0 %v6914_v38, %s7276_s16 }
 0xd57   :  { %1007 = vrot.lane.b32.xlu1 %v6916_v49, %s7276_s16 }
 0xd5a   :  { %1014 = vperm.xlu0 %6825, %v7510_v43  }
 0xd5e   :  { %6826 = vset.pattern.permute.xlu0 %v7283_v30 }
 0xdc8   :  { %v1006_v50 = vpop.permute.xlu0 %1005 }
 0xdc9   :  { %v1008_v51 = vpop.permute.xlu1 %1007  ;;  %v7672_v54 = vmul.f32 %v6910_v16, %v1006_v50 }
 0xdca   :  { %v7674_v56 = vmul.f32 %v6912_v19, %v1008_v51 }
 0xdcb   :  { %v1019_v59 = vrot.slane %v7672_v54, 4 }
 0xdcc   :  { %v1020_v53 = vrot.slane %v7674_v56, 3 }
 0xdce   :  { %v1021_v60 = vsel %vm354_vm4, %v1020_v53, %v1019_v59 }
 0xdcf   :  { %1022 = vrot.lane.b32.xlu1 %v1021_v60, %s7277_s2 }
 0xdd3   :  { %1031 = vrot.lane.b32.xlu1 %v1030_v37, %s7278_s23 }
 0xdd9   :  { %v1015_v61 = vpop.permute.xlu0 %1014 }
 0xdda   :  { %vm1016_vm10 = vcmp.eq.s32.totalorder %v1015_v61, 1 }
 0xe41   :  { %v1023_v62 = vpop.permute.xlu1 %1022 }
 0xe42   :  { %v7683_v52 = vsel %vm1016_vm10, %v1023_v62, %v7644_v57 }
 0xe43   :  { %6203 = vmatmul.mubr.msk.f32.vlgmr.msra.gmra.mrb[6].mxu0 %vm217_vm5, %v7683_v52 }
 0xe44   :  { %6602 = vmatpush3.bf16.msra.mxu0 %v7454_v8  ;;  %6224 = vmatprep.mubr.msk.f32.mxu0 %vm7273_vm0, %v7274_v1 }
 0xe45   :  { %6603 = vmatprep.subr.bf16.mxu0 %v7272_v0  ;;  %v1032_v8 = vpop.permute.xlu1 %1031 }
 0xe46   :  { %v7697_v10 = vsel %vm1016_vm10, %v1032_v8, %v7657_v5 }
 0xe47   :  { %v1140_v63 = vrot.slane %v7697_v10, 4 }
 0xe48   :  { %6605 = vmatpush3.bf16.msra.mxu0 %v7464_v12  ;;  %v1139_v12 = vrot.slane %v7697_v10, 3 }
 0xe49   :  { %6614 = vmatprep.subr.bf16.mxu0 %v7272_v0 }
 0xf16   :  { %v1113_v3 = vpop.f32.mrb[6].mxu0 }
 0xf17   :  { %v1118_v4 = vrot.slane %v1113_v3, 3  ;;  %v1119_v6 = vrot.slane %v1113_v3, 4  ;;  %v6204_v7 = vpop.f32.mrb[7].mxu0 }
 0xf19   :  { %v1122_v57 = vadd.f32 %v1118_v4, %v7490_v21  ;;  %v1123_v9 = vadd.f32 %v1119_v6, %v7488_v17 }
 0xf1b   :  { %6917 = vtanh.f32 %v1122_v57  ;;  %v5881_v14 = vmul.f32 -1.442695, %v1122_v57  ;;  %v5882_v15 = vmul.f32 -1.442695, %v1123_v9 }
 0xf1c   :  { %6919 = vtanh.f32 %v1123_v9 }
 0xf1d   :  { %6921 = vpow2.f32 %v5881_v14 }
 0xf1e   :  { %6923 = vpow2.f32 %v5882_v15 }
 0xf25   :  { %v6918_v2 = vpop.eup %6917 }
 0xf26   :  { %v6920_v11 = vpop.eup %6919  ;;  %1151 = vrot.lane.b32.xlu0 %v6918_v2, %s7276_s16 }
 0xf27   :  { %1153 = vrot.lane.b32.xlu1 %v6920_v11, %s7276_s16  ;;  %v6922_v16 = vpop.eup %6921 }
 0xf28   :  { %v6924_v5 = vpop.eup %6923  ;;  %v1130_v18 = vadd.f32 1.0, %v6922_v16 }
 0xf29   :  { %v1131_v19 = vadd.f32 1.0, %v6924_v5 }
 0xf2a   :  { %1141 = vrot.lane.b32.xlu0 %v1139_v12, %s7277_s2  ;;  %6925 = vrcp.f32 %v1130_v18 }
 0xf2b   :  { %1143 = vrot.lane.b32.xlu1 %v1140_v63, %s7277_s2  ;;  %6927 = vrcp.f32 %v1131_v19 }
 0xf34   :  { %v6926_v20 = vpop.eup %6925 }
 0xf35   :  { %v6928_v25 = vpop.eup %6927 }
 0xf98   :  { %v1152_v24 = vpop.permute.xlu0 %1151 }
 0xf99   :  { %v1154_v27 = vpop.permute.xlu1 %1153  ;;  %v1157_v28 = vmul.f32 %v6926_v20, %v1152_v24 }
 0xf9a   :  { %v1158_v29 = vmul.f32 %v6928_v25, %v1154_v27 }
 0xf9b   :  { %1161 = vrot.lane.b32.xlu0 %v1157_v28, %s7277_s2 }
 0xf9c   :  { %1163 = vrot.lane.b32.xlu1 %v1158_v29, %s7277_s2  ;;  %v1142_v31 = vpop.permute.xlu0 %1141 }
 0xf9d   :  { %v1144_v32 = vpop.permute.xlu1 %1143  ;;  %v1147_v33 = vmul.f32 %v6926_v20, %v1142_v31 }
 0xf9e   :  { %v1148_v34 = vmul.f32 %v6928_v25, %v1144_v32 }
0x100d   :  { %v1162_v35 = vpop.permute.xlu0 %1161 }
0x100e   :  { %v1164_v36 = vpop.permute.xlu1 %1163  ;;  %v1167_v37 = vadd.f32 %v1162_v35, %v1147_v33 }
0x100f   :  { %v1168_v38 = vadd.f32 %v1164_v36, %v1148_v34 }
0x1010   :  { %6929 = vtanh.f32 %v1167_v37  ;;  %v1196_v49 = vrot.slane %v1167_v37, 5  ;;  %v7284_v37 = vmov 6  }
0x1011   :  { %6931 = vtanh.f32 %v1168_v38  ;;  %v1197_v50 = vrot.slane %v1168_v38, 4 }
0x1013   :  { %v1198_v51 = vsel %vm354_vm4, %v1197_v50, %v1196_v49 }
0x101a   :  { %v6930_v59 = vpop.eup %6929 }
0x101b   :  { %v6932_v53 = vpop.eup %6931  ;;  %1173 = vrot.lane.b32.xlu0 %v6930_v59, %s7276_s16 }
0x101c   :  { %1175 = vrot.lane.b32.xlu1 %v6932_v53, %s7276_s16 }
0x101f   :  { %1182 = vperm.xlu0 %6826, %v7510_v43  }
0x1023   :  { %6827 = vset.pattern.permute.xlu0 %v7284_v37 }
0x108d   :  { %v1174_v60 = vpop.permute.xlu0 %1173 }
0x108e   :  { %v1176_v61 = vpop.permute.xlu1 %1175  ;;  %v7712_v62 = vmul.f32 %v6926_v20, %v1174_v60 }
0x108f   :  { %v7714_v3 = vmul.f32 %v6928_v25, %v1176_v61 }
0x1090   :  { %v1187_v4 = vrot.slane %v7712_v62, 5 }
0x1091   :  { %v1188_v6 = vrot.slane %v7714_v3, 4 }
0x1093   :  { %v1189_v7 = vsel %vm354_vm4, %v1188_v6, %v1187_v4 }
0x1094   :  { %1190 = vrot.lane.b32.xlu1 %v1189_v7, %s7277_s2 }
0x1098   :  { %1199 = vrot.lane.b32.xlu1 %v1198_v51, %s7278_s23 }
0x109e   :  { %v1183_v57 = vpop.permute.xlu0 %1182 }
0x109f   :  { %vm1184_vm11 = vcmp.eq.s32.totalorder %v1183_v57, 1 }
0x1106   :  { %v1191_v9 = vpop.permute.xlu1 %1190 }
0x1107   :  { %v7722_v8 = vsel %vm1184_vm11, %v1191_v9, %v7683_v52 }
0x1108   :  { %6214 = vmatmul.mubr.msk.f32.vlgmr.msra.gmra.mrb[6].mxu1 %vm217_vm5, %v7722_v8 }
0x110a   :  { %v1200_v16 = vpop.permute.xlu1 %1199 }
0x110b   :  { %v7729_v18 = vsel %vm1184_vm11, %v1200_v16, %v7697_v10 }
0x110c   :  { %v1307_v19 = vrot.slane %v7729_v18, 2  ;;  %v1308_v20 = vrot.slane %v7729_v18, 3 }
0x11db   :  { %v1281_v2 = vpop.f32.mrb[6].mxu1 }
0x11dc   :  { %v1286_v11 = vrot.slane %v1281_v2, 2  ;;  %v1287_v12 = vrot.slane %v1281_v2, 3  ;;  %v6215_v63 = vpop.f32.mrb[7].mxu1 }
0x11de   :  { %v1290_v14 = vadd.f32 %v1286_v11, %v7490_v21  ;;  %v1291_v15 = vadd.f32 %v1287_v12, %v7488_v17 }
0x11e0   :  { %6933 = vtanh.f32 %v1290_v14  ;;  %v5884_v24 = vmul.f32 -1.442695, %v1290_v14  ;;  %v5885_v25 = vmul.f32 -1.442695, %v1291_v15 }
0x11e1   :  { %6935 = vtanh.f32 %v1291_v15 }
0x11e2   :  { %6937 = vpow2.f32 %v5884_v24 }
0x11e3   :  { %6939 = vpow2.f32 %v5885_v25 }
0x11ea   :  { %v6934_v5 = vpop.eup %6933 }
0x11eb   :  { %v6936_v52 = vpop.eup %6935  ;;  %1319 = vrot.lane.b32.xlu0 %v6934_v5, %s7276_s16 }
0x11ec   :  { %1321 = vrot.lane.b32.xlu1 %v6936_v52, %s7276_s16  ;;  %v6938_v27 = vpop.eup %6937 }
0x11ed   :  { %v6940_v10 = vpop.eup %6939  ;;  %v1298_v28 = vadd.f32 1.0, %v6938_v27 }
0x11ee   :  { %v1299_v29 = vadd.f32 1.0, %v6940_v10 }
0x11ef   :  { %1309 = vrot.lane.b32.xlu0 %v1307_v19, %s7277_s2  ;;  %6941 = vrcp.f32 %v1298_v28 }
0x11f0   :  { %1311 = vrot.lane.b32.xlu1 %v1308_v20, %s7277_s2  ;;  %6943 = vrcp.f32 %v1299_v29 }
0x11f9   :  { %v6942_v31 = vpop.eup %6941 }
0x11fa   :  { %v6944_v33 = vpop.eup %6943 }
0x125d   :  { %v1320_v32 = vpop.permute.xlu0 %1319 }
0x125e   :  { %v1322_v34 = vpop.permute.xlu1 %1321  ;;  %v1325_v35 = vmul.f32 %v6942_v31, %v1320_v32 }
0x125f   :  { %v1326_v36 = vmul.f32 %v6944_v33, %v1322_v34 }
0x1260   :  { %1329 = vrot.lane.b32.xlu0 %v1325_v35, %s7277_s2 }
0x1261   :  { %1331 = vrot.lane.b32.xlu1 %v1326_v36, %s7277_s2  ;;  %v1310_v38 = vpop.permute.xlu0 %1309 }
0x1262   :  { %v1312_v49 = vpop.permute.xlu1 %1311  ;;  %v1315_v50 = vmul.f32 %v6942_v31, %v1310_v38 }
0x1263   :  { %v1316_v51 = vmul.f32 %v6944_v33, %v1312_v49 }
0x12d2   :  { %v1330_v59 = vpop.permute.xlu0 %1329 }
0x12d3   :  { %v1332_v53 = vpop.permute.xlu1 %1331  ;;  %v1335_v60 = vadd.f32 %v1330_v59, %v1315_v50 }
0x12d4   :  { %v1336_v61 = vadd.f32 %v1332_v53, %v1316_v51 }
0x12d5   :  { %6945 = vtanh.f32 %v1335_v60  ;;  %v1364_v4 = vrot.slane %v1335_v60, 6 }
0x12d6   :  { %6947 = vtanh.f32 %v1336_v61  ;;  %v1365_v6 = vrot.slane %v1336_v61, 5 }
0x12d8   :  { %v1366_v7 = vsel %vm354_vm4, %v1365_v6, %v1364_v4 }
0x12df   :  { %v6946_v57 = vpop.eup %6945 }
0x12e0   :  { %v6948_v9 = vpop.eup %6947  ;;  %1341 = vrot.lane.b32.xlu0 %v6946_v57, %s7276_s16 }
0x12e1   :  { %1343 = vrot.lane.b32.xlu1 %v6948_v9, %s7276_s16  ;;  %v5890_v9 = vld [vmem:[#allocation7] ss:$0 sm:$0xff] }
0x12e4   :  { %1350 = vperm.xlu0 %6827, %v7510_v43  }
0x12e8   :  { %6828 = vset.pattern.permute.xlu0 %v7275_v13 }
0x1352   :  { %v1342_v2 = vpop.permute.xlu0 %1341 }
0x1353   :  { %v1344_v11 = vpop.permute.xlu1 %1343  ;;  %v7745_v12 = vmul.f32 %v6942_v31, %v1342_v2  ;;  %v1603_v2 = vld [vmem:[%s8871_s7 + $0x20] sm:$0xff] }
0x1354   :  { %v7747_v63 = vmul.f32 %v6944_v33, %v1344_v11  ;;  %v1604_v11 = vld [vmem:[%s8871_s7 + $0x28] sm:$0xff] }
0x1355   :  { %v1355_v14 = vrot.slane %v7745_v12, 6 }
0x1356   :  { %v1356_v15 = vrot.slane %v7747_v63, 5 }
0x1358   :  { %v1357_v16 = vsel %vm354_vm4, %v1356_v15, %v1355_v14  ;;  %v1605_v14 = vld [vmem:[%s8871_s7 + $0x30] sm:$0xff]  ;;  %v7806_v15 = vpack.c.bf16 %v1604_v11, %v1603_v2 }
0x1359   :  { %1358 = vrot.lane.b32.xlu1 %v1357_v16, %s7277_s2  ;;  %v1606_v16 = vld [vmem:[%s8871_s7 + $0x38] sm:$0xff] }
0x135d   :  { %1367 = vrot.lane.b32.xlu1 %v1366_v7, %s7278_s23 }
0x1363   :  { %v1351_v5 = vpop.permute.xlu0 %1350 }
0x1364   :  { %vm1352_vm12 = vcmp.eq.s32.totalorder %v1351_v5, 1  ;;  %v1599_v5 = vld [vmem:[%s8871_s7] sm:$0xff] }
0x13cb   :  { %v1359_v43 = vpop.permute.xlu1 %1358 }
0x13cc   :  { %v1361_v52 = vsel %vm1352_vm12, %v1359_v43, %v7722_v8  ;;  %v1600_v43 = vld [vmem:[%s8871_s7 + $0x8] sm:$0xff] }
0x13cd   :  { %6225 = vmatmul.mubr.msk.f32.vlgmr.msra.gmra.mrb[8].mxu0 %vm217_vm5, %v1361_v52  ;;  %v6606_v52 = vpack.c.bf16 %v1600_v43, %v1599_v5 }
0x13ce   :  { %6246 = vmatprep.mubr.msk.f32.mxu0 %vm7273_vm0, %v7274_v1  ;;  %6616 = vmatpush3.bf16.msra.mxu0 %v7806_v15 }
0x13cf   :  { %v1368_v28 = vpop.permute.xlu1 %1367  ;;  %6617 = vmatprep.subr.bf16.mxu0 %v7272_v0  ;;  %6607 = vmatprep.subr.bf16.mxu1 %v6606_v52 }
0x13d0   :  { %v1370_v31 = vsel %vm1352_vm12, %v1368_v28, %v7729_v18  ;;  %6609 = vmatpush3.bf16.msra.mxu1 %v6606_v52 }
0x13d1   :  { %v1475_v32 = vrot.slane %v1370_v31, 1  ;;  %v1476_v33 = vrot.slane %v1370_v31, 2 }
0x14a0   :  { %v1449_v19 = vpop.f32.mrb[8].mxu0 }
0x14a1   :  { %v1454_v20 = vrot.slane %v1449_v19, 1  ;;  %v1455_v24 = vrot.slane %v1449_v19, 2  ;;  %v6226_v25 = vpop.f32.mrb[9].mxu0  ;;  %v1601_v19 = vld [vmem:[%s8871_s7 + $0x10] sm:$0xff] }
0x14a3   :  { %v1458_v27 = vadd.f32 %v1454_v20, %v7490_v21  ;;  %v1459_v10 = vadd.f32 %v1455_v24, %v7488_v17  ;;  %v1602_v20 = vld [vmem:[%s8871_s7 + $0x18] sm:$0xff]  ;;  %v7824_v24 = vpack.c.bf16 %v1606_v16, %v1605_v14 }
0x14a4   :  { %v6610_v25 = vpack.c.bf16 %v1602_v20, %v1601_v19 }
0x14a5   :  { %6949 = vtanh.f32 %v1458_v27  ;;  %v5887_v21 = vmul.f32 -1.442695, %v1458_v27  ;;  %v5888_v34 = vmul.f32 -1.442695, %v1459_v10  ;;  %6619 = vmatpush3.bf16.msra.mxu0 %v7824_v24 }
0x14a6   :  { %6951 = vtanh.f32 %v1459_v10  ;;  %6611 = vmatprep.subr.bf16.mxu1 %v6610_v25  ;;  %6626 = vmatprep.subr.bf16.mxu0 %v7272_v0 }
0x14a7   :  { %6953 = vpow2.f32 %v5887_v21  ;;  %6613 = vmatpush3.bf16.msra.mxu1 %v6610_v25 }
0x14a8   :  { %6955 = vpow2.f32 %v5888_v34  ;;  %6247 = vmatmul.mubr.f32.vlgmr.msra.gmra.mrb[10].mxu0 %v7274_v1  ;;  %6620 = vmatprep.subr.bf16.mxu1 %v7272_v0 }
0x14a9   :  { %6268 = vmatprep.mubr.msk.f32.mxu0 %vm7273_vm0, %v7274_v1 }
0x14af   :  { %v6950_v29 = vpop.eup %6949 }
0x14b0   :  { %v6952_v8 = vpop.eup %6951  ;;  %1487 = vrot.lane.b32.xlu0 %v6950_v29, %s7276_s16 }
0x14b1   :  { %1489 = vrot.lane.b32.xlu1 %v6952_v8, %s7276_s16  ;;  %v6954_v17 = vpop.eup %6953 }
0x14b2   :  { %v6956_v35 = vpop.eup %6955  ;;  %v1466_v36 = vadd.f32 1.0, %v6954_v17 }
0x14b3   :  { %v1467_v38 = vadd.f32 1.0, %v6956_v35 }
0x14b4   :  { %1477 = vrot.lane.b32.xlu0 %v1475_v32, %s7277_s2  ;;  %6957 = vrcp.f32 %v1466_v36 }
0x14b5   :  { %1479 = vrot.lane.b32.xlu1 %v1476_v33, %s7277_s2  ;;  %6959 = vrcp.f32 %v1467_v38 }
0x14be   :  { %v7765_v18 = vpop.eup %6957 }
0x14bf   :  { %v7767_v50 = vpop.eup %6959 }
0x1522   :  { %v1488_v49 = vpop.permute.xlu0 %1487 }
0x1523   :  { %v1490_v51 = vpop.permute.xlu1 %1489  ;;  %v1493_v59 = vmul.f32 %v7765_v18, %v1488_v49 }
0x1524   :  { %v1494_v53 = vmul.f32 %v7767_v50, %v1490_v51 }
0x1525   :  { %1497 = vrot.lane.b32.xlu0 %v1493_v59, %s7277_s2 }
0x1526   :  { %1499 = vrot.lane.b32.xlu1 %v1494_v53, %s7277_s2 }
0x1529   :  { %370 = vperm.xlu0 %6828, %v7506_v42  }
0x152a   :  { %533 = vperm.xlu1 %6822, %v7506_v42  }
0x152d   :  { %6830 = vset.pattern.permute.xlu0 %v7281_v22  ;;  %v7285_v22 = vmov 7  }
0x152e   :  { %6829 = vset.pattern.permute.xlu1 %v7280_v23  ;;  %868 = vperm.xlu0 %6830, %v7506_v42   ;;  %v1478_v23 = vpop.permute.xlu0 %1477 }
0x152f   :  { %700 = vperm.xlu1 %6829, %v7506_v42  }
0x1532   :  { %6833 = vset.pattern.permute.xlu0 %v7284_v37  ;;  %v1480_v37 = vpop.permute.xlu1 %1479 }
0x1533   :  { %6831 = vset.pattern.permute.xlu1 %v7282_v26  ;;  %1372 = vperm.xlu0 %6833, %v7506_v42   ;;  %v1483_v26 = vmul.f32 %v7765_v18, %v1478_v23  ;;  %v1484_v60 = vmul.f32 %v7767_v50, %v1480_v37 }
0x1534   :  { %1036 = vperm.xlu1 %6831, %v7506_v42  }
0x1537   :  { %6836 = vset.pattern.permute.xlu0 %v7275_v13 }
0x1538   :  { %6832 = vset.pattern.permute.xlu1 %v7283_v30 }
0x1539   :  { %1204 = vperm.xlu1 %6832, %v7506_v42  }
0x153d   :  { %6834 = vset.pattern.permute.xlu1 %v7285_v22 }
0x153e   :  { %1518 = vperm.xlu1 %6834, %v7506_v42  }
0x1542   :  { %6835 = vset.pattern.permute.xlu1 %v7275_v13  ;;  %v5889_v13 = vld [vmem:[%s8869_s5] ss:$0 sm:$0xff] }
0x1597   :  { %v1498_v61 = vpop.permute.xlu0 %1497 }
0x1598   :  { %v1500_v4 = vpop.permute.xlu1 %1499  ;;  %v1503_v6 = vadd.f32 %v1498_v61, %v1483_v26 }
0x1599   :  { %v1504_v7 = vadd.f32 %v1500_v4, %v1484_v60 }
0x159a   :  { %6961 = vtanh.f32 %v1503_v6 }
0x159b   :  { %6963 = vtanh.f32 %v1504_v7 }
0x15a4   :  { %v6962_v30 = vpop.eup %6961 }
0x15a5   :  { %v6964_v57 = vpop.eup %6963  ;;  %1509 = vrot.lane.b32.xlu1 %v6962_v30, %s7276_s16 }
0x15a6   :  { %1511 = vrot.lane.b32.xlu0 %v6964_v57, %s7276_s16 }
0x15a8   :  { %v371_v28 = vpop.permute.xlu0 %370 }
0x15a9   :  { %1583 = vrot.lane.b32.xlu1 %v5889_v13, %s7278_s23  ;;  %v534_v27 = vpop.permute.xlu1 %533  ;;  %v372_v8 = vrot.slane %v371_v28, 1  ;;  %v375_v59 = vmul.f32 %v371_v28, %v7520_v58 }
0x15aa   :  { %1594 = vrot.lane.b32.xlu0 %v5890_v9, %s7278_s23  ;;  %v535_v31 = vrot.slane %v534_v27, 7  ;;  %v539_v37 = vmul.f32 %v534_v27, %v7556_v48  ;;  %s7287_s23 = smov [#allocation11]  }
0x15ab   :  { %v376_v36 = vmul.f32 %v372_v8, %v7517_v55  ;;  %s5844_s7 = sshll.u32 %s7287_s23, 4  ;;  %s5845_s7 = int_to_ptr.vmem [resolvable:$true] %s5844_s7 }
0x15ac   :  { %v538_v17 = vmul.f32 %v535_v31, %v7554_v47  ;;  %p7217_p5 = scmp.lt.s32.totalorder %s5845_s7, %s5845_s7 }
0x15ad   :  { %v869_v33 = vpop.permute.xlu0 %868  ;;  %v1528_v55 = vsel %vm1526_vm13, %v376_v36, %v539_v37 }
0x15ae   :  { %v701_v10 = vpop.permute.xlu1 %700  ;;  %v870_v35 = vrot.slane %v869_v33, 5  ;;  %v871_v49 = vrot.slane %v869_v33, 6  ;;  %v1527_v47 = vsel %vm1526_vm13, %v375_v59, %v538_v17 }
0x15af   :  { %v702_v32 = vrot.slane %v701_v10, 6  ;;  %v703_v21 = vrot.slane %v701_v10, 7 }
0x15b0   :  { %v874_v60 = vmul.f32 %v870_v35, %v7633_v45  ;;  %v875_v4 = vmul.f32 %v871_v49, %v7635_v46 }
0x15b1   :  { %v706_v38 = vmul.f32 %v702_v32, %v7593_v41  ;;  %v707_v53 = vmul.f32 %v703_v21, %v7595_v44 }
0x15b2   :  { %v1373_v61 = vpop.permute.xlu0 %1372 }
0x15b3   :  { %v1037_v29 = vpop.permute.xlu1 %1036  ;;  %v1530_v41 = vsel %vm1529_vm14, %v1527_v47, %v706_v38  ;;  %v1531_v6 = vsel %vm1529_vm14, %v1528_v55, %v707_v53  ;;  %v1374_v30 = vrot.slane %v1373_v61, 2  ;;  %v1375_v13 = vrot.slane %v1373_v61, 3 }
0x15b4   :  { %v1038_v51 = vrot.slane %v1037_v29, 4  ;;  %v1039_v22 = vrot.slane %v1037_v29, 5  ;;  %v1533_v57 = vsel %vm1532_vm15, %v1530_v41, %v874_v60  ;;  %v1534_v9 = vsel %vm1532_vm15, %v1531_v6, %v875_v4 }
0x15b5   :  { %v1379_v52 = vmul.f32 %v1375_v13, %v7747_v63 }
0x15b6   :  { %v1042_v58 = vmul.f32 %v1038_v51, %v7672_v54  ;;  %v1043_v48 = vmul.f32 %v1039_v22, %v7674_v56 }
0x15b8   :  { %v1205_v34 = vpop.permute.xlu1 %1204  ;;  %v1536_v46 = vsel %vm1535_vm2, %v1533_v57, %v1042_v58  ;;  %v1537_v2 = vsel %vm1535_vm2, %v1534_v9, %v1043_v48  ;;  %v7286_v9 = vmov 1966171168  }
0x15b9   :  { %v1206_v23 = vrot.slane %v1205_v34, 3  ;;  %v1207_v26 = vrot.slane %v1205_v34, 4 }
0x15bb   :  { %v1210_v7 = vmul.f32 %v1206_v23, %v7712_v62  ;;  %v1211_v45 = vmul.f32 %v1207_v26, %v7714_v3  ;;  %v1378_v3 = vmul.f32 %v1374_v30, %v7745_v12  ;;  %v1783_v30 = vpop.f32.mrb[10].mxu0 }
0x15bd   :  { %v1519_v44 = vpop.permute.xlu1 %1518  ;;  %v1539_v56 = vsel %vm1538_vm3, %v1536_v46, %v1210_v7  ;;  %v1540_v16 = vsel %vm1538_vm3, %v1537_v2, %v1211_v45  ;;  %v6248_v45 = vpop.f32.mrb[11].mxu0  ;;  %v1789_v46 = vunpack.c.l.s4 %v7286_v9  ;;  %v1792_v2 = vshrl.u32 %v111_v39, 7 }
0x15be   :  { %v1520_v11 = vrot.slane %v1519_v44, 1  ;;  %v1521_v5 = vrot.slane %v1519_v44, 2  ;;  %v1542_v25 = vsel %vm1541_vm6, %v1539_v56, %v1378_v3  ;;  %v1543_v27 = vsel %vm1541_vm6, %v1540_v16, %v1379_v52 }
0x15bf   :  { %v7884_v3 = vsub.s32 0, %v1792_v2 }
0x1617   :  { %v1510_v54 = vpop.permute.xlu1 %1509 }
0x1618   :  { %v1512_v62 = vpop.permute.xlu0 %1511  ;;  %v1515_v14 = vmul.f32 %v7765_v18, %v1510_v54  ;;  %v1790_v54 = vunpack.c.0.s8 %v1789_v46 }
0x1619   :  { %v1516_v43 = vmul.f32 %v7767_v50, %v1512_v62 }
0x161a   :  { %v1524_v19 = vmul.f32 %v1520_v11, %v1515_v14  ;;  %v7880_v56 = vsub.s32 %v1790_v54, %v1792_v2 }
0x161b   :  { %v1525_v20 = vmul.f32 %v1521_v5, %v1516_v43  ;;  %v1584_v55 = vpop.permute.xlu1 %1583  ;;  %v5891_v5 = vld [vmem:[#allocation8] ss:$0 sm:$0xff] }
0x161c   :  { %v1545_v10 = vsel %vm1544_vm7, %v1542_v25, %v1524_v19  ;;  %v1595_v58 = vpop.permute.xlu0 %1594  ;;  %v1794_v11 = vrot.slane %v1783_v30, %v7880_v56 }
0x161d   :  { %v1546_v18 = vsel %vm1544_vm7, %v1543_v27, %v1525_v20  ;;  %v1548_v12 = vsel %vm1547_vm8, %v1545_v10, 0.0 }
0x161e   :  { %v1549_v28 = vsel %vm1547_vm8, %v1546_v18, 0.0  ;;  %v1795_v62 = vcombine.high %v1794_v11, %v1794_v11  ;;  %v1802_v16 = vrot.slane %v1794_v11, %v7880_v56 }
0x161f   :  { %v1550_v29 = vadd.f32 %v1549_v28, %v1548_v12 }
0x1620   :  { %v1809_v14 = vrot.slane %v1795_v62, %v7880_v56  ;;  %v1813_v39 = vrot.slane %v1802_v16, %v7884_v3  ;;  %v1701_v16 = vld [vmem:[%s8874_s10 + $0x8] sm:$0xff] }
0x1621   :  { %v1551_v31 = vrot.slane %v1550_v29, 4 }
0x1622   :  { %v1817_v43 = vrot.slane %v1809_v14, %v7884_v3  ;;  %v1700_v14 = vld [vmem:[%s8874_s10] sm:$0xff] }
0x1623   :  { %v1552_v50 = vadd.f32 %v1551_v31, %v1550_v29 }
0x1625   :  { %v1553_v8 = vrot.slane %v1552_v50, 2 }
0x1627   :  { %v1554_v63 = vadd.f32 %v1553_v8, %v1552_v50 }
0x1629   :  { %v1555_v32 = vrot.slane %v1554_v63, 1 }
0x162b   :  { %v1556_v33 = vadd.f32 %v1555_v32, %v1554_v63  ;;  %v7904_v63 = vsub.s32 1, %v1792_v2 }
0x162d   :  { %v1558_v21 = vmul.f32 0.0625, %v1556_v33  ;;  %v7908_v32 = vrot.slane %v7506_v42, %v7904_v63  ;;  %v7913_v33 = vrot.slane %v7506_v42, %v7884_v3 }
0x162f   :  { %v1559_v34 = vsub.f32 %v1545_v10, %v1558_v21  ;;  %v1560_v17 = vsub.f32 %v1546_v18, %v1558_v21  ;;  %v7898_v18 = vld [vmem:[%s8873_s9] ss:$0 sm:$0xff] }
0x1631   :  { %v1561_v35 = vmul.f32 %v1559_v34, %v1559_v34  ;;  %v1562_v36 = vmul.f32 %v1560_v17, %v1560_v17 }
0x1633   :  { %v1563_v38 = vsel %vm1547_vm8, %v1561_v35, 0.0  ;;  %v1564_v49 = vsel %vm1547_vm8, %v1562_v36, 0.0 }
0x1634   :  { %v1565_v51 = vadd.f32 %v1564_v49, %v1563_v38  ;;  %v7923_v49 = vsub.s32 %v7502_v40, %v1792_v2 }
0x1636   :  { %v1566_v59 = vrot.slane %v1565_v51, 4 }
0x1638   :  { %v1567_v53 = vadd.f32 %v1566_v59, %v1565_v51 }
0x163a   :  { %v1568_v22 = vrot.slane %v1567_v53, 2 }
0x163c   :  { %v1569_v23 = vadd.f32 %v1568_v22, %v1567_v53 }
0x163e   :  { %v1570_v37 = vrot.slane %v1569_v23, 1 }
0x1640   :  { %v1571_v26 = vadd.f32 %v1570_v37, %v1569_v23 }
0x1642   :  { %v1572_v47 = vmul.f32 0.0625, %v1571_v26 }
0x1644   :  { %v1573_v60 = vadd.f32 1e-05, %v1572_v47 }
0x1646   :  { %6965 = vrsqrt.f32 %v1573_v60 }
0x1650   :  { %v6966_v61 = vpop.eup %6965 }
0x1651   :  { %v1575_v41 = vmul.f32 %v6966_v61, %v1559_v34  ;;  %v1576_v4 = vmul.f32 %v6966_v61, %v1560_v17 }
0x1653   :  { %v1586_v44 = vmul.f32 %v1584_v55, %v1575_v41  ;;  %v1587_v6 = vmul.f32 %v1584_v55, %v1576_v4 }
0x1655   :  { %v7867_v48 = vadd.f32 %v1595_v58, %v1586_v44  ;;  %v7869_v7 = vadd.f32 %v1595_v58, %v1587_v6 }
0x1657   :  { %1618 = vrot.lane.b32.xlu0 %v7869_v7, %s7277_s2  ;;  %1616 = vrot.lane.b32.xlu1 %v7867_v48, %s7277_s2 }
0x16c9   :  { %v1619_v57 = vpop.permute.xlu0 %1618  ;;  %v1617_v13 = vpop.permute.xlu1 %1616 }
0x16ca   :  { %6235 = vmatprep.mubr.msk.f32.mxu1 %vm217_vm5, %v1617_v13 }
0x16cb   :  { %6236 = vmatmul.mubr.msk.f32.vlgmr.msra.gmra.mrb[8].mxu1 %vm217_vm5, %v1619_v57 }
0x16cc   :  { %6257 = vmatprep.mubr.msk.f32.mxu1 %vm7273_vm0, %v7274_v1 }
0x179e   :  { %v6237_v52 = vpop.f32.mrb[8].mxu1 }
0x179f   :  { %v7888_v19 = vadd.f32 %v6237_v52, %v5891_v5  ;;  %v1690_v20 = vpop.f32.mrb[9].mxu1 }
0x17a0   :  { %v7891_v25 = vadd.f32 %v5891_v5, %v1690_v20  ;;  %v1704_v5 = vld [vmem:[%s8875_s11] sm:$0xff] }
0x17a1   :  { %v1821_v27 = vadd.f32 %v1817_v43, %v7888_v19  ;;  %v1705_v43 = vld [vmem:[%s8875_s11 + $0x8] sm:$0xff]  ;;  %v1708_v52 = vadd.f32 %v1704_v5, %v1700_v14  ;;  %v1712_v20 = vld [vmem:[%s8874_s10 + $0x20] sm:$0xff] }
0x17a2   :  { %v1820_v10 = vadd.f32 %v1813_v39, %v7891_v25  ;;  %v1713_v39 = vld [vmem:[%s8874_s10 + $0x28] sm:$0xff] }
0x17a3   :  { %6967 = vtanh.f32 %v1821_v27  ;;  %v1709_v27 = vadd.f32 %v1705_v43, %v1701_v16 }
0x17a4   :  { %6969 = vtanh.f32 %v1820_v10  ;;  %v7955_v10 = vpack.c.bf16 %v1713_v39, %v1712_v20 }
0x17a6   :  { %6622 = vmatpush3.bf16.msra.mxu1 %v7955_v10 }
0x17a7   :  { %6623 = vmatprep.subr.bf16.mxu1 %v7272_v0 }
0x17ad   :  { %v6968_v12 = vpop.eup %6967 }
0x17ae   :  { %v6970_v28 = vpop.eup %6969  ;;  %v1831_v29 = vmul.f32 %v6968_v12, %v7898_v18  ;;  %v1702_v12 = vld [vmem:[%s8874_s10 + $0x10] sm:$0xff] }
0x17af   :  { %v1830_v31 = vmul.f32 %v6970_v28, %v7898_v18  ;;  %v1703_v28 = vld [vmem:[%s8874_s10 + $0x18] sm:$0xff] }
0x17b0   :  { %v1835_v50 = vsel %vm217_vm5, %v1831_v29, 0.0  ;;  %v1706_v29 = vld [vmem:[%s8875_s11 + $0x10] sm:$0xff] }
0x17b1   :  { %1836 = vadd.xlane.f32.xlu0 %v1835_v50  ;;  %v1832_v8 = vsel %vm217_vm5, %v1830_v31, 0.0  ;;  %v1707_v31 = vld [vmem:[%s8875_s11 + $0x18] sm:$0xff]  ;;  %v1710_v50 = vadd.f32 %v1706_v29, %v1702_v12 }
0x17b2   :  { %1833 = vadd.xlane.f32.xlu1 %v1832_v8  ;;  %v1714_v8 = vld [vmem:[%s8874_s10 + $0x30] sm:$0xff] }
0x17c3   :  { %1850 = vbcast.lane.b32.xlu1 %v7908_v32, 256 }
0x17c7   :  { %1843 = vbcast.lane.b32.xlu0 %v7913_v33, 256 }
0x183e   :  { %v1837_v21 = vpop.xlane.xlu0 %1836 }
0x183f   :  { %v1834_v34 = vpop.xlane.xlu1 %1833 }
0x1842   :  { %v7916_v17 = vpop.permute.xlu0 %1843 }
0x1843   :  { %v7918_v35 = vpop.permute.xlu1 %1850  ;;  %v1854_v36 = vmul.f32 %v7916_v17, %v1834_v34  ;;  %v7975_v34 = vpack.c.bf16 %v1709_v27, %v1708_v52 }
0x1844   :  { %v1855_v38 = vmul.f32 %v7918_v35, %v1837_v21  ;;  %v1715_v21 = vld [vmem:[%s8874_s10 + $0x38] sm:$0xff] }
0x1845   :  { %1859 = vperm.xlu1 %6835, %v1854_v36   ;;  %6628 = vmatpush3.bf16.msra.mxu0 %v7975_v34 }
0x1846   :  { %1862 = vperm.xlu0 %6836, %v1855_v38   ;;  %6629 = vmatprep.subr.bf16.mxu0 %v7272_v0 }
0x18c4   :  { %v1860_v51 = vpop.permute.xlu1 %1859 }
0x18c5   :  { %v1867_v59 = vrot.slane %v1860_v51, %v7923_v49  ;;  %v1863_v53 = vpop.permute.xlu0 %1862 }
0x18c6   :  { %v1871_v22 = vrot.slane %v1863_v53, %v7923_v49 }
0x18c8   :  { %v1872_v23 = vsel %vm354_vm4, %v1871_v22, %v1867_v59 }
0x18c9   :  { %v1875_v37 = vsel %vm1874_vm9, %v1872_v23, -inf }
0x18ca   :  { %1876 = vmax.xlane.f32.xlu1 %v1875_v37 }
0x1957   :  { %v1877_v26 = vpop.xlane.xlu1 %1876 }
0x1958   :  { %v1882_v47 = vrot.slane %v1877_v26, %v7884_v3  ;;  %v1886_v60 = vrot.slane %v1877_v26, %v7904_v63 }
0x195a   :  { %v1889_v61 = vsub.f32 %v1854_v36, %v1882_v47  ;;  %v1890_v40 = vsub.f32 %v1855_v38, %v1886_v60  ;;  %v1711_v36 = vadd.f32 %v1707_v31, %v1703_v28  ;;  %v7978_v38 = vpack.c.bf16 %v1715_v21, %v1714_v8 }
0x195c   :  { %v1891_v55 = vmul.f32 1.442695, %v1889_v61  ;;  %v1893_v41 = vmul.f32 1.442695, %v1890_v40  ;;  %v7982_v51 = vpack.c.bf16 %v1711_v36, %v1710_v50  ;;  %6625 = vmatpush3.bf16.msra.mxu1 %v7978_v38 }
0x195d   :  { %6632 = vmatprep.subr.bf16.mxu1 %v7272_v0 }
0x195e   :  { %6971 = vpow2.f32 %v1891_v55  ;;  %6631 = vmatpush3.bf16.msra.mxu0 %v7982_v51 }
0x195f   :  { %6973 = vpow2.f32 %v1893_v41  ;;  %6638 = vmatprep.subr.bf16.mxu0 %v7272_v0 }
0x1961   :  { %6269 = vmatmul.mubr.f32.vlgmr.msra.gmra.mrb[12].mxu0 %v7274_v1 }
0x1962   :  { %6640 = vmatpush3.bf16.msra.mxu0 %v7955_v10  ;;  %6290 = vmatprep.mubr.msk.f32.mxu0 %vm7273_vm0, %v7274_v1 }
0x1963   :  { %6641 = vmatprep.subr.bf16.mxu0 %v7272_v0 }
0x1966   :  { %6643 = vmatpush3.bf16.msra.mxu0 %v7978_v38 }
0x1967   :  { %6650 = vmatprep.subr.bf16.mxu0 %v7272_v0 }
0x1968   :  { %v6972_v4 = vpop.eup %6971 }
0x1969   :  { %1898 = vperm.xlu0 %6836, %v6972_v4   ;;  %v6974_v58 = vpop.eup %6973 }
0x196d   :  { %1901 = vperm.xlu0 %6836, %v6974_v58  }
0x19e8   :  { %v1899_v44 = vpop.permute.xlu0 %1898 }
0x19e9   :  { %v1906_v30 = vrot.slane %v1899_v44, %v7923_v49 }
0x19ec   :  { %v1902_v6 = vpop.permute.xlu0 %1901 }
0x19ed   :  { %v1910_v45 = vrot.slane %v1902_v6, %v7923_v49 }
0x19ef   :  { %v1911_v57 = vsel %vm354_vm4, %v1910_v45, %v1906_v30 }
0x19f0   :  { %v1913_v13 = vsel %vm1874_vm9, %v1911_v57, 0.0 }
0x19f1   :  { %1914 = vadd.xlane.f32.xlu0 %v1913_v13 }
0x1a34   :  { %v2099_v13 = vpop.f32.mrb[12].mxu0 }
0x1a7e   :  { %v1915_v9 = vpop.xlane.xlu0 %1914 }
0x1a7f   :  { %6975 = vrcp.f32 %v1915_v9  ;;  %v6270_v9 = vpop.f32.mrb[13].mxu0 }
0x1a89   :  { %v6976_v46 = vpop.eup %6975 }
0x1a8a   :  { %v1925_v54 = vrot.slane %v6976_v46, %v7904_v63  ;;  %v1921_v2 = vrot.slane %v6976_v46, %v7884_v3 }
0x1a8c   :  { %v1929_v11 = vmul.f32 %v6974_v58, %v1925_v54  ;;  %v1928_v62 = vmul.f32 %v6972_v4, %v1921_v2  ;;  %v8012_v54 = vld [vmem:[%s8876_s12] ss:$0 sm:$0xff] }
0x1a8e   :  { %1937 = vperm.xlu0 %6836, %v1929_v11   ;;  %1932 = vperm.xlu1 %6835, %v1928_v62  }
0x1b0d   :  { %v1938_v59 = vpop.permute.xlu0 %1937  ;;  %v1933_v53 = vpop.permute.xlu1 %1932 }
0x1b0e   :  { %v1941_v22 = vmul.f32 %v1938_v59, %v7869_v7  ;;  %v1940_v23 = vmul.f32 %v1933_v53, %v7867_v48 }
0x1b10   :  { %v1949_v37 = vsel %vm1547_vm8, %v1941_v22, 0.0  ;;  %v1942_v26 = vsel %vm1547_vm8, %v1940_v23, 0.0 }
0x1b11   :  { %v1950_v47 = vrot.slane %v1949_v37, 4  ;;  %v1943_v60 = vrot.slane %v1942_v26, 4 }
0x1b13   :  { %v1951_v61 = vadd.f32 %v1950_v47, %v1949_v37  ;;  %v1944_v40 = vadd.f32 %v1943_v60, %v1942_v26 }
0x1b15   :  { %v1952_v55 = vrot.slane %v1951_v61, 2  ;;  %v1945_v41 = vrot.slane %v1944_v40, 2 }
0x1b17   :  { %v1953_v4 = vadd.f32 %v1952_v55, %v1951_v61  ;;  %v1946_v58 = vadd.f32 %v1945_v41, %v1944_v40 }
0x1b19   :  { %v1954_v44 = vrot.slane %v1953_v4, 1  ;;  %v1947_v6 = vrot.slane %v1946_v58, 1 }
0x1b1b   :  { %v1948_v30 = vadd.f32 %v1947_v6, %v1946_v58  ;;  %v1955_v45 = vadd.f32 %v1954_v44, %v1953_v4 }
0x1b1d   :  { %v1958_v57 = vsel %vm354_vm4, %v1955_v45, %v1948_v30 }
0x1b1e   :  { %1959 = vrot.lane.b32.xlu1 %v1958_v57, %s7277_s2 }
0x1b90   :  { %v1960_v46 = vpop.permute.xlu1 %1959 }
0x1b91   :  { %6258 = vmatmul.mubr.msk.f32.vlgmr.msra.gmra.mrb[10].mxu1 %vm217_vm5, %v1960_v46 }
0x1b92   :  { %6634 = vmatpush3.bf16.msra.mxu1 %v7806_v15  ;;  %6279 = vmatprep.mubr.msk.f32.mxu1 %vm7273_vm0, %v7274_v1 }
0x1b93   :  { %6635 = vmatprep.subr.bf16.mxu1 %v7272_v0 }
0x1b96   :  { %6637 = vmatpush3.bf16.msra.mxu1 %v7824_v24 }
0x1b97   :  { %6644 = vmatprep.subr.bf16.mxu1 %v7272_v0 }
0x1c64   :  { %v2029_v2 = vpop.f32.mrb[10].mxu1 }
0x1c65   :  { %v2100_v11 = vadd.f32 %v2099_v13, %v2029_v2  ;;  %v6259_v62 = vpop.f32.mrb[11].mxu1 }
0x1c67   :  { %v2109_v14 = vadd.f32 %v8012_v54, %v2100_v11 }
0x1c69   :  { %6977 = vtanh.f32 %v2109_v14  ;;  %v5897_v5 = vmul.f32 -1.442695, %v2109_v14 }
0x1c6b   :  { %6979 = vpow2.f32 %v5897_v5 }
0x1c73   :  { %v6978_v16 = vpop.eup %6977 }
0x1c74   :  { %2119 = vrot.lane.b32.xlu1 %v6978_v16, %s7276_s16 }
0x1c75   :  { %v6980_v43 = vpop.eup %6979 }
0x1c76   :  { %v2113_v52 = vadd.f32 1.0, %v6980_v43 }
0x1c78   :  { %6981 = vrcp.f32 %v2113_v52 }
0x1c82   :  { %v6982_v20 = vpop.eup %6981 }
0x1c83   :  { %v2117_v12 = vmul.f32 0.0, %v6982_v20 }
0x1ce6   :  { %v2120_v39 = vpop.permute.xlu1 %2119 }
0x1ce7   :  { %v2122_v27 = vmul.f32 %v6982_v20, %v2120_v39 }
0x1ce9   :  { %2124 = vrot.lane.b32.xlu1 %v2122_v27, %s7277_s2 }
0x1d5b   :  { %v2125_v28 = vpop.permute.xlu1 %2124 }
0x1d5c   :  { %v8017_v29 = vadd.f32 %v2125_v28, %v2117_v12 }
0x1d5e   :  { %6983 = vtanh.f32 %v8017_v29 }
0x1d68   :  { %v6984_v31 = vpop.eup %6983 }
0x1d69   :  { %2130 = vrot.lane.b32.xlu1 %v6984_v31, %s7276_s16 }
0x1ddb   :  { %v2131_v50 = vpop.permute.xlu1 %2130 }
0x1ddc   :  { %v8021_v8 = vmul.f32 %v6982_v20, %v2131_v50 }
0x1dde   :  { %2135 = vrot.lane.b32.xlu0 %v8021_v8, %s7277_s2 }
0x1e50   :  { %v2136_v21 = vpop.permute.xlu0 %2135 }
0x1e51   :  { %6280 = vmatmul.mubr.msk.f32.vlgmr.msra.gmra.mrb[12].mxu1 %vm217_vm5, %v2136_v21 }
0x1e52   :  { %6646 = vmatpush3.bf16.msra.mxu1 %v7975_v34  ;;  %6301 = vmatprep.mubr.msk.f32.mxu1 %vm7273_vm0, %v7274_v1 }
0x1e53   :  { %6647 = vmatprep.subr.bf16.mxu1 %v7272_v0 }
0x1e56   :  { %6649 = vmatpush3.bf16.msra.mxu1 %v7982_v51 }
0x1e57   :  { %6656 = vmatprep.subr.bf16.mxu1 %v7272_v0 }
0x1e59   :  { %6302 = vmatmul.mubr.msk.f32.vlgmr.msra.gmra.mrb[14].mxu1 %vm217_vm5, %v2136_v21 }
0x1e5a   :  { %6658 = vmatpush3.bf16.msra.mxu1 %v7955_v10  ;;  %6323 = vmatprep.mubr.msk.f32.mxu1 %vm7273_vm0, %v7274_v1 }
0x1e5b   :  { %6659 = vmatprep.subr.bf16.mxu1 %v7272_v0 }
0x1e5e   :  { %6661 = vmatpush3.bf16.msra.mxu1 %v7978_v38 }
0x1e5f   :  { %6668 = vmatprep.subr.bf16.mxu1 %v7272_v0 }
0x1f24   :  { %v2205_v36 = vpop.f32.mrb[12].mxu1 }
0x1f25   :  { %v2216_v59 = vrot.slane %v2205_v36, %v7880_v56  ;;  %v6281_v53 = vpop.f32.mrb[13].mxu1 }
0x1f27   :  { %v2217_v22 = vcombine.high %v2216_v59, %v2216_v59  ;;  %v2224_v23 = vrot.slane %v2216_v59, %v7880_v56 }
0x1f29   :  { %v2231_v37 = vrot.slane %v2217_v22, %v7880_v56  ;;  %v2235_v26 = vrot.slane %v2224_v23, %v7884_v3 }
0x1f2b   :  { %v2239_v47 = vrot.slane %v2231_v37, %v7884_v3  ;;  %v2242_v60 = vadd.f32 %v2235_v26, %v7891_v25 }
0x1f2c   :  { %v8045_v61 = vpop.f32.mrb[14].mxu1 }
0x1f2d   :  { %v2243_v40 = vadd.f32 %v2239_v47, %v7888_v19  ;;  %6985 = vtanh.f32 %v2242_v60  ;;  %v6303_v55 = vpop.f32.mrb[15].mxu1 }
0x1f2f   :  { %6987 = vtanh.f32 %v2243_v40 }
0x1f37   :  { %v6986_v41 = vpop.eup %6985 }
0x1f38   :  { %v2246_v4 = vmul.f32 %v6986_v41, %v7898_v18 }
0x1f39   :  { %v6988_v58 = vpop.eup %6987 }
0x1f3a   :  { %v2248_v44 = vsel %vm217_vm5, %v2246_v4, 0.0  ;;  %v2247_v6 = vmul.f32 %v6988_v58, %v7898_v18 }
0x1f3b   :  { %2249 = vadd.xlane.f32.xlu1 %v2248_v44 }
0x1f3c   :  { %v2251_v30 = vsel %vm217_vm5, %v2247_v6, 0.0 }
0x1f3d   :  { %2252 = vadd.xlane.f32.xlu0 %v2251_v30 }
0x1fc8   :  { %v2250_v45 = vpop.xlane.xlu1 %2249 }
0x1fc9   :  { %v2254_v57 = vmul.f32 %v2250_v45, %v7916_v17 }
0x1fca   :  { %v2253_v13 = vpop.xlane.xlu0 %2252 }
0x1fcb   :  { %v2255_v9 = vmul.f32 %v2253_v13, %v7918_v35  ;;  %2259 = vperm.xlu0 %6836, %v2254_v57  }
0x1fcd   :  { %2262 = vperm.xlu1 %6835, %v2255_v9  }
0x204a   :  { %v2260_v46 = vpop.permute.xlu0 %2259 }
0x204b   :  { %v2267_v11 = vrot.slane %v2260_v46, %v7923_v49 }
0x204c   :  { %v2263_v2 = vpop.permute.xlu1 %2262 }
0x204d   :  { %v2271_v62 = vrot.slane %v2263_v2, %v7923_v49 }
0x204f   :  { %v2272_v14 = vsel %vm354_vm4, %v2271_v62, %v2267_v11 }
0x2050   :  { %v2274_v16 = vsel %vm1874_vm9, %v2272_v14, -inf }
0x2051   :  { %2275 = vmax.xlane.f32.xlu1 %v2274_v16 }
0x20de   :  { %v2276_v5 = vpop.xlane.xlu1 %2275 }
0x20df   :  { %v2281_v43 = vrot.slane %v2276_v5, %v7884_v3  ;;  %v2285_v52 = vrot.slane %v2276_v5, %v7904_v63 }
0x20e1   :  { %v2288_v20 = vsub.f32 %v2254_v57, %v2281_v43  ;;  %v2289_v39 = vsub.f32 %v2255_v9, %v2285_v52 }
0x20e3   :  { %v2290_v27 = vmul.f32 1.442695, %v2288_v20  ;;  %v2292_v12 = vmul.f32 1.442695, %v2289_v39 }
0x20e5   :  { %6989 = vpow2.f32 %v2290_v27 }
0x20e6   :  { %6991 = vpow2.f32 %v2292_v12 }
0x20ef   :  { %v6990_v28 = vpop.eup %6989 }
0x20f0   :  { %2297 = vperm.xlu0 %6836, %v6990_v28   ;;  %v6992_v31 = vpop.eup %6991 }
0x20f4   :  { %2300 = vperm.xlu0 %6836, %v6992_v31  }
0x216f   :  { %v2298_v50 = vpop.permute.xlu0 %2297 }
0x2170   :  { %v2305_v36 = vrot.slane %v2298_v50, %v7923_v49 }
0x2173   :  { %v2301_v21 = vpop.permute.xlu0 %2300 }
0x2174   :  { %v2309_v59 = vrot.slane %v2301_v21, %v7923_v49 }
0x2176   :  { %v2310_v53 = vsel %vm354_vm4, %v2309_v59, %v2305_v36 }
0x2177   :  { %v2312_v22 = vsel %vm1874_vm9, %v2310_v53, 0.0 }
0x2178   :  { %2313 = vadd.xlane.f32.xlu0 %v2312_v22 }
0x2205   :  { %v2314_v23 = vpop.xlane.xlu0 %2313 }
0x2206   :  { %6993 = vrcp.f32 %v2314_v23 }
0x2210   :  { %v6994_v37 = vpop.eup %6993 }
0x2211   :  { %v2324_v26 = vrot.slane %v6994_v37, %v7904_v63  ;;  %v2320_v47 = vrot.slane %v6994_v37, %v7884_v3 }
0x2213   :  { %v2328_v60 = vmul.f32 %v6992_v31, %v2324_v26  ;;  %v2327_v40 = vmul.f32 %v6990_v28, %v2320_v47  ;;  %v5112_v47 = vrot.slane %v8021_v8, %v7880_v56 }
0x2215   :  { %2336 = vperm.xlu0 %6836, %v2328_v60   ;;  %2331 = vperm.xlu1 %6835, %v2327_v40  }
0x2294   :  { %v8066_v55 = vpop.permute.xlu0 %2336  ;;  %v8068_v41 = vpop.permute.xlu1 %2331 }
0x2295   :  { %v2340_v4 = vmul.f32 %v8066_v55, %v7869_v7  ;;  %v2339_v58 = vmul.f32 %v8068_v41, %v7867_v48 }
0x2297   :  { %v2348_v44 = vsel %vm1547_vm8, %v2340_v4, 0.0  ;;  %v2341_v6 = vsel %vm1547_vm8, %v2339_v58, 0.0  ;;  %v5113_v4 = vcombine.high %v5112_v47, %v5112_v47 }
0x2298   :  { %v2349_v30 = vrot.slane %v2348_v44, 4  ;;  %v2342_v45 = vrot.slane %v2341_v6, 4 }
0x229a   :  { %v2350_v57 = vadd.f32 %v2349_v30, %v2348_v44  ;;  %v2343_v13 = vadd.f32 %v2342_v45, %v2341_v6  ;;  %v5120_v44 = vrot.slane %v5112_v47, %v7880_v56  ;;  %v5127_v45 = vrot.slane %v5113_v4, %v7880_v56 }
0x229c   :  { %v2351_v9 = vrot.slane %v2350_v57, 2  ;;  %v2344_v46 = vrot.slane %v2343_v13, 2 }
0x229e   :  { %v2352_v2 = vadd.f32 %v2351_v9, %v2350_v57  ;;  %v2345_v11 = vadd.f32 %v2344_v46, %v2343_v13 }
0x22a0   :  { %v2346_v62 = vrot.slane %v2345_v11, 1  ;;  %v2353_v14 = vrot.slane %v2352_v2, 1 }
0x22a2   :  { %v8076_v16 = vadd.f32 %v2346_v62, %v2345_v11  ;;  %v8078_v5 = vadd.f32 %v2353_v14, %v2352_v2 }
0x22a4   :  { %v2357_v43 = vsel %vm354_vm4, %v8078_v5, %v8076_v16 }
0x22a5   :  { %2358 = vrot.lane.b32.xlu1 %v2357_v43, %s7277_s2 }
0x2317   :  { %v2359_v52 = vpop.permute.xlu1 %2358 }
0x2318   :  { %6291 = vmatmul.mubr.msk.f32.vlgmr.msra.gmra.mrb[14].mxu0 %vm217_vm5, %v2359_v52 }
0x2319   :  { %6652 = vmatpush3.bf16.msra.mxu0 %v7806_v15  ;;  %6312 = vmatprep.mubr.msk.f32.mxu0 %vm7273_vm0, %v7274_v1 }
0x231a   :  { %6653 = vmatprep.subr.bf16.mxu0 %v7272_v0 }
0x231d   :  { %6655 = vmatpush3.bf16.msra.mxu0 %v7824_v24 }
0x231e   :  { %6662 = vmatprep.subr.bf16.mxu0 %v7272_v0 }
0x23eb   :  { %v2428_v20 = vpop.f32.mrb[14].mxu0 }
0x23ec   :  { %v2499_v39 = vadd.f32 %v8045_v61, %v2428_v20  ;;  %v6292_v27 = vpop.f32.mrb[15].mxu0 }
0x23ee   :  { %v2502_v12 = vadd.f32 %v8012_v54, %v2499_v39 }
0x23f0   :  { %6995 = vtanh.f32 %v2502_v12  ;;  %v5901_v31 = vmul.f32 -1.442695, %v2502_v12 }
0x23f2   :  { %6997 = vpow2.f32 %v5901_v31 }
0x23fa   :  { %v6996_v28 = vpop.eup %6995 }
0x23fb   :  { %2512 = vrot.lane.b32.xlu1 %v6996_v28, %s7276_s16 }
0x23fc   :  { %v6998_v50 = vpop.eup %6997 }
0x23fd   :  { %v2506_v21 = vadd.f32 1.0, %v6998_v50 }
0x23ff   :  { %6999 = vrcp.f32 %v2506_v21 }
0x2409   :  { %v7000_v36 = vpop.eup %6999 }
0x240a   :  { %v2510_v22 = vmul.f32 %v7000_v36, %v8017_v29 }
0x246d   :  { %v2513_v59 = vpop.permute.xlu1 %2512 }
0x246e   :  { %v2515_v53 = vmul.f32 %v7000_v36, %v2513_v59 }
0x2470   :  { %2517 = vrot.lane.b32.xlu1 %v2515_v53, %s7277_s2 }
0x24e2   :  { %v2518_v61 = vpop.permute.xlu1 %2517 }
0x24e3   :  { %v8096_v23 = vadd.f32 %v2518_v61, %v2510_v22 }
0x24e5   :  { %7001 = vtanh.f32 %v8096_v23 }
0x24ef   :  { %v7002_v37 = vpop.eup %7001 }
0x24f0   :  { %2523 = vrot.lane.b32.xlu0 %v7002_v37, %s7276_s16 }
0x2562   :  { %v2524_v26 = vpop.permute.xlu0 %2523 }
0x2563   :  { %v2526_v60 = vmul.f32 %v7000_v36, %v2524_v26 }
0x2565   :  { %v5136_v40 = vrot.slane %v2526_v60, %v7880_v56  ;;  %2528 = vrot.lane.b32.xlu1 %v2526_v60, %s7277_s2 }
0x2567   :  { %v5137_v58 = vcombine.high %v5136_v40, %v5136_v40  ;;  %v5144_v29 = vrot.slane %v5136_v40, %v7880_v56 }
0x2569   :  { %v5151_v6 = vrot.slane %v5137_v58, %v7880_v56  ;;  %v5287_v30 = vrot.slane %v5144_v29, %v7884_v3 }
0x256b   :  { %v5291_v57 = vrot.slane %v5151_v6, %v7884_v3  ;;  %v8111_v8 = vsel %vm1526_vm13, %v5120_v44, %v5287_v30 }
0x256d   :  { %v8114_v13 = vsel %vm1526_vm13, %v5127_v45, %v5291_v57 }
0x25d7   :  { %v2529_v9 = vpop.permute.xlu1 %2528 }
0x25d8   :  { %6313 = vmatmul.mubr.msk.f32.vlgmr.msra.gmra.mrb[16].mxu0 %vm217_vm5, %v2529_v9 }
0x25d9   :  { %6664 = vmatpush3.bf16.msra.mxu0 %v7975_v34  ;;  %6334 = vmatprep.mubr.msk.f32.mxu0 %vm7273_vm0, %v7274_v1 }
0x25da   :  { %6665 = vmatprep.subr.bf16.mxu0 %v7272_v0 }
0x25dd   :  { %6667 = vmatpush3.bf16.msra.mxu0 %v7982_v51 }
0x25de   :  { %6674 = vmatprep.subr.bf16.mxu0 %v7272_v0 }
0x25e0   :  { %6335 = vmatmul.mubr.msk.f32.vlgmr.msra.gmra.mrb[18].mxu0 %vm217_vm5, %v2529_v9 }
0x25e1   :  { %6676 = vmatpush3.bf16.msra.mxu0 %v7955_v10  ;;  %6356 = vmatprep.mubr.msk.f32.mxu0 %vm7273_vm0, %v7274_v1 }
0x25e2   :  { %6677 = vmatprep.subr.bf16.mxu0 %v7272_v0 }
0x25e5   :  { %6679 = vmatpush3.bf16.msra.mxu0 %v7978_v38 }
0x25e6   :  { %6686 = vmatprep.subr.bf16.mxu0 %v7272_v0 }
0x26ab   :  { %v2598_v46 = vpop.f32.mrb[16].mxu0 }
0x26ac   :  { %v2609_v2 = vrot.slane %v2598_v46, %v7880_v56  ;;  %v6314_v11 = vpop.f32.mrb[17].mxu0 }
0x26ae   :  { %v2610_v62 = vcombine.high %v2609_v2, %v2609_v2  ;;  %v2617_v14 = vrot.slane %v2609_v2, %v7880_v56 }
0x26b0   :  { %v2624_v43 = vrot.slane %v2610_v62, %v7880_v56  ;;  %v2628_v52 = vrot.slane %v2617_v14, %v7884_v3 }
0x26b2   :  { %v2632_v20 = vrot.slane %v2624_v43, %v7884_v3  ;;  %v2635_v39 = vadd.f32 %v2628_v52, %v7891_v25 }
0x26b3   :  { %v8136_v27 = vpop.f32.mrb[18].mxu0 }
0x26b4   :  { %v2636_v12 = vadd.f32 %v2632_v20, %v7888_v19  ;;  %7003 = vtanh.f32 %v2635_v39  ;;  %v6336_v28 = vpop.f32.mrb[19].mxu0 }
0x26b6   :  { %7005 = vtanh.f32 %v2636_v12 }
0x26be   :  { %v7004_v31 = vpop.eup %7003 }
0x26bf   :  { %v2639_v50 = vmul.f32 %v7004_v31, %v7898_v18 }
0x26c0   :  { %v7006_v21 = vpop.eup %7005 }
0x26c1   :  { %v2641_v36 = vsel %vm217_vm5, %v2639_v50, 0.0  ;;  %v2640_v59 = vmul.f32 %v7006_v21, %v7898_v18 }
0x26c2   :  { %2642 = vadd.xlane.f32.xlu0 %v2641_v36 }
0x26c3   :  { %v2644_v53 = vsel %vm217_vm5, %v2640_v59, 0.0 }
0x26c4   :  { %2645 = vadd.xlane.f32.xlu1 %v2644_v53 }
0x274f   :  { %v2643_v22 = vpop.xlane.xlu0 %2642 }
0x2750   :  { %v2647_v61 = vmul.f32 %v2643_v22, %v7916_v17 }
0x2751   :  { %v2646_v37 = vpop.xlane.xlu1 %2645 }
0x2752   :  { %v2648_v26 = vmul.f32 %v2646_v37, %v7918_v35  ;;  %2652 = vperm.xlu0 %6836, %v2647_v61  }
0x2754   :  { %2655 = vperm.xlu1 %6835, %v2648_v26  }
0x27d1   :  { %v2653_v47 = vpop.permute.xlu0 %2652 }
0x27d2   :  { %v2660_v40 = vrot.slane %v2653_v47, %v7923_v49 }
0x27d3   :  { %v2656_v60 = vpop.permute.xlu1 %2655 }
0x27d4   :  { %v2664_v4 = vrot.slane %v2656_v60, %v7923_v49 }
0x27d6   :  { %v2665_v58 = vsel %vm354_vm4, %v2664_v4, %v2660_v40 }
0x27d7   :  { %v2667_v29 = vsel %vm1874_vm9, %v2665_v58, -inf }
0x27d8   :  { %2668 = vmax.xlane.f32.xlu0 %v2667_v29 }
0x2865   :  { %v2669_v44 = vpop.xlane.xlu0 %2668 }
0x2866   :  { %v2674_v6 = vrot.slane %v2669_v44, %v7884_v3  ;;  %v2678_v30 = vrot.slane %v2669_v44, %v7904_v63 }
0x2868   :  { %v2681_v45 = vsub.f32 %v2647_v61, %v2674_v6  ;;  %v2682_v57 = vsub.f32 %v2648_v26, %v2678_v30 }
0x286a   :  { %v2683_v9 = vmul.f32 1.442695, %v2681_v45  ;;  %v2685_v46 = vmul.f32 1.442695, %v2682_v57 }
0x286c   :  { %7007 = vpow2.f32 %v2683_v9 }
0x286d   :  { %7009 = vpow2.f32 %v2685_v46 }
0x2876   :  { %v7008_v2 = vpop.eup %7007 }
0x2877   :  { %2690 = vperm.xlu1 %6835, %v7008_v2   ;;  %v7010_v11 = vpop.eup %7009 }
0x287b   :  { %2693 = vperm.xlu1 %6835, %v7010_v11  }
0x28f6   :  { %v2691_v62 = vpop.permute.xlu1 %2690 }
0x28f7   :  { %v2698_v43 = vrot.slane %v2691_v62, %v7923_v49 }
0x28fa   :  { %v2694_v14 = vpop.permute.xlu1 %2693 }
0x28fb   :  { %v2702_v52 = vrot.slane %v2694_v14, %v7923_v49 }
0x28fd   :  { %v2703_v20 = vsel %vm354_vm4, %v2702_v52, %v2698_v43 }
0x28fe   :  { %v2705_v39 = vsel %vm1874_vm9, %v2703_v20, 0.0 }
0x28ff   :  { %2706 = vadd.xlane.f32.xlu1 %v2705_v39 }
0x298c   :  { %v2707_v12 = vpop.xlane.xlu1 %2706 }
0x298d   :  { %7011 = vrcp.f32 %v2707_v12 }
0x2997   :  { %v7012_v28 = vpop.eup %7011 }
0x2998   :  { %v2717_v31 = vrot.slane %v7012_v28, %v7904_v63  ;;  %v2713_v50 = vrot.slane %v7012_v28, %v7884_v3 }
0x299a   :  { %v2721_v21 = vmul.f32 %v7010_v11, %v2717_v31  ;;  %v2720_v36 = vmul.f32 %v7008_v2, %v2713_v50 }
0x299c   :  { %2729 = vperm.xlu1 %6835, %v2721_v21   ;;  %2724 = vperm.xlu0 %6836, %v2720_v36  }
0x2a1b   :  { %v8157_v59 = vpop.permute.xlu1 %2729  ;;  %v8159_v53 = vpop.permute.xlu0 %2724 }
0x2a1c   :  { %v2733_v22 = vmul.f32 %v8157_v59, %v7869_v7  ;;  %v2732_v61 = vmul.f32 %v8159_v53, %v7867_v48 }
0x2a1e   :  { %v2741_v37 = vsel %vm1547_vm8, %v2733_v22, 0.0  ;;  %v2734_v26 = vsel %vm1547_vm8, %v2732_v61, 0.0 }
0x2a1f   :  { %v2742_v47 = vrot.slane %v2741_v37, 4  ;;  %v2735_v60 = vrot.slane %v2734_v26, 4 }
0x2a21   :  { %v2743_v40 = vadd.f32 %v2742_v47, %v2741_v37  ;;  %v2736_v4 = vadd.f32 %v2735_v60, %v2734_v26 }
0x2a23   :  { %v2744_v58 = vrot.slane %v2743_v40, 2  ;;  %v2737_v29 = vrot.slane %v2736_v4, 2 }
0x2a25   :  { %v2745_v44 = vadd.f32 %v2744_v58, %v2743_v40  ;;  %v2738_v6 = vadd.f32 %v2737_v29, %v2736_v4 }
0x2a27   :  { %v2746_v30 = vrot.slane %v2745_v44, 1  ;;  %v2739_v45 = vrot.slane %v2738_v6, 1 }
0x2a29   :  { %v8167_v57 = vadd.f32 %v2739_v45, %v2738_v6  ;;  %v8169_v9 = vadd.f32 %v2746_v30, %v2745_v44 }
0x2a2b   :  { %v2750_v46 = vsel %vm354_vm4, %v8169_v9, %v8167_v57 }
0x2a2c   :  { %2751 = vrot.lane.b32.xlu0 %v2750_v46, %s7277_s2 }
0x2a9e   :  { %v2752_v2 = vpop.permute.xlu0 %2751 }
0x2a9f   :  { %6324 = vmatmul.mubr.msk.f32.vlgmr.msra.gmra.mrb[16].mxu1 %vm217_vm5, %v2752_v2 }
0x2aa0   :  { %6670 = vmatpush3.bf16.msra.mxu1 %v7806_v15  ;;  %6345 = vmatprep.mubr.msk.f32.mxu1 %vm7273_vm0, %v7274_v1 }
0x2aa1   :  { %6671 = vmatprep.subr.bf16.mxu1 %v7272_v0 }
0x2aa4   :  { %6673 = vmatpush3.bf16.msra.mxu1 %v7824_v24 }
0x2aa5   :  { %6680 = vmatprep.subr.bf16.mxu1 %v7272_v0 }
0x2b72   :  { %v2821_v11 = vpop.f32.mrb[16].mxu1 }
0x2b73   :  { %v2892_v62 = vadd.f32 %v8136_v27, %v2821_v11  ;;  %v6325_v14 = vpop.f32.mrb[17].mxu1 }
0x2b75   :  { %v2895_v43 = vadd.f32 %v8012_v54, %v2892_v62 }
0x2b77   :  { %7013 = vtanh.f32 %v2895_v43  ;;  %v5905_v20 = vmul.f32 -1.442695, %v2895_v43 }
0x2b79   :  { %7015 = vpow2.f32 %v5905_v20 }
0x2b81   :  { %v7014_v52 = vpop.eup %7013 }
0x2b82   :  { %2905 = vrot.lane.b32.xlu0 %v7014_v52, %s7276_s16 }
0x2b83   :  { %v7016_v39 = vpop.eup %7015 }
0x2b84   :  { %v2899_v12 = vadd.f32 1.0, %v7016_v39 }
0x2b86   :  { %7017 = vrcp.f32 %v2899_v12 }
0x2b90   :  { %v7018_v28 = vpop.eup %7017 }
0x2b91   :  { %v2903_v21 = vmul.f32 %v7018_v28, %v8096_v23 }
0x2bf4   :  { %v2906_v31 = vpop.permute.xlu0 %2905 }
0x2bf5   :  { %v2908_v50 = vmul.f32 %v7018_v28, %v2906_v31 }
0x2bf7   :  { %2910 = vrot.lane.b32.xlu0 %v2908_v50, %s7277_s2 }
0x2c69   :  { %v2911_v27 = vpop.permute.xlu0 %2910 }
0x2c6a   :  { %v8187_v36 = vadd.f32 %v2911_v27, %v2903_v21 }
0x2c6c   :  { %7019 = vtanh.f32 %v8187_v36 }
0x2c76   :  { %v7020_v22 = vpop.eup %7019 }
0x2c77   :  { %2916 = vrot.lane.b32.xlu1 %v7020_v22, %s7276_s16 }
0x2ce9   :  { %v2917_v61 = vpop.permute.xlu1 %2916 }
0x2cea   :  { %v2919_v37 = vmul.f32 %v7018_v28, %v2917_v61 }
0x2cec   :  { %v5158_v26 = vrot.slane %v2919_v37, %v7880_v56  ;;  %2921 = vrot.lane.b32.xlu0 %v2919_v37, %s7277_s2 }
0x2cee   :  { %v5159_v47 = vcombine.high %v5158_v26, %v5158_v26  ;;  %v5166_v60 = vrot.slane %v5158_v26, %v7880_v56 }
0x2cf0   :  { %v5173_v40 = vrot.slane %v5159_v47, %v7880_v56  ;;  %v5297_v23 = vrot.slane %v5166_v60, %v7884_v3 }
0x2cf2   :  { %v5301_v4 = vrot.slane %v5173_v40, %v7884_v3  ;;  %v8199_v58 = vsel %vm1529_vm14, %v8111_v8, %v5297_v23 }
0x2cf4   :  { %v8203_v29 = vsel %vm1529_vm14, %v8114_v13, %v5301_v4 }
0x2d5e   :  { %v2922_v44 = vpop.permute.xlu0 %2921 }
0x2d5f   :  { %6346 = vmatmul.mubr.msk.f32.vlgmr.msra.gmra.mrb[18].mxu1 %vm217_vm5, %v2922_v44 }
0x2d60   :  { %6682 = vmatpush3.bf16.msra.mxu1 %v7975_v34  ;;  %6367 = vmatprep.mubr.msk.f32.mxu1 %vm7273_vm0, %v7274_v1 }
0x2d61   :  { %6683 = vmatprep.subr.bf16.mxu1 %v7272_v0 }
0x2d64   :  { %6685 = vmatpush3.bf16.msra.mxu1 %v7982_v51 }
0x2d65   :  { %6692 = vmatprep.subr.bf16.mxu1 %v7272_v0 }
0x2d67   :  { %6368 = vmatmul.mubr.msk.f32.vlgmr.msra.gmra.mrb[20].mxu1 %vm217_vm5, %v2922_v44 }
0x2d68   :  { %6694 = vmatpush3.bf16.msra.mxu1 %v7955_v10  ;;  %6389 = vmatprep.mubr.msk.f32.mxu1 %vm7273_vm0, %v7274_v1 }
0x2d69   :  { %6695 = vmatprep.subr.bf16.mxu1 %v7272_v0 }
0x2d6c   :  { %6697 = vmatpush3.bf16.msra.mxu1 %v7978_v38 }
0x2d6d   :  { %6704 = vmatprep.subr.bf16.mxu1 %v7272_v0 }
0x2e32   :  { %v2991_v8 = vpop.f32.mrb[18].mxu1 }
0x2e33   :  { %v3002_v13 = vrot.slane %v2991_v8, %v7880_v56  ;;  %v6347_v6 = vpop.f32.mrb[19].mxu1 }
0x2e35   :  { %v3003_v30 = vcombine.high %v3002_v13, %v3002_v13  ;;  %v3010_v45 = vrot.slane %v3002_v13, %v7880_v56 }
0x2e37   :  { %v3017_v46 = vrot.slane %v3003_v30, %v7880_v56  ;;  %v3021_v2 = vrot.slane %v3010_v45, %v7884_v3 }
0x2e39   :  { %v3025_v11 = vrot.slane %v3017_v46, %v7884_v3  ;;  %v3028_v62 = vadd.f32 %v3021_v2, %v7891_v25 }
0x2e3a   :  { %v8225_v14 = vpop.f32.mrb[20].mxu1 }
0x2e3b   :  { %v3029_v43 = vadd.f32 %v3025_v11, %v7888_v19  ;;  %7021 = vtanh.f32 %v3028_v62  ;;  %v6369_v52 = vpop.f32.mrb[21].mxu1 }
0x2e3d   :  { %7023 = vtanh.f32 %v3029_v43 }
0x2e45   :  { %v7022_v20 = vpop.eup %7021 }
0x2e46   :  { %v3032_v39 = vmul.f32 %v7022_v20, %v7898_v18 }
0x2e47   :  { %v7024_v12 = vpop.eup %7023 }
0x2e48   :  { %v3034_v28 = vsel %vm217_vm5, %v3032_v39, 0.0  ;;  %v3033_v31 = vmul.f32 %v7024_v12, %v7898_v18 }
0x2e49   :  { %3035 = vadd.xlane.f32.xlu1 %v3034_v28 }
0x2e4a   :  { %v3037_v50 = vsel %vm217_vm5, %v3033_v31, 0.0 }
0x2e4b   :  { %3038 = vadd.xlane.f32.xlu0 %v3037_v50 }
0x2ed6   :  { %v3036_v21 = vpop.xlane.xlu1 %3035 }
0x2ed7   :  { %v3040_v27 = vmul.f32 %v3036_v21, %v7916_v17 }
0x2ed8   :  { %v3039_v22 = vpop.xlane.xlu0 %3038 }
0x2ed9   :  { %v3041_v61 = vmul.f32 %v3039_v22, %v7918_v35  ;;  %3045 = vperm.xlu0 %6836, %v3040_v27  }
0x2edb   :  { %3048 = vperm.xlu1 %6835, %v3041_v61  }
0x2f58   :  { %v3046_v37 = vpop.permute.xlu0 %3045 }
0x2f59   :  { %v3053_v47 = vrot.slane %v3046_v37, %v7923_v49 }
0x2f5a   :  { %v3049_v26 = vpop.permute.xlu1 %3048 }
0x2f5b   :  { %v3057_v60 = vrot.slane %v3049_v26, %v7923_v49 }
0x2f5d   :  { %v3058_v18 = vsel %vm354_vm4, %v3057_v60, %v3053_v47 }
0x2f5e   :  { %v3060_v40 = vsel %vm1874_vm9, %v3058_v18, -inf }
0x2f5f   :  { %3061 = vmax.xlane.f32.xlu1 %v3060_v40 }
0x2fec   :  { %v3062_v23 = vpop.xlane.xlu1 %3061 }
0x2fed   :  { %v3067_v4 = vrot.slane %v3062_v23, %v7884_v3  ;;  %v3071_v44 = vrot.slane %v3062_v23, %v7904_v63 }
0x2fef   :  { %v3074_v8 = vsub.f32 %v3040_v27, %v3067_v4  ;;  %v3075_v13 = vsub.f32 %v3041_v61, %v3071_v44 }
0x2ff1   :  { %v3076_v6 = vmul.f32 1.442695, %v3074_v8  ;;  %v3078_v30 = vmul.f32 1.442695, %v3075_v13 }
0x2ff3   :  { %7025 = vpow2.f32 %v3076_v6 }
0x2ff4   :  { %7027 = vpow2.f32 %v3078_v30 }
0x2ffd   :  { %v7026_v45 = vpop.eup %7025 }
0x2ffe   :  { %3083 = vperm.xlu0 %6836, %v7026_v45   ;;  %v7028_v46 = vpop.eup %7027 }
0x3002   :  { %3086 = vperm.xlu0 %6836, %v7028_v46  }
0x307d   :  { %v3084_v2 = vpop.permute.xlu0 %3083 }
0x307e   :  { %v3091_v62 = vrot.slane %v3084_v2, %v7923_v49  ;;  %v5368_v2 = vsel %vm1526_vm13, %v8076_v16, %v8167_v57 }
0x3081   :  { %v3087_v11 = vpop.permute.xlu0 %3086 }
0x3082   :  { %v3095_v43 = vrot.slane %v3087_v11, %v7923_v49  ;;  %v5369_v11 = vsel %vm1526_vm13, %v8078_v5, %v8169_v9 }
0x3084   :  { %v3096_v52 = vsel %vm354_vm4, %v3095_v43, %v3091_v62 }
0x3085   :  { %v3098_v20 = vsel %vm1874_vm9, %v3096_v52, 0.0 }
0x3086   :  { %3099 = vadd.xlane.f32.xlu0 %v3098_v20 }
0x3113   :  { %v3100_v39 = vpop.xlane.xlu0 %3099 }
0x3114   :  { %7029 = vrcp.f32 %v3100_v39 }
0x311e   :  { %v7030_v12 = vpop.eup %7029 }
0x311f   :  { %v3110_v28 = vrot.slane %v7030_v12, %v7904_v63  ;;  %v3106_v31 = vrot.slane %v7030_v12, %v7884_v3 }
0x3121   :  { %v3114_v50 = vmul.f32 %v7028_v46, %v3110_v28  ;;  %v3113_v21 = vmul.f32 %v7026_v45, %v3106_v31 }
0x3123   :  { %3122 = vperm.xlu0 %6836, %v3114_v50   ;;  %3117 = vperm.xlu1 %6835, %v3113_v21  }
0x31a2   :  { %v8246_v27 = vpop.permute.xlu0 %3122  ;;  %v8248_v22 = vpop.permute.xlu1 %3117 }
0x31a3   :  { %v3126_v61 = vmul.f32 %v8246_v27, %v7869_v7  ;;  %v3125_v37 = vmul.f32 %v8248_v22, %v7867_v48 }
0x31a5   :  { %v3134_v26 = vsel %vm1547_vm8, %v3126_v61, 0.0  ;;  %v3127_v47 = vsel %vm1547_vm8, %v3125_v37, 0.0 }
0x31a6   :  { %v3135_v60 = vrot.slane %v3134_v26, 4  ;;  %v3128_v18 = vrot.slane %v3127_v47, 4 }
0x31a8   :  { %v3136_v40 = vadd.f32 %v3135_v60, %v3134_v26  ;;  %v3129_v23 = vadd.f32 %v3128_v18, %v3127_v47 }
0x31aa   :  { %v3137_v4 = vrot.slane %v3136_v40, 2  ;;  %v3130_v44 = vrot.slane %v3129_v23, 2 }
0x31ac   :  { %v3138_v8 = vadd.f32 %v3137_v4, %v3136_v40  ;;  %v3131_v13 = vadd.f32 %v3130_v44, %v3129_v23 }
0x31ae   :  { %v3139_v6 = vrot.slane %v3138_v8, 1  ;;  %v3132_v30 = vrot.slane %v3131_v13, 1 }
0x31b0   :  { %v3133_v45 = vadd.f32 %v3132_v30, %v3131_v13  ;;  %v3140_v46 = vadd.f32 %v3139_v6, %v3138_v8 }
0x31b2   :  { %v3143_v62 = vsel %vm354_vm4, %v3140_v46, %v3133_v45  ;;  %v8264_v43 = vsel %vm1529_vm14, %v5368_v2, %v3133_v45  ;;  %v8267_v52 = vsel %vm1529_vm14, %v5369_v11, %v3140_v46 }
0x31b3   :  { %3144 = vrot.lane.b32.xlu1 %v3143_v62, %s7277_s2 }
0x3225   :  { %v3145_v20 = vpop.permute.xlu1 %3144 }
0x3226   :  { %6357 = vmatmul.mubr.msk.f32.vlgmr.msra.gmra.mrb[20].mxu0 %vm217_vm5, %v3145_v20 }
0x3227   :  { %6688 = vmatpush3.bf16.msra.mxu0 %v7806_v15  ;;  %6378 = vmatprep.mubr.msk.f32.mxu0 %vm7273_vm0, %v7274_v1 }
0x3228   :  { %6689 = vmatprep.subr.bf16.mxu0 %v7272_v0 }
0x322b   :  { %6691 = vmatpush3.bf16.msra.mxu0 %v7824_v24 }
0x322c   :  { %6698 = vmatprep.subr.bf16.mxu0 %v7272_v0 }
0x32f9   :  { %v3214_v16 = vpop.f32.mrb[20].mxu0 }
0x32fa   :  { %v3285_v5 = vadd.f32 %v8225_v14, %v3214_v16  ;;  %v6358_v57 = vpop.f32.mrb[21].mxu0 }
0x32fc   :  { %v3288_v9 = vadd.f32 %v8012_v54, %v3285_v5 }
0x32fe   :  { %7031 = vtanh.f32 %v3288_v9  ;;  %v5909_v12 = vmul.f32 -1.442695, %v3288_v9 }
0x3300   :  { %7033 = vpow2.f32 %v5909_v12 }
0x3308   :  { %v7032_v39 = vpop.eup %7031 }
0x3309   :  { %3298 = vrot.lane.b32.xlu1 %v7032_v39, %s7276_s16  ;;  %v8326_v39 = vld [vmem:[%s8873_s9] ss:$0 sm:$0xff] }
0x330a   :  { %v7034_v28 = vpop.eup %7033 }
0x330b   :  { %v3292_v31 = vadd.f32 1.0, %v7034_v28 }
0x330d   :  { %7035 = vrcp.f32 %v3292_v31 }
0x3317   :  { %v7036_v50 = vpop.eup %7035 }
0x3318   :  { %v3296_v37 = vmul.f32 %v7036_v50, %v8187_v36 }
0x337b   :  { %v3299_v21 = vpop.permute.xlu1 %3298 }
0x337c   :  { %v3301_v61 = vmul.f32 %v7036_v50, %v3299_v21 }
0x337e   :  { %3303 = vrot.lane.b32.xlu1 %v3301_v61, %s7277_s2 }
0x33f0   :  { %v3304_v14 = vpop.permute.xlu1 %3303 }
0x33f1   :  { %v8282_v26 = vadd.f32 %v3304_v14, %v3296_v37 }
0x33f3   :  { %7037 = vtanh.f32 %v8282_v26 }
0x33fd   :  { %v7038_v54 = vpop.eup %7037 }
0x33fe   :  { %3309 = vrot.lane.b32.xlu0 %v7038_v54, %s7276_s16 }
0x3470   :  { %v3310_v47 = vpop.permute.xlu0 %3309 }
0x3471   :  { %v3312_v60 = vmul.f32 %v7036_v50, %v3310_v47 }
0x3473   :  { %v5180_v18 = vrot.slane %v3312_v60, %v7880_v56  ;;  %3314 = vrot.lane.b32.xlu1 %v3312_v60, %s7277_s2 }
0x3475   :  { %v5181_v40 = vcombine.high %v5180_v18, %v5180_v18  ;;  %v5188_v23 = vrot.slane %v5180_v18, %v7880_v56 }
0x3477   :  { %v5195_v4 = vrot.slane %v5181_v40, %v7880_v56  ;;  %v5307_v36 = vrot.slane %v5188_v23, %v7884_v3 }
0x3479   :  { %v5311_v44 = vrot.slane %v5195_v4, %v7884_v3  ;;  %v8294_v8 = vsel %vm1532_vm15, %v8199_v58, %v5307_v36 }
0x347b   :  { %v8298_v13 = vsel %vm1532_vm15, %v8203_v29, %v5311_v44 }
0x34e5   :  { %v3315_v6 = vpop.permute.xlu1 %3314 }
0x34e6   :  { %6379 = vmatmul.mubr.msk.f32.vlgmr.msra.gmra.mrb[22].mxu0 %vm217_vm5, %v3315_v6 }
0x34e7   :  { %6700 = vmatpush3.bf16.msra.mxu0 %v7975_v34  ;;  %6400 = vmatprep.mubr.msk.f32.mxu0 %vm7273_vm0, %v7274_v1 }
0x34e8   :  { %6701 = vmatprep.subr.bf16.mxu0 %v7272_v0 }
0x34eb   :  { %6703 = vmatpush3.bf16.msra.mxu0 %v7982_v51 }
0x34ec   :  { %6710 = vmatprep.subr.bf16.mxu0 %v7272_v0 }
0x34ee   :  { %6401 = vmatmul.mubr.msk.f32.vlgmr.msra.gmra.mrb[24].mxu0 %vm217_vm5, %v3315_v6 }
0x34ef   :  { %6712 = vmatpush3.bf16.msra.mxu0 %v7955_v10  ;;  %6422 = vmatprep.mubr.msk.f32.mxu0 %vm7273_vm0, %v7274_v1 }
0x34f0   :  { %6713 = vmatprep.subr.bf16.mxu0 %v7272_v0 }
0x34f3   :  { %6715 = vmatpush3.bf16.msra.mxu0 %v7978_v38 }
0x34f4   :  { %6722 = vmatprep.subr.bf16.mxu0 %v7272_v0 }
0x35b9   :  { %v3384_v58 = vpop.f32.mrb[22].mxu0 }
0x35ba   :  { %v3395_v29 = vrot.slane %v3384_v58, %v7880_v56  ;;  %v6380_v30 = vpop.f32.mrb[23].mxu0 }
0x35bc   :  { %v3396_v45 = vcombine.high %v3395_v29, %v3395_v29  ;;  %v3403_v46 = vrot.slane %v3395_v29, %v7880_v56 }
0x35be   :  { %v3410_v2 = vrot.slane %v3396_v45, %v7880_v56  ;;  %v3414_v11 = vrot.slane %v3403_v46, %v7884_v3 }
0x35c0   :  { %v3418_v62 = vrot.slane %v3410_v2, %v7884_v3  ;;  %v3421_v20 = vadd.f32 %v3414_v11, %v7891_v25 }
0x35c1   :  { %v8320_v16 = vpop.f32.mrb[24].mxu0 }
0x35c2   :  { %v3422_v5 = vadd.f32 %v3418_v62, %v7888_v19  ;;  %7039 = vtanh.f32 %v3421_v20  ;;  %v6402_v57 = vpop.f32.mrb[25].mxu0 }
0x35c4   :  { %7041 = vtanh.f32 %v3422_v5 }
0x35cc   :  { %v7040_v9 = vpop.eup %7039 }
0x35cd   :  { %v3425_v12 = vmul.f32 %v8326_v39, %v7040_v9 }
0x35ce   :  { %v7042_v28 = vpop.eup %7041 }
0x35cf   :  { %v3427_v31 = vsel %vm217_vm5, %v3425_v12, 0.0  ;;  %v3426_v50 = vmul.f32 %v8326_v39, %v7042_v28 }
0x35d0   :  { %3428 = vadd.xlane.f32.xlu0 %v3427_v31 }
0x35d1   :  { %v3430_v21 = vsel %vm217_vm5, %v3426_v50, 0.0 }
0x35d2   :  { %3431 = vadd.xlane.f32.xlu1 %v3430_v21 }
0x365d   :  { %v3429_v61 = vpop.xlane.xlu0 %3428 }
0x365e   :  { %v3433_v37 = vmul.f32 %v3429_v61, %v7916_v17 }
0x365f   :  { %v3432_v14 = vpop.xlane.xlu1 %3431 }
0x3660   :  { %v3434_v54 = vmul.f32 %v3432_v14, %v7918_v35  ;;  %3438 = vperm.xlu0 %6836, %v3433_v37  }
0x3662   :  { %3441 = vperm.xlu1 %6835, %v3434_v54  }
0x36df   :  { %v3439_v47 = vpop.permute.xlu0 %3438 }
0x36e0   :  { %v3446_v18 = vrot.slane %v3439_v47, %v7923_v49 }
0x36e1   :  { %v3442_v60 = vpop.permute.xlu1 %3441 }
0x36e2   :  { %v3450_v40 = vrot.slane %v3442_v60, %v7923_v49 }
0x36e4   :  { %v3451_v23 = vsel %vm354_vm4, %v3450_v40, %v3446_v18 }
0x36e5   :  { %v3453_v4 = vsel %vm1874_vm9, %v3451_v23, -inf }
0x36e6   :  { %3454 = vmax.xlane.f32.xlu0 %v3453_v4 }
0x3773   :  { %v3455_v36 = vpop.xlane.xlu0 %3454 }
0x3774   :  { %v3460_v44 = vrot.slane %v3455_v36, %v7884_v3  ;;  %v3464_v6 = vrot.slane %v3455_v36, %v7904_v63 }
0x3776   :  { %v3467_v58 = vsub.f32 %v3433_v37, %v3460_v44  ;;  %v3468_v29 = vsub.f32 %v3434_v54, %v3464_v6 }
0x3778   :  { %v3469_v30 = vmul.f32 1.442695, %v3467_v58  ;;  %v3471_v45 = vmul.f32 1.442695, %v3468_v29 }
0x377a   :  { %7043 = vpow2.f32 %v3469_v30 }
0x377b   :  { %7045 = vpow2.f32 %v3471_v45 }
0x3784   :  { %v7044_v46 = vpop.eup %7043 }
0x3785   :  { %3476 = vperm.xlu1 %6835, %v7044_v46   ;;  %v7046_v2 = vpop.eup %7045 }
0x3789   :  { %3479 = vperm.xlu1 %6835, %v7046_v2  }
0x3804   :  { %v3477_v11 = vpop.permute.xlu1 %3476 }
0x3805   :  { %v3484_v20 = vrot.slane %v3477_v11, %v7923_v49 }
0x3808   :  { %v3480_v62 = vpop.permute.xlu1 %3479 }
0x3809   :  { %v3488_v5 = vrot.slane %v3480_v62, %v7923_v49 }
0x380b   :  { %v3489_v57 = vsel %vm354_vm4, %v3488_v5, %v3484_v20 }
0x380c   :  { %v3491_v9 = vsel %vm1874_vm9, %v3489_v57, 0.0 }
0x380d   :  { %3492 = vadd.xlane.f32.xlu1 %v3491_v9  ;;  %v8377_v9 = vld [vmem:[%s8876_s12] ss:$0 sm:$0xff] }
0x389a   :  { %v3493_v12 = vpop.xlane.xlu1 %3492 }
0x389b   :  { %7047 = vrcp.f32 %v3493_v12 }
0x38a5   :  { %v7048_v28 = vpop.eup %7047 }
0x38a6   :  { %v3503_v31 = vrot.slane %v7048_v28, %v7904_v63  ;;  %v3499_v50 = vrot.slane %v7048_v28, %v7884_v3 }
0x38a8   :  { %v3507_v21 = vmul.f32 %v7046_v2, %v3503_v31  ;;  %v3506_v61 = vmul.f32 %v7044_v46, %v3499_v50 }
0x38aa   :  { %3515 = vperm.xlu1 %6835, %v3507_v21   ;;  %3510 = vperm.xlu0 %6836, %v3506_v61  }
0x3929   :  { %v8346_v37 = vpop.permute.xlu1 %3515  ;;  %v8348_v14 = vpop.permute.xlu0 %3510 }
0x392a   :  { %v3519_v54 = vmul.f32 %v8346_v37, %v7869_v7  ;;  %v3518_v47 = vmul.f32 %v8348_v14, %v7867_v48 }
0x392c   :  { %v3527_v60 = vsel %vm1547_vm8, %v3519_v54, 0.0  ;;  %v3520_v18 = vsel %vm1547_vm8, %v3518_v47, 0.0 }
0x392d   :  { %v3528_v40 = vrot.slane %v3527_v60, 4  ;;  %v3521_v23 = vrot.slane %v3520_v18, 4 }
0x392f   :  { %v3529_v4 = vadd.f32 %v3528_v40, %v3527_v60  ;;  %v3522_v36 = vadd.f32 %v3521_v23, %v3520_v18 }
0x3931   :  { %v3530_v44 = vrot.slane %v3529_v4, 2  ;;  %v3523_v6 = vrot.slane %v3522_v36, 2 }
0x3933   :  { %v3531_v58 = vadd.f32 %v3530_v44, %v3529_v4  ;;  %v3524_v29 = vadd.f32 %v3523_v6, %v3522_v36 }
0x3935   :  { %v3532_v30 = vrot.slane %v3531_v58, 1  ;;  %v3525_v45 = vrot.slane %v3524_v29, 1 }
0x3937   :  { %v3526_v46 = vadd.f32 %v3525_v45, %v3524_v29  ;;  %v3533_v2 = vadd.f32 %v3532_v30, %v3531_v58 }
0x3939   :  { %v3536_v11 = vsel %vm354_vm4, %v3533_v2, %v3526_v46  ;;  %v8359_v62 = vsel %vm1532_vm15, %v8264_v43, %v3526_v46  ;;  %v8363_v20 = vsel %vm1532_vm15, %v8267_v52, %v3533_v2 }
0x393a   :  { %3537 = vrot.lane.b32.xlu0 %v3536_v11, %s7277_s2 }
0x39ac   :  { %v3538_v5 = vpop.permute.xlu0 %3537 }
0x39ad   :  { %6390 = vmatmul.mubr.msk.f32.vlgmr.msra.gmra.mrb[22].mxu1 %vm217_vm5, %v3538_v5 }
0x39ae   :  { %6706 = vmatpush3.bf16.msra.mxu1 %v7806_v15  ;;  %6411 = vmatprep.mubr.msk.f32.mxu1 %vm7273_vm0, %v7274_v1 }
0x39af   :  { %6707 = vmatprep.subr.bf16.mxu1 %v7272_v0 }
0x39b2   :  { %6709 = vmatpush3.bf16.msra.mxu1 %v7824_v24 }
0x39b3   :  { %6716 = vmatprep.subr.bf16.mxu1 %v7272_v0 }
0x3a80   :  { %v3607_v43 = vpop.f32.mrb[22].mxu1 }
0x3a81   :  { %v3678_v52 = vadd.f32 %v8320_v16, %v3607_v43  ;;  %v6391_v57 = vpop.f32.mrb[23].mxu1 }
0x3a83   :  { %v3681_v12 = vadd.f32 %v8377_v9, %v3678_v52 }
0x3a85   :  { %7049 = vtanh.f32 %v3681_v12  ;;  %v5913_v31 = vmul.f32 -1.442695, %v3681_v12 }
0x3a87   :  { %7051 = vpow2.f32 %v5913_v31 }
0x3a8f   :  { %v7050_v28 = vpop.eup %7049 }
0x3a90   :  { %3691 = vrot.lane.b32.xlu0 %v7050_v28, %s7276_s16 }
0x3a91   :  { %v7052_v50 = vpop.eup %7051 }
0x3a92   :  { %v3685_v21 = vadd.f32 1.0, %v7052_v50 }
0x3a94   :  { %7053 = vrcp.f32 %v3685_v21 }
0x3a9e   :  { %v7054_v61 = vpop.eup %7053 }
0x3a9f   :  { %v3689_v47 = vmul.f32 %v7054_v61, %v8282_v26 }
0x3b02   :  { %v3692_v54 = vpop.permute.xlu0 %3691 }
0x3b03   :  { %v3694_v16 = vmul.f32 %v7054_v61, %v3692_v54 }
0x3b05   :  { %3696 = vrot.lane.b32.xlu0 %v3694_v16, %s7277_s2 }
0x3b77   :  { %v3697_v60 = vpop.permute.xlu0 %3696 }
0x3b78   :  { %v8383_v18 = vadd.f32 %v3697_v60, %v3689_v47 }
0x3b7a   :  { %7055 = vtanh.f32 %v8383_v18 }
0x3b84   :  { %v7056_v40 = vpop.eup %7055 }
0x3b85   :  { %3702 = vrot.lane.b32.xlu1 %v7056_v40, %s7276_s16 }
0x3bf7   :  { %v3703_v23 = vpop.permute.xlu1 %3702 }
0x3bf8   :  { %v3705_v4 = vmul.f32 %v7054_v61, %v3703_v23 }
0x3bfa   :  { %v5202_v36 = vrot.slane %v3705_v4, %v7880_v56  ;;  %3707 = vrot.lane.b32.xlu0 %v3705_v4, %s7277_s2 }
0x3bfc   :  { %v5203_v44 = vcombine.high %v5202_v36, %v5202_v36  ;;  %v5210_v6 = vrot.slane %v5202_v36, %v7880_v56 }
0x3bfe   :  { %v5217_v58 = vrot.slane %v5203_v44, %v7880_v56  ;;  %v5317_v26 = vrot.slane %v5210_v6, %v7884_v3 }
0x3c00   :  { %v5321_v29 = vrot.slane %v5217_v58, %v7884_v3  ;;  %v8395_v30 = vsel %vm1535_vm2, %v8294_v8, %v5317_v26 }
0x3c02   :  { %v8399_v45 = vsel %vm1535_vm2, %v8298_v13, %v5321_v29 }
0x3c6c   :  { %v3708_v46 = vpop.permute.xlu0 %3707 }
0x3c6d   :  { %6412 = vmatmul.mubr.msk.f32.vlgmr.msra.gmra.mrb[24].mxu1 %vm217_vm5, %v3708_v46 }
0x3c6e   :  { %6718 = vmatpush3.bf16.msra.mxu1 %v7975_v34  ;;  %6433 = vmatprep.mubr.msk.f32.mxu1 %vm7273_vm0, %v7274_v1 }
0x3c6f   :  { %6719 = vmatprep.subr.bf16.mxu1 %v7272_v0 }
0x3c72   :  { %6721 = vmatpush3.bf16.msra.mxu1 %v7982_v51 }
0x3c73   :  { %6728 = vmatprep.subr.bf16.mxu1 %v7272_v0 }
0x3c75   :  { %6434 = vmatmul.mubr.msk.f32.vlgmr.msra.gmra.mrb[26].mxu1 %vm217_vm5, %v3708_v46 }
0x3c76   :  { %6730 = vmatpush3.bf16.msra.mxu1 %v7955_v10  ;;  %6455 = vmatprep.mubr.msk.f32.mxu1 %vm7273_vm0, %v7274_v1 }
0x3c77   :  { %6731 = vmatprep.subr.bf16.mxu1 %v7272_v0 }
0x3c7a   :  { %6733 = vmatpush3.bf16.msra.mxu1 %v7978_v38 }
0x3c7b   :  { %6740 = vmatprep.subr.bf16.mxu1 %v7272_v0 }
0x3d40   :  { %v3777_v8 = vpop.f32.mrb[24].mxu1 }
0x3d41   :  { %v3788_v13 = vrot.slane %v3777_v8, %v7880_v56  ;;  %v6413_v2 = vpop.f32.mrb[25].mxu1 }
0x3d43   :  { %v3789_v11 = vcombine.high %v3788_v13, %v3788_v13  ;;  %v3796_v5 = vrot.slane %v3788_v13, %v7880_v56 }
0x3d45   :  { %v3803_v43 = vrot.slane %v3789_v11, %v7880_v56  ;;  %v3807_v52 = vrot.slane %v3796_v5, %v7884_v3 }
0x3d47   :  { %v3811_v57 = vrot.slane %v3803_v43, %v7884_v3  ;;  %v3814_v12 = vadd.f32 %v3807_v52, %v7891_v25 }
0x3d48   :  { %v8421_v28 = vpop.f32.mrb[26].mxu1 }
0x3d49   :  { %v3815_v31 = vadd.f32 %v3811_v57, %v7888_v19  ;;  %7057 = vtanh.f32 %v3814_v12  ;;  %v6435_v50 = vpop.f32.mrb[27].mxu1 }
0x3d4b   :  { %7059 = vtanh.f32 %v3815_v31 }
0x3d53   :  { %v7058_v21 = vpop.eup %7057 }
0x3d54   :  { %v3818_v61 = vmul.f32 %v8326_v39, %v7058_v21 }
0x3d55   :  { %v7060_v54 = vpop.eup %7059 }
0x3d56   :  { %v3820_v16 = vsel %vm217_vm5, %v3818_v61, 0.0  ;;  %v3819_v47 = vmul.f32 %v8326_v39, %v7060_v54 }
0x3d57   :  { %3821 = vadd.xlane.f32.xlu1 %v3820_v16 }
0x3d58   :  { %v3823_v60 = vsel %vm217_vm5, %v3819_v47, 0.0 }
0x3d59   :  { %3824 = vadd.xlane.f32.xlu0 %v3823_v60 }
0x3de4   :  { %v3822_v40 = vpop.xlane.xlu1 %3821 }
0x3de5   :  { %v3826_v23 = vmul.f32 %v3822_v40, %v7916_v17 }
0x3de6   :  { %v3825_v4 = vpop.xlane.xlu0 %3824 }
0x3de7   :  { %v3827_v36 = vmul.f32 %v3825_v4, %v7918_v35  ;;  %3831 = vperm.xlu0 %6836, %v3826_v23  }
0x3de9   :  { %3834 = vperm.xlu1 %6835, %v3827_v36  }
0x3e66   :  { %v3832_v44 = vpop.permute.xlu0 %3831 }
0x3e67   :  { %v3839_v58 = vrot.slane %v3832_v44, %v7923_v49 }
0x3e68   :  { %v3835_v6 = vpop.permute.xlu1 %3834 }
0x3e69   :  { %v3843_v26 = vrot.slane %v3835_v6, %v7923_v49 }
0x3e6b   :  { %v3844_v29 = vsel %vm354_vm4, %v3843_v26, %v3839_v58 }
0x3e6c   :  { %v3846_v46 = vsel %vm1874_vm9, %v3844_v29, -inf }
0x3e6d   :  { %3847 = vmax.xlane.f32.xlu1 %v3846_v46 }
0x3efa   :  { %v3848_v8 = vpop.xlane.xlu1 %3847 }
0x3efb   :  { %v3853_v13 = vrot.slane %v3848_v8, %v7884_v3  ;;  %v3857_v2 = vrot.slane %v3848_v8, %v7904_v63 }
0x3efd   :  { %v3860_v11 = vsub.f32 %v3826_v23, %v3853_v13  ;;  %v3861_v5 = vsub.f32 %v3827_v36, %v3857_v2 }
0x3eff   :  { %v3862_v43 = vmul.f32 1.442695, %v3860_v11  ;;  %v3864_v52 = vmul.f32 1.442695, %v3861_v5 }
0x3f01   :  { %7061 = vpow2.f32 %v3862_v43 }
0x3f02   :  { %7063 = vpow2.f32 %v3864_v52 }
0x3f0b   :  { %v7062_v57 = vpop.eup %7061 }
0x3f0c   :  { %3869 = vperm.xlu0 %6836, %v7062_v57   ;;  %v7064_v12 = vpop.eup %7063 }
0x3f10   :  { %3872 = vperm.xlu0 %6836, %v7064_v12  }
0x3f8b   :  { %v3870_v31 = vpop.permute.xlu0 %3869 }
0x3f8c   :  { %v3877_v21 = vrot.slane %v3870_v31, %v7923_v49 }
0x3f8f   :  { %v3873_v50 = vpop.permute.xlu0 %3872 }
0x3f90   :  { %v3881_v61 = vrot.slane %v3873_v50, %v7923_v49 }
0x3f92   :  { %v3882_v54 = vsel %vm354_vm4, %v3881_v61, %v3877_v21 }
0x3f93   :  { %v3884_v16 = vsel %vm1874_vm9, %v3882_v54, 0.0 }
0x3f94   :  { %3885 = vadd.xlane.f32.xlu0 %v3884_v16 }
0x4021   :  { %v3886_v47 = vpop.xlane.xlu0 %3885 }
0x4022   :  { %7065 = vrcp.f32 %v3886_v47 }
0x402c   :  { %v7066_v60 = vpop.eup %7065 }
0x402d   :  { %v3896_v40 = vrot.slane %v7066_v60, %v7904_v63  ;;  %v3892_v23 = vrot.slane %v7066_v60, %v7884_v3 }
0x402f   :  { %v3900_v4 = vmul.f32 %v7064_v12, %v3896_v40  ;;  %v3899_v36 = vmul.f32 %v7062_v57, %v3892_v23 }
0x4031   :  { %3908 = vperm.xlu0 %6836, %v3900_v4   ;;  %3903 = vperm.xlu1 %6835, %v3899_v36  }
0x40b0   :  { %v8442_v44 = vpop.permute.xlu0 %3908  ;;  %v8444_v6 = vpop.permute.xlu1 %3903 }
0x40b1   :  { %v3912_v58 = vmul.f32 %v8442_v44, %v7869_v7  ;;  %v3911_v26 = vmul.f32 %v8444_v6, %v7867_v48 }
0x40b3   :  { %v3920_v29 = vsel %vm1547_vm8, %v3912_v58, 0.0  ;;  %v3913_v46 = vsel %vm1547_vm8, %v3911_v26, 0.0 }
0x40b4   :  { %v3921_v8 = vrot.slane %v3920_v29, 4  ;;  %v3914_v13 = vrot.slane %v3913_v46, 4 }
0x40b6   :  { %v3922_v2 = vadd.f32 %v3921_v8, %v3920_v29  ;;  %v3915_v11 = vadd.f32 %v3914_v13, %v3913_v46 }
0x40b8   :  { %v3923_v5 = vrot.slane %v3922_v2, 2  ;;  %v3916_v43 = vrot.slane %v3915_v11, 2 }
0x40ba   :  { %v3924_v52 = vadd.f32 %v3923_v5, %v3922_v2  ;;  %v3917_v57 = vadd.f32 %v3916_v43, %v3915_v11 }
0x40bc   :  { %v3925_v12 = vrot.slane %v3924_v52, 1  ;;  %v3918_v31 = vrot.slane %v3917_v57, 1 }
0x40be   :  { %v3919_v50 = vadd.f32 %v3918_v31, %v3917_v57  ;;  %v3926_v21 = vadd.f32 %v3925_v12, %v3924_v52 }
0x40c0   :  { %v3929_v61 = vsel %vm354_vm4, %v3926_v21, %v3919_v50  ;;  %v8455_v54 = vsel %vm1535_vm2, %v8359_v62, %v3919_v50  ;;  %v8459_v16 = vsel %vm1535_vm2, %v8363_v20, %v3926_v21 }
0x40c1   :  { %3930 = vrot.lane.b32.xlu1 %v3929_v61, %s7277_s2 }
0x4133   :  { %v3931_v47 = vpop.permute.xlu1 %3930 }
0x4134   :  { %6423 = vmatmul.mubr.msk.f32.vlgmr.msra.gmra.mrb[26].mxu0 %vm217_vm5, %v3931_v47 }
0x4135   :  { %6724 = vmatpush3.bf16.msra.mxu0 %v7806_v15  ;;  %6444 = vmatprep.mubr.msk.f32.mxu0 %vm7273_vm0, %v7274_v1 }
0x4136   :  { %6725 = vmatprep.subr.bf16.mxu0 %v7272_v0 }
0x4139   :  { %6727 = vmatpush3.bf16.msra.mxu0 %v7824_v24 }
0x413a   :  { %6734 = vmatprep.subr.bf16.mxu0 %v7272_v0 }
0x4207   :  { %v4000_v62 = vpop.f32.mrb[26].mxu0 }
0x4208   :  { %v4071_v20 = vadd.f32 %v8421_v28, %v4000_v62  ;;  %v6424_v60 = vpop.f32.mrb[27].mxu0 }
0x420a   :  { %v4074_v40 = vadd.f32 %v8377_v9, %v4071_v20 }
0x420c   :  { %7067 = vtanh.f32 %v4074_v40  ;;  %v5917_v4 = vmul.f32 -1.442695, %v4074_v40 }
0x420e   :  { %7069 = vpow2.f32 %v5917_v4 }
0x4216   :  { %v7068_v23 = vpop.eup %7067 }
0x4217   :  { %4084 = vrot.lane.b32.xlu1 %v7068_v23, %s7276_s16 }
0x4218   :  { %v7070_v36 = vpop.eup %7069 }
0x4219   :  { %v4078_v58 = vadd.f32 1.0, %v7070_v36 }
0x421b   :  { %7071 = vrcp.f32 %v4078_v58 }
0x4225   :  { %v7072_v26 = vpop.eup %7071 }
0x4226   :  { %v4082_v8 = vmul.f32 %v7072_v26, %v8383_v18 }
0x4289   :  { %v4085_v29 = vpop.permute.xlu1 %4084 }
0x428a   :  { %v4087_v46 = vmul.f32 %v7072_v26, %v4085_v29 }
0x428c   :  { %4089 = vrot.lane.b32.xlu1 %v4087_v46, %s7277_s2 }
0x42fe   :  { %v4090_v28 = vpop.permute.xlu1 %4089 }
0x42ff   :  { %v8474_v13 = vadd.f32 %v4090_v28, %v4082_v8 }
0x4301   :  { %7073 = vtanh.f32 %v8474_v13 }
0x430b   :  { %v7074_v2 = vpop.eup %7073 }
0x430c   :  { %4095 = vrot.lane.b32.xlu0 %v7074_v2, %s7276_s16 }
0x437e   :  { %v4096_v11 = vpop.permute.xlu0 %4095 }
0x437f   :  { %v4098_v5 = vmul.f32 %v7072_v26, %v4096_v11 }
0x4381   :  { %v5224_v43 = vrot.slane %v4098_v5, %v7880_v56  ;;  %4100 = vrot.lane.b32.xlu1 %v4098_v5, %s7277_s2 }
0x4383   :  { %v5225_v52 = vcombine.high %v5224_v43, %v5224_v43  ;;  %v5232_v57 = vrot.slane %v5224_v43, %v7880_v56 }
0x4385   :  { %v5239_v12 = vrot.slane %v5225_v52, %v7880_v56  ;;  %v5327_v18 = vrot.slane %v5232_v57, %v7884_v3 }
0x4387   :  { %v5331_v31 = vrot.slane %v5239_v12, %v7884_v3  ;;  %v8486_v50 = vsel %vm1538_vm3, %v8395_v30, %v5327_v18 }
0x4389   :  { %v8490_v21 = vsel %vm1538_vm3, %v8399_v45, %v5331_v31 }
0x43f3   :  { %v4101_v61 = vpop.permute.xlu1 %4100 }
0x43f4   :  { %6445 = vmatmul.mubr.msk.f32.vlgmr.msra.gmra.mrb[28].mxu0 %vm217_vm5, %v4101_v61 }
0x43f5   :  { %6736 = vmatpush3.bf16.msra.mxu0 %v7975_v34  ;;  %6466 = vmatprep.mubr.msk.f32.mxu0 %vm7273_vm0, %v7274_v1 }
0x43f6   :  { %6737 = vmatprep.subr.bf16.mxu0 %v7272_v0 }
0x43f9   :  { %6739 = vmatpush3.bf16.msra.mxu0 %v7982_v51 }
0x43fa   :  { %6746 = vmatprep.subr.bf16.mxu0 %v7272_v0 }
0x43fc   :  { %6467 = vmatmul.mubr.msk.f32.vlgmr.msra.gmra.mrb[30].mxu0 %vm217_vm5, %v4101_v61 }
0x43fd   :  { %6748 = vmatpush3.bf16.msra.mxu0 %v7955_v10  ;;  %6488 = vmatprep.mubr.msk.f32.mxu0 %vm7273_vm0, %v7274_v1 }
0x43fe   :  { %6749 = vmatprep.subr.bf16.mxu0 %v7272_v0 }
0x4401   :  { %6751 = vmatpush3.bf16.msra.mxu0 %v7978_v38 }
0x4402   :  { %6758 = vmatprep.subr.bf16.mxu0 %v7272_v0 }
0x44c7   :  { %v4170_v30 = vpop.f32.mrb[28].mxu0 }
0x44c8   :  { %v4181_v45 = vrot.slane %v4170_v30, %v7880_v56  ;;  %v6446_v47 = vpop.f32.mrb[29].mxu0 }
0x44ca   :  { %v4182_v62 = vcombine.high %v4181_v45, %v4181_v45  ;;  %v4189_v20 = vrot.slane %v4181_v45, %v7880_v56 }
0x44cc   :  { %v4196_v60 = vrot.slane %v4182_v62, %v7880_v56  ;;  %v4200_v10 = vrot.slane %v4189_v20, %v7884_v3 }
0x44ce   :  { %v4204_v40 = vrot.slane %v4196_v60, %v7884_v3  ;;  %v4207_v23 = vadd.f32 %v4200_v10, %v7891_v25 }
0x44cf   :  { %v8512_v4 = vpop.f32.mrb[30].mxu0 }
0x44d0   :  { %v4208_v38 = vadd.f32 %v4204_v40, %v7888_v19  ;;  %7075 = vtanh.f32 %v4207_v23  ;;  %v6468_v36 = vpop.f32.mrb[31].mxu0 }
0x44d2   :  { %7077 = vtanh.f32 %v4208_v38 }
0x44da   :  { %v7076_v58 = vpop.eup %7075 }
0x44db   :  { %v4211_v26 = vmul.f32 %v8326_v39, %v7076_v58 }
0x44dc   :  { %v7078_v29 = vpop.eup %7077 }
0x44dd   :  { %v4213_v46 = vsel %vm217_vm5, %v4211_v26, 0.0  ;;  %v4212_v8 = vmul.f32 %v8326_v39, %v7078_v29 }
0x44de   :  { %4214 = vadd.xlane.f32.xlu0 %v4213_v46 }
0x44df   :  { %v4216_v28 = vsel %vm217_vm5, %v4212_v8, 0.0 }
0x44e0   :  { %4217 = vadd.xlane.f32.xlu1 %v4216_v28 }
0x456b   :  { %v4215_v2 = vpop.xlane.xlu0 %4214 }
0x456c   :  { %v4219_v11 = vmul.f32 %v4215_v2, %v7916_v17 }
0x456d   :  { %v4218_v5 = vpop.xlane.xlu1 %4217 }
0x456e   :  { %v4220_v43 = vmul.f32 %v4218_v5, %v7918_v35  ;;  %4224 = vperm.xlu0 %6836, %v4219_v11  }
0x4570   :  { %4227 = vperm.xlu1 %6835, %v4220_v43  }
0x45ed   :  { %v4225_v52 = vpop.permute.xlu0 %4224 }
0x45ee   :  { %v4232_v12 = vrot.slane %v4225_v52, %v7923_v49 }
0x45ef   :  { %v4228_v57 = vpop.permute.xlu1 %4227 }
0x45f0   :  { %v4236_v18 = vrot.slane %v4228_v57, %v7923_v49 }
0x45f2   :  { %v4237_v31 = vsel %vm354_vm4, %v4236_v18, %v4232_v12 }
0x45f3   :  { %v4239_v61 = vsel %vm1874_vm9, %v4237_v31, -inf }
0x45f4   :  { %4240 = vmax.xlane.f32.xlu0 %v4239_v61 }
0x4681   :  { %v4241_v30 = vpop.xlane.xlu0 %4240 }
0x4682   :  { %v4246_v45 = vrot.slane %v4241_v30, %v7884_v3  ;;  %v4250_v47 = vrot.slane %v4241_v30, %v7904_v63 }
0x4684   :  { %v4253_v62 = vsub.f32 %v4219_v11, %v4246_v45  ;;  %v4254_v20 = vsub.f32 %v4220_v43, %v4250_v47 }
0x4686   :  { %v4255_v60 = vmul.f32 1.442695, %v4253_v62  ;;  %v4257_v10 = vmul.f32 1.442695, %v4254_v20 }
0x4688   :  { %7079 = vpow2.f32 %v4255_v60 }
0x4689   :  { %7081 = vpow2.f32 %v4257_v10 }
0x4692   :  { %v7080_v40 = vpop.eup %7079 }
0x4693   :  { %4262 = vperm.xlu1 %6835, %v7080_v40   ;;  %v7082_v23 = vpop.eup %7081 }
0x4697   :  { %4265 = vperm.xlu1 %6835, %v7082_v23  }
0x4712   :  { %v4263_v38 = vpop.permute.xlu1 %4262 }
0x4713   :  { %v4270_v58 = vrot.slane %v4263_v38, %v7923_v49 }
0x4716   :  { %v4266_v36 = vpop.permute.xlu1 %4265 }
0x4717   :  { %v4274_v26 = vrot.slane %v4266_v36, %v7923_v49 }
0x4719   :  { %v4275_v29 = vsel %vm354_vm4, %v4274_v26, %v4270_v58 }
0x471a   :  { %v4277_v46 = vsel %vm1874_vm9, %v4275_v29, 0.0 }
0x471b   :  { %4278 = vadd.xlane.f32.xlu1 %v4277_v46 }
0x47a8   :  { %v4279_v8 = vpop.xlane.xlu1 %4278 }
0x47a9   :  { %7083 = vrcp.f32 %v4279_v8 }
0x47b3   :  { %v7084_v28 = vpop.eup %7083 }
0x47b4   :  { %v4289_v2 = vrot.slane %v7084_v28, %v7904_v63  ;;  %v4285_v11 = vrot.slane %v7084_v28, %v7884_v3 }
0x47b6   :  { %v4293_v5 = vmul.f32 %v7082_v23, %v4289_v2  ;;  %v4292_v43 = vmul.f32 %v7080_v40, %v4285_v11 }
0x47b8   :  { %4301 = vperm.xlu1 %6835, %v4293_v5   ;;  %4296 = vperm.xlu0 %6836, %v4292_v43  }
0x4837   :  { %v8533_v52 = vpop.permute.xlu1 %4301  ;;  %v8535_v57 = vpop.permute.xlu0 %4296 }
0x4838   :  { %v4305_v12 = vmul.f32 %v8533_v52, %v7869_v7  ;;  %v4304_v18 = vmul.f32 %v8535_v57, %v7867_v48 }
0x483a   :  { %v4313_v31 = vsel %vm1547_vm8, %v4305_v12, 0.0  ;;  %v4306_v61 = vsel %vm1547_vm8, %v4304_v18, 0.0 }
0x483b   :  { %v4314_v30 = vrot.slane %v4313_v31, 4  ;;  %v4307_v45 = vrot.slane %v4306_v61, 4 }
0x483d   :  { %v4315_v47 = vadd.f32 %v4314_v30, %v4313_v31  ;;  %v4308_v62 = vadd.f32 %v4307_v45, %v4306_v61 }
0x483f   :  { %v4316_v20 = vrot.slane %v4315_v47, 2  ;;  %v4309_v60 = vrot.slane %v4308_v62, 2 }
0x4841   :  { %v4317_v10 = vadd.f32 %v4316_v20, %v4315_v47  ;;  %v4310_v40 = vadd.f32 %v4309_v60, %v4308_v62 }
0x4843   :  { %v4318_v23 = vrot.slane %v4317_v10, 1  ;;  %v4311_v38 = vrot.slane %v4310_v40, 1 }
0x4845   :  { %v4312_v36 = vadd.f32 %v4311_v38, %v4310_v40  ;;  %v4319_v58 = vadd.f32 %v4318_v23, %v4317_v10 }
0x4847   :  { %v4322_v26 = vsel %vm354_vm4, %v4319_v58, %v4312_v36  ;;  %v8546_v29 = vsel %vm1538_vm3, %v8455_v54, %v4312_v36  ;;  %v8550_v46 = vsel %vm1538_vm3, %v8459_v16, %v4319_v58 }
0x4848   :  { %4323 = vrot.lane.b32.xlu0 %v4322_v26, %s7277_s2 }
0x48ba   :  { %v4324_v8 = vpop.permute.xlu0 %4323 }
0x48bb   :  { %6456 = vmatmul.mubr.msk.f32.vlgmr.msra.gmra.mrb[28].mxu1 %vm217_vm5, %v4324_v8 }
0x48bc   :  { %6742 = vmatpush3.bf16.msra.mxu1 %v7806_v15  ;;  %6477 = vmatprep.mubr.msk.f32.mxu1 %vm7273_vm0, %v7274_v1 }
0x48bd   :  { %6743 = vmatprep.subr.bf16.mxu1 %v7272_v0 }
0x48c0   :  { %6745 = vmatpush3.bf16.msra.mxu1 %v7824_v24 }
0x48c1   :  { %6752 = vmatprep.subr.bf16.mxu1 %v7272_v0 }
0x498e   :  { %v4393_v54 = vpop.f32.mrb[28].mxu1 }
0x498f   :  { %v4464_v16 = vadd.f32 %v8512_v4, %v4393_v54  ;;  %v6457_v28 = vpop.f32.mrb[29].mxu1 }
0x4991   :  { %v4467_v2 = vadd.f32 %v8377_v9, %v4464_v16 }
0x4993   :  { %7085 = vtanh.f32 %v4467_v2  ;;  %v5921_v5 = vmul.f32 -1.442695, %v4467_v2 }
0x4995   :  { %7087 = vpow2.f32 %v5921_v5 }
0x499d   :  { %v7086_v11 = vpop.eup %7085 }
0x499e   :  { %4477 = vrot.lane.b32.xlu0 %v7086_v11, %s7276_s16 }
0x499f   :  { %v7088_v43 = vpop.eup %7087 }
0x49a0   :  { %v4471_v12 = vadd.f32 1.0, %v7088_v43 }
0x49a2   :  { %7089 = vrcp.f32 %v4471_v12 }
0x49ac   :  { %v7090_v18 = vpop.eup %7089 }
0x49ad   :  { %v4475_v30 = vmul.f32 %v7090_v18, %v8474_v13 }
0x4a10   :  { %v4478_v31 = vpop.permute.xlu0 %4477 }
0x4a11   :  { %v4480_v61 = vmul.f32 %v7090_v18, %v4478_v31 }
0x4a13   :  { %4482 = vrot.lane.b32.xlu0 %v4480_v61, %s7277_s2 }
0x4a85   :  { %v4483_v4 = vpop.permute.xlu0 %4482 }
0x4a86   :  { %v8565_v45 = vadd.f32 %v4483_v4, %v4475_v30 }
0x4a88   :  { %7091 = vtanh.f32 %v8565_v45 }
0x4a92   :  { %v7092_v47 = vpop.eup %7091 }
0x4a93   :  { %4488 = vrot.lane.b32.xlu1 %v7092_v47, %s7276_s16 }
0x4b05   :  { %v4489_v62 = vpop.permute.xlu1 %4488 }
0x4b06   :  { %v4491_v20 = vmul.f32 %v7090_v18, %v4489_v62 }
0x4b08   :  { %v5246_v60 = vrot.slane %v4491_v20, %v7880_v56  ;;  %4493 = vrot.lane.b32.xlu0 %v4491_v20, %s7277_s2 }
0x4b0a   :  { %v5247_v10 = vcombine.high %v5246_v60, %v5246_v60  ;;  %v5254_v40 = vrot.slane %v5246_v60, %v7880_v56 }
0x4b0c   :  { %v5261_v23 = vrot.slane %v5247_v10, %v7880_v56  ;;  %v5337_v13 = vrot.slane %v5254_v40, %v7884_v3 }
0x4b0e   :  { %v5341_v38 = vrot.slane %v5261_v23, %v7884_v3  ;;  %v8577_v36 = vsel %vm1541_vm6, %v8486_v50, %v5337_v13 }
0x4b10   :  { %v8581_v58 = vsel %vm1541_vm6, %v8490_v21, %v5341_v38 }
0x4b7a   :  { %v4494_v26 = vpop.permute.xlu0 %4493 }
0x4b7b   :  { %6478 = vmatmul.mubr.msk.f32.vlgmr.msra.gmra.mrb[30].mxu1 %vm217_vm5, %v4494_v26 }
0x4b7c   :  { %6754 = vmatpush3.bf16.msra.mxu1 %v7975_v34  ;;  %6499 = vmatprep.mubr.msk.f32.mxu1 %vm7273_vm0, %v7274_v1 }
0x4b7d   :  { %6755 = vmatprep.subr.bf16.mxu1 %v7272_v0 }
0x4b80   :  { %6757 = vmatpush3.bf16.msra.mxu1 %v7982_v51 }
0x4b83   :  { %6500 = vmatmul.mubr.msk.f32.vlgmr.msra.gmra.mrb[32].mxu1 %vm217_vm5, %v4494_v26 }
0x4c4e   :  { %v4563_v50 = vpop.f32.mrb[30].mxu1 }
0x4c4f   :  { %v4574_v8 = vrot.slane %v4563_v50, %v7880_v56  ;;  %v6479_v54 = vpop.f32.mrb[31].mxu1 }
0x4c51   :  { %v4575_v21 = vcombine.high %v4574_v8, %v4574_v8  ;;  %v4582_v16 = vrot.slane %v4574_v8, %v7880_v56 }
0x4c53   :  { %v4589_v28 = vrot.slane %v4575_v21, %v7880_v56  ;;  %v4593_v34 = vrot.slane %v4582_v16, %v7884_v3 }
0x4c55   :  { %v4597_v2 = vrot.slane %v4589_v28, %v7884_v3  ;;  %v4600_v11 = vadd.f32 %v4593_v34, %v7891_v25 }
0x4c56   :  { %v8596_v5 = vpop.f32.mrb[32].mxu1 }
0x4c57   :  { %v4601_v51 = vadd.f32 %v4597_v2, %v7888_v19  ;;  %7093 = vtanh.f32 %v4600_v11  ;;  %v6501_v43 = vpop.f32.mrb[33].mxu1 }
0x4c59   :  { %7095 = vtanh.f32 %v4601_v51 }
0x4c61   :  { %v7094_v12 = vpop.eup %7093 }
0x4c62   :  { %v4604_v18 = vmul.f32 %v8326_v39, %v7094_v12 }
0x4c63   :  { %v7096_v31 = vpop.eup %7095 }
0x4c64   :  { %v4606_v61 = vsel %vm217_vm5, %v4604_v18, 0.0  ;;  %v4605_v30 = vmul.f32 %v8326_v39, %v7096_v31 }
0x4c65   :  { %4607 = vadd.xlane.f32.xlu1 %v4606_v61 }
0x4c66   :  { %v4609_v4 = vsel %vm217_vm5, %v4605_v30, 0.0 }
0x4c67   :  { %4610 = vadd.xlane.f32.xlu0 %v4609_v4 }
0x4cf2   :  { %v4608_v47 = vpop.xlane.xlu1 %4607 }
0x4cf3   :  { %v4612_v62 = vmul.f32 %v4608_v47, %v7916_v17 }
0x4cf4   :  { %v4611_v20 = vpop.xlane.xlu0 %4610 }
0x4cf5   :  { %v4613_v60 = vmul.f32 %v4611_v20, %v7918_v35  ;;  %4617 = vperm.xlu0 %6836, %v4612_v62  }
0x4cf7   :  { %4620 = vperm.xlu1 %6835, %v4613_v60  }
0x4d74   :  { %v4618_v10 = vpop.permute.xlu0 %4617 }
0x4d75   :  { %v4625_v23 = vrot.slane %v4618_v10, %v7923_v49 }
0x4d76   :  { %v4621_v40 = vpop.permute.xlu1 %4620 }
0x4d77   :  { %v4629_v13 = vrot.slane %v4621_v40, %v7923_v49 }
0x4d79   :  { %v4630_v39 = vsel %vm354_vm4, %v4629_v13, %v4625_v23 }
0x4d7a   :  { %v4632_v38 = vsel %vm1874_vm9, %v4630_v39, -inf }
0x4d7b   :  { %4633 = vmax.xlane.f32.xlu1 %v4632_v38 }
0x4e08   :  { %v4634_v26 = vpop.xlane.xlu1 %4633 }
0x4e09   :  { %v4639_v50 = vrot.slane %v4634_v26, %v7884_v3  ;;  %v4643_v8 = vrot.slane %v4634_v26, %v7904_v63 }
0x4e0b   :  { %v4646_v54 = vsub.f32 %v4612_v62, %v4639_v50  ;;  %v4647_v21 = vsub.f32 %v4613_v60, %v4643_v8 }
0x4e0d   :  { %v4648_v16 = vmul.f32 1.442695, %v4646_v54  ;;  %v4650_v28 = vmul.f32 1.442695, %v4647_v21 }
0x4e0f   :  { %7097 = vpow2.f32 %v4648_v16 }
0x4e10   :  { %7099 = vpow2.f32 %v4650_v28 }
0x4e19   :  { %v7098_v34 = vpop.eup %7097 }
0x4e1a   :  { %4655 = vperm.xlu0 %6836, %v7098_v34   ;;  %v7100_v2 = vpop.eup %7099 }
0x4e1e   :  { %4658 = vperm.xlu0 %6836, %v7100_v2  }
0x4e99   :  { %v4656_v11 = vpop.permute.xlu0 %4655 }
0x4e9a   :  { %v4663_v43 = vrot.slane %v4656_v11, %v7923_v49 }
0x4e9d   :  { %v4659_v51 = vpop.permute.xlu0 %4658 }
0x4e9e   :  { %v4667_v12 = vrot.slane %v4659_v51, %v7923_v49 }
0x4ea0   :  { %v4668_v18 = vsel %vm354_vm4, %v4667_v12, %v4663_v43 }
0x4ea1   :  { %v4670_v31 = vsel %vm1874_vm9, %v4668_v18, 0.0 }
0x4ea2   :  { %4671 = vadd.xlane.f32.xlu0 %v4670_v31 }
0x4f2f   :  { %v4672_v61 = vpop.xlane.xlu0 %4671 }
0x4f30   :  { %7101 = vrcp.f32 %v4672_v61 }
0x4f3a   :  { %v7102_v30 = vpop.eup %7101 }
0x4f3b   :  { %v4682_v4 = vrot.slane %v7102_v30, %v7904_v63  ;;  %v4678_v47 = vrot.slane %v7102_v30, %v7884_v3 }
0x4f3d   :  { %v4686_v62 = vmul.f32 %v7100_v2, %v4682_v4  ;;  %v4685_v20 = vmul.f32 %v7098_v34, %v4678_v47 }
0x4f3f   :  { %4694 = vperm.xlu0 %6836, %v4686_v62   ;;  %4689 = vperm.xlu1 %6835, %v4685_v20  }
0x4fbe   :  { %v8617_v60 = vpop.permute.xlu0 %4694  ;;  %v8619_v10 = vpop.permute.xlu1 %4689 }
0x4fbf   :  { %v4698_v40 = vmul.f32 %v8617_v60, %v7869_v7  ;;  %v4697_v23 = vmul.f32 %v8619_v10, %v7867_v48 }
0x4fc1   :  { %v4706_v13 = vsel %vm1547_vm8, %v4698_v40, 0.0  ;;  %v4699_v39 = vsel %vm1547_vm8, %v4697_v23, 0.0 }
0x4fc2   :  { %v4707_v38 = vrot.slane %v4706_v13, 4  ;;  %v4700_v26 = vrot.slane %v4699_v39, 4 }
0x4fc4   :  { %v4708_v50 = vadd.f32 %v4707_v38, %v4706_v13  ;;  %v4701_v8 = vadd.f32 %v4700_v26, %v4699_v39 }
0x4fc6   :  { %v4709_v54 = vrot.slane %v4708_v50, 2  ;;  %v4702_v21 = vrot.slane %v4701_v8, 2 }
0x4fc8   :  { %v4710_v16 = vadd.f32 %v4709_v54, %v4708_v50  ;;  %v4703_v28 = vadd.f32 %v4702_v21, %v4701_v8 }
0x4fca   :  { %v4711_v34 = vrot.slane %v4710_v16, 1  ;;  %v4704_v2 = vrot.slane %v4703_v28, 1 }
0x4fcc   :  { %v4705_v11 = vadd.f32 %v4704_v2, %v4703_v28  ;;  %v4712_v51 = vadd.f32 %v4711_v34, %v4710_v16 }
0x4fce   :  { %v4715_v43 = vsel %vm354_vm4, %v4712_v51, %v4705_v11  ;;  %v8630_v12 = vsel %vm1541_vm6, %v8546_v29, %v4705_v11  ;;  %v8634_v18 = vsel %vm1541_vm6, %v8550_v46, %v4712_v51 }
0x4fcf   :  { %4716 = vrot.lane.b32.xlu1 %v4715_v43, %s7277_s2 }
0x5041   :  { %v4717_v31 = vpop.permute.xlu1 %4716 }
0x5042   :  { %6489 = vmatmul.mubr.msk.f32.vlgmr.msra.gmra.mrb[32].mxu0 %vm217_vm5, %v4717_v31 }
0x5043   :  { %6760 = vmatpush3.bf16.msra.mxu0 %v7806_v15  ;;  %6510 = vmatprep.mubr.msk.f32.mxu0 %vm7273_vm0, %v7274_v1  ;;  %vm5824_vm0 = vcmask 64512  }
0x5044   :  { %6761 = vmatprep.subr.bf16.mxu0 %v7272_v0 }
0x5047   :  { %6763 = vmatpush3.bf16.msra.mxu0 %v7824_v24 }
0x5115   :  { %v4786_v29 = vpop.f32.mrb[32].mxu0 }
0x5116   :  { %v4857_v61 = vadd.f32 %v8596_v5, %v4786_v29  ;;  %v6490_v30 = vpop.f32.mrb[33].mxu0 }
0x5117   :  { %v7123_v30 = vld [vmem:[%s8873_s9] ss:$0 sm:$0xff] }
0x5118   :  { %v4860_v46 = vadd.f32 %v8377_v9, %v4857_v61 }
0x511a   :  { %7103 = vtanh.f32 %v4860_v46  ;;  %v5925_v47 = vmul.f32 -1.442695, %v4860_v46 }
0x511c   :  { %7105 = vpow2.f32 %v5925_v47 }
0x5124   :  { %v7104_v4 = vpop.eup %7103 }
0x5125   :  { %4870 = vrot.lane.b32.xlu1 %v7104_v4, %s7276_s16 }
0x5126   :  { %v7106_v15 = vpop.eup %7105 }
0x5127   :  { %v4864_v62 = vadd.f32 1.0, %v7106_v15 }
0x5129   :  { %7107 = vrcp.f32 %v4864_v62 }
0x5133   :  { %v7108_v1 = vpop.eup %7107 }
0x5134   :  { %v4868_v24 = vmul.f32 %v7108_v1, %v8565_v45 }
0x5197   :  { %v4871_v20 = vpop.permute.xlu1 %4870 }
0x5198   :  { %v4873_v0 = vmul.f32 %v7108_v1, %v4871_v20 }
0x519a   :  { %4875 = vrot.lane.b32.xlu1 %v4873_v0, %s7277_s2 }
0x520c   :  { %v4876_v5 = vpop.permute.xlu1 %4875 }
0x520d   :  { %v4878_v40 = vadd.f32 %v4876_v5, %v4868_v24 }
0x520f   :  { %7109 = vtanh.f32 %v4878_v40 }
0x5219   :  { %v7110_v9 = vpop.eup %7109 }
0x521a   :  { %4881 = vrot.lane.b32.xlu0 %v7110_v9, %s7276_s16 }
0x528c   :  { %v4882_v23 = vpop.permute.xlu0 %4881 }
0x528d   :  { %v4884_v13 = vmul.f32 %v7108_v1, %v4882_v23 }
0x528f   :  { %v5268_v39 = vrot.slane %v4884_v13, %v7880_v56  ;;  %4886 = vrot.lane.b32.xlu1 %v4884_v13, %s7277_s2 }
0x5291   :  { %v5269_v38 = vcombine.high %v5268_v39, %v5268_v39  ;;  %v5276_v26 = vrot.slane %v5268_v39, %v7880_v56 }
0x5293   :  { %v5283_v50 = vrot.slane %v5269_v38, %v7880_v56  ;;  %v5347_v8 = vrot.slane %v5276_v26, %v7884_v3 }
0x5295   :  { %v5351_v45 = vrot.slane %v5283_v50, %v7884_v3  ;;  %v8657_v54 = vsel %vm1544_vm7, %v8577_v36, %v5347_v8 }
0x5297   :  { %v8661_v21 = vsel %vm1544_vm7, %v8581_v58, %v5351_v45 }
0x5301   :  { %v4887_v16 = vpop.permute.xlu1 %4886 }
0x5302   :  { %6511 = vmatmul.mubr.msk.f32.vlgmr.msra.gmra.mrb[34].mxu0 %vm217_vm5, %v4887_v16 }
0x53d5   :  { %v4956_v28 = vpop.f32.mrb[34].mxu0 }
0x53d6   :  { %v4967_v34 = vrot.slane %v4956_v28, %v7880_v56  ;;  %v6512_v2 = vpop.f32.mrb[35].mxu0 }
0x53d8   :  { %v4968_v11 = vcombine.high %v4967_v34, %v4967_v34  ;;  %v4975_v51 = vrot.slane %v4967_v34, %v7880_v56 }
0x53da   :  { %v4982_v43 = vrot.slane %v4968_v11, %v7880_v56  ;;  %v4986_v31 = vrot.slane %v4975_v51, %v7884_v3 }
0x53dc   :  { %v4990_v36 = vrot.slane %v4982_v43, %v7884_v3  ;;  %v4993_v29 = vadd.f32 %v4986_v31, %v7891_v25 }
0x53de   :  { %v4994_v58 = vadd.f32 %v4990_v36, %v7888_v19  ;;  %7111 = vtanh.f32 %v4993_v29 }
0x53e0   :  { %7113 = vtanh.f32 %v4994_v58 }
0x53e8   :  { %v7112_v61 = vpop.eup %7111 }
0x53e9   :  { %v4997_v46 = vmul.f32 %v7123_v30, %v7112_v61 }
0x53ea   :  { %v7114_v4 = vpop.eup %7113 }
0x53eb   :  { %v4999_v47 = vsel %vm217_vm5, %v4997_v46, 0.0  ;;  %v4998_v15 = vmul.f32 %v7123_v30, %v7114_v4  ;;  %v5386_v30 = vld [vmem:[%s8877_s13 + $0x20] sm:$0xff]  ;;  %v5387_v46 = vld [vmem:[%s8877_s13 + $0x28] sm:$0xff] }
0x53ec   :  { %5000 = vadd.xlane.f32.xlu0 %v4999_v47  ;;  %v6764_v4 = vpack.c.bf16 %v5387_v46, %v5386_v30  ;;  %v5389_v47 = vld [vmem:[%s8877_s13 + $0x38] sm:$0xff]  ;;  %v5571_v46 = vld [vmem:[%s8879_s15] sm:$0xff] }
0x53ed   :  { %v5002_v62 = vsel %vm217_vm5, %v4998_v15, 0.0 }
0x53ee   :  { %5003 = vadd.xlane.f32.xlu1 %v5002_v62  ;;  %6765 = vmatprep.subr.bf16.mxu1 %v6764_v4 }
0x53ef   :  { %6767 = vmatpush3.bf16.msra.mxu1 %v6764_v4  ;;  %v5573_v4 = vld [vmem:[%s8879_s15 + $0x10] sm:$0xff] }
0x5479   :  { %v5001_v1 = vpop.xlane.xlu0 %5000 }
0x547a   :  { %v5005_v25 = vmul.f32 %v5001_v1, %v7916_v17 }
0x547b   :  { %v5004_v19 = vpop.xlane.xlu1 %5003 }
0x547c   :  { %v5006_v20 = vmul.f32 %v5004_v19, %v7918_v35  ;;  %5010 = vperm.xlu0 %6836, %v5005_v25  }
0x547e   :  { %5013 = vperm.xlu1 %6835, %v5006_v20  }
0x54fb   :  { %v5011_v0 = vpop.permute.xlu0 %5010 }
0x54fc   :  { %v5018_v5 = vrot.slane %v5011_v0, %v7923_v49  ;;  %v5719_v0 = vrot.slane %v8246_v27, %v7923_v49  ;;  %v5382_v27 = vld [vmem:[%s8877_s13] sm:$0xff] }
0x54fd   :  { %v5014_v24 = vpop.permute.xlu1 %5013 }
0x54fe   :  { %v5022_v40 = vrot.slane %v5014_v24, %v7923_v49  ;;  %v5699_v24 = vrot.slane %v8066_v55, %v7923_v49  ;;  %v5383_v55 = vld [vmem:[%s8877_s13 + $0x8] sm:$0xff] }
0x5500   :  { %v5023_v9 = vsel %vm354_vm4, %v5022_v40, %v5018_v5  ;;  %v5729_v5 = vrot.slane %v8346_v37, %v7923_v49 }
0x5501   :  { %v5025_v23 = vsel %vm1874_vm9, %v5023_v9, -inf }
0x5502   :  { %5026 = vmax.xlane.f32.xlu0 %v5025_v23 }
0x558f   :  { %v5027_v13 = vpop.xlane.xlu0 %5026 }
0x5590   :  { %v5032_v39 = vrot.slane %v5027_v13, %v7884_v3  ;;  %v5036_v17 = vrot.slane %v5027_v13, %v7904_v63  ;;  %v5749_v13 = vrot.slane %v8533_v52, %v7923_v49 }
0x5592   :  { %v5039_v38 = vsub.f32 %v5005_v25, %v5032_v39  ;;  %v5040_v35 = vsub.f32 %v5006_v20, %v5036_v17  ;;  %v5709_v25 = vrot.slane %v8157_v59, %v7923_v49  ;;  %v6772_v39 = vpack.c.bf16 %v5383_v55, %v5382_v27 }
0x5593   :  { %v5759_v17 = vrot.slane %v8617_v60, %v7923_v49 }
0x5594   :  { %v5041_v26 = vmul.f32 1.442695, %v5039_v38  ;;  %v5043_v50 = vmul.f32 1.442695, %v5040_v35  ;;  %v5773_v37 = vsel %vm1526_vm13, %v5699_v24, %v5709_v25  ;;  %v5576_v25 = vld [vmem:[%s8879_s15 + $0x28] sm:$0xff] }
0x5596   :  { %7115 = vpow2.f32 %v5041_v26 }
0x5597   :  { %7117 = vpow2.f32 %v5043_v50 }
0x55a0   :  { %v7116_v8 = vpop.eup %7115 }
0x55a1   :  { %5048 = vperm.xlu1 %6835, %v7116_v8   ;;  %v7118_v45 = vpop.eup %7117 }
0x55a5   :  { %5051 = vperm.xlu1 %6835, %v7118_v45  }
0x5620   :  { %v5049_v16 = vpop.permute.xlu1 %5048 }
0x5621   :  { %v5056_v34 = vrot.slane %v5049_v16, %v7923_v49 }
0x5624   :  { %v5052_v28 = vpop.permute.xlu1 %5051 }
0x5625   :  { %v5060_v2 = vrot.slane %v5052_v28, %v7923_v49 }
0x5627   :  { %v5061_v11 = vsel %vm354_vm4, %v5060_v2, %v5056_v34 }
0x5628   :  { %v5063_v51 = vsel %vm1874_vm9, %v5061_v11, 0.0 }
0x5629   :  { %5064 = vadd.xlane.f32.xlu1 %v5063_v51 }
0x56b6   :  { %v5065_v43 = vpop.xlane.xlu1 %5064 }
0x56b7   :  { %7119 = vrcp.f32 %v5065_v43 }
0x56c1   :  { %v7120_v31 = vpop.eup %7119 }
0x56c2   :  { %v5075_v36 = vrot.slane %v7120_v31, %v7904_v63  ;;  %v5071_v29 = vrot.slane %v7120_v31, %v7884_v3  ;;  %v5388_v63 = vld [vmem:[%s8877_s13 + $0x30] sm:$0xff] }
0x56c4   :  { %v5079_v58 = vmul.f32 %v7118_v45, %v5075_v36  ;;  %v5078_v61 = vmul.f32 %v7116_v8, %v5071_v29 }
0x56c6   :  { %5087 = vperm.xlu1 %6835, %v5079_v58   ;;  %5082 = vperm.xlu0 %6836, %v5078_v61  }
0x56ca   :  { %5479 = vrot.lane.b32.xlu1 %v8661_v21, %s7277_s2  ;;  %v6768_v21 = vpack.c.bf16 %v5389_v47, %v5388_v63  ;;  %v5572_v63 = vld [vmem:[%s8879_s15 + $0x8] sm:$0xff] }
0x56cc   :  { %6769 = vmatprep.subr.bf16.mxu1 %v6768_v21 }
0x56cd   :  { %6771 = vmatpush3.bf16.msra.mxu1 %v6768_v21  ;;  %v6780_v21 = vpack.c.bf16 %v5572_v63, %v5571_v46 }
0x56ce   :  { %5680 = vbcast.lane.b32.xlu1 %v7908_v32, 256  ;;  %v8707_v32 = vrot.slane %v7506_v42, %v7880_v56  ;;  %6773 = vmatprep.subr.bf16.mxu1 %v6772_v39 }
0x56cf   :  { %6781 = vmatprep.subr.bf16.mxu0 %v6780_v21 }
0x56d0   :  { %v5793_v15 = vcombine.high %v8707_v32, %v8707_v32  ;;  %6783 = vmatpush3.bf16.msra.mxu0 %v6780_v21 }
0x56d2   :  { %v5807_v42 = vrot.slane %v5793_v15, %v7880_v56 }
0x56d4   :  { %v5815_v8 = vrot.slane %v5807_v42, %v7884_v3 }
0x5745   :  { %v5088_v62 = vpop.permute.xlu1 %5087  ;;  %v8711_v1 = vpop.permute.xlu0 %5082 }
0x5746   :  { %v5091_v19 = vmul.f32 %v5088_v62, %v7869_v7  ;;  %v5090_v20 = vmul.f32 %v8711_v1, %v7867_v48  ;;  %v5739_v7 = vrot.slane %v8442_v44, %v7923_v49  ;;  %v5775_v44 = vsel %vm1529_vm14, %v5773_v37, %v5719_v0  ;;  %v5385_v0 = vld [vmem:[%s8877_s13 + $0x18] sm:$0xff] }
0x5747   :  { %v5777_v26 = vsel %vm1532_vm15, %v5775_v44, %v5729_v5  ;;  %v5769_v50 = vrot.slane %v5088_v62, %v7923_v49  ;;  %v5575_v62 = vld [vmem:[%s8879_s15 + $0x20] sm:$0xff]  ;;  %v5695_v5 = vrot.slane %v8068_v41, %v7923_v49 }
0x5748   :  { %v5099_v40 = vsel %vm1547_vm8, %v5091_v19, 0.0  ;;  %v5092_v59 = vsel %vm1547_vm8, %v5090_v20, 0.0  ;;  %v5779_v45 = vsel %vm1535_vm2, %v5777_v26, %v5739_v7  ;;  %v5384_v20 = vld [vmem:[%s8877_s13 + $0x10] sm:$0xff]  ;;  %v5735_v7 = vrot.slane %v8444_v6, %v7923_v49 }
0x5749   :  { %v5100_v9 = vrot.slane %v5099_v40, 4  ;;  %v5093_v48 = vrot.slane %v5092_v59, 4  ;;  %v8729_v23 = vpop.permute.xlu1 %5479  ;;  %v5781_v34 = vsel %vm1538_vm3, %v5779_v45, %v5749_v13  ;;  %v6776_v42 = vpack.c.bf16 %v5385_v0, %v5384_v20 }
0x574a   :  { %v5783_v51 = vsel %vm1541_vm6, %v5781_v34, %v5759_v17 }
0x574b   :  { %v5101_v38 = vadd.f32 %v5100_v9, %v5099_v40  ;;  %v5094_v35 = vadd.f32 %v5093_v48, %v5092_v59  ;;  %v5785_v43 = vsel %vm1544_vm7, %v5783_v51, %v5769_v50  ;;  %v5725_v40 = vrot.slane %v8348_v14, %v7923_v49 }
0x574c   :  { %v5800_v59 = vrot.slane %v8707_v32, %v7880_v56  ;;  %v5755_v14 = vrot.slane %v8619_v10, %v7923_v49  ;;  %v5765_v56 = vrot.slane %v8711_v1, %v7923_v49 }
0x574d   :  { %v5102_v16 = vrot.slane %v5101_v38, 2  ;;  %v5095_v28 = vrot.slane %v5094_v35, 2  ;;  %v8747_v52 = vpop.permute.xlu1 %5680 }
0x574e   :  { %v5819_v2 = vmul.f32 %v5815_v8, %v8747_v52  ;;  %v5811_v6 = vrot.slane %v5800_v59, %v7884_v3  ;;  %v5577_v3 = vld [vmem:[%s8879_s15 + $0x30] sm:$0xff] }
0x574f   :  { %v5103_v60 = vadd.f32 %v5102_v16, %v5101_v38  ;;  %v5096_v11 = vadd.f32 %v5095_v28, %v5094_v35 }
0x5750   :  { %vm5821_vm4 = vcmp.gt.f32.partialorder %v5819_v2, 0.0 }
0x5751   :  { %v5104_v31 = vrot.slane %v5103_v60, 1  ;;  %v5097_v36 = vrot.slane %v5096_v11, 1  ;;  %v5823_v29 = vsel %vm5821_vm4, %v5785_v43, 1e-10 }
0x5752   :  { %5826 = vst.msk [vmem:[#allocation11 + $0x8] sm:$0xff] %vm5824_vm0, %v5823_v29 }
0x5753   :  { %v5098_v58 = vadd.f32 %v5097_v36, %v5096_v11  ;;  %v5105_v30 = vadd.f32 %v5104_v31, %v5103_v60 }
0x5755   :  { %v5380_v61 = vsel %vm1544_vm7, %v8630_v12, %v5098_v58  ;;  %v5381_v47 = vsel %vm1544_vm7, %v8634_v18, %v5105_v30  ;;  %v5574_v12 = vld [vmem:[%s8879_s15 + $0x18] sm:$0xff]  ;;  %v6788_v18 = vpack.c.bf16 %v5576_v25, %v5575_v62 }
0x5756   :  { %5392 = vrot.lane.b32.xlu0 %v5380_v61, %s7277_s2  ;;  %v6784_v15 = vpack.c.bf16 %v5574_v12, %v5573_v4 }
0x5758   :  { %6785 = vmatprep.subr.bf16.mxu0 %v6784_v15 }
0x5759   :  { %6787 = vmatpush3.bf16.msra.mxu0 %v6784_v15 }
0x575a   :  { %5394 = vrot.lane.b32.xlu0 %v5381_v47, %s7277_s2  ;;  %6789 = vmatprep.subr.bf16.mxu0 %v6788_v18 }
0x575d   :  { %6791 = vmatpush3.bf16.msra.mxu0 %v6788_v18 }
0x575e   :  { %5477 = vrot.lane.b32.xlu0 %v8657_v54, %s7277_s2  ;;  %v5705_v54 = vrot.slane %v8159_v53, %v7923_v49 }
0x5760   :  { %v5772_v9 = vsel %vm1526_vm13, %v5695_v5, %v5705_v54 }
0x5762   :  { %5673 = vbcast.lane.b32.xlu0 %v7913_v33, 256  ;;  %v5715_v33 = vrot.slane %v8248_v22, %v7923_v49  ;;  %v5745_v22 = vrot.slane %v8535_v57, %v7923_v49  ;;  %v5578_v49 = vld [vmem:[%s8879_s15 + $0x38] sm:$0xff]  ;;  %s7212_s15 = scalar_lea.vmem %s5845_s7, 256 }
0x5763   :  { %v6792_v1 = vpack.c.bf16 %v5578_v49, %v5577_v3  ;;  %p7213_p4 = scmp.ne.s32.totalorder %s5845_s7, %s7212_s15  ;;  %p7218_p6 = scmp.lt.s32.totalorder %s7212_s15, %s7212_s15 }
0x5764   :  { %v5774_v41 = vsel %vm1529_vm14, %v5772_v9, %v5715_v33 }
0x5765   :  { %v5776_v48 = vsel %vm1532_vm15, %v5774_v41, %v5725_v40  ;;  %6793 = vmatprep.subr.bf16.mxu0 %v6792_v1  ;;  %p7219_p7 = por %p7218_p6, %p7217_p5 }
0x5766   :  { %v5778_v32 = vsel %vm1535_vm2, %v5776_v48, %v5735_v7  ;;  %6795 = vmatpush3.bf16.msra.mxu0 %v6792_v1 }
0x5767   :  { %v5780_v57 = vsel %vm1538_vm3, %v5778_v32, %v5745_v22  ;;  %p7220_p8 = pnand %p7219_p7, %p7213_p4 }
0x5768   :  { %v5782_v37 = vsel %vm1541_vm6, %v5780_v57, %v5755_v14 }
0x5769   :  { %v5784_v10 = vsel %vm1544_vm7, %v5782_v37, %v5765_v56 }
0x57c8   :  { %v5393_v19 = vpop.permute.xlu0 %5392 }
0x57c9   :  { %6521 = vmatprep.mubr.msk.f32.mxu1 %vm217_vm5, %v5393_v19 }
0x57cc   :  { %v5395_v24 = vpop.permute.xlu0 %5394 }
0x57cd   :  { %6522 = vmatmul.mubr.msk.f32.vlgmr.msra.gmra.mrb[34].mxu1 %vm217_vm5, %v5395_v24 }
0x57ce   :  { %6775 = vmatpush3.bf16.msra.mxu1 %v6772_v39 }
0x57cf   :  { %6777 = vmatprep.subr.bf16.mxu1 %v6776_v42 }
0x57d0   :  { %v5478_v53 = vpop.permute.xlu0 %5477 }
0x57d1   :  { %6532 = vmatprep.mubr.msk.f32.mxu1 %vm217_vm5, %v5478_v53 }
0x57d2   :  { %6779 = vmatpush3.bf16.msra.mxu1 %v6776_v42 }
0x57d4   :  { %v5674_v27 = vpop.permute.xlu0 %5673 }
0x57d5   :  { %v5818_v55 = vmul.f32 %v5811_v6, %v5674_v27  ;;  %6533 = vmatmul.mubr.msk.f32.vlgmr.msra.gmra.mrb[34].mxu1 %vm217_vm5, %v8729_v23  ;;  %v5931_v23 = vld [vmem:[%s8878_s14] ss:$0 sm:$0xff]  ;;  %vm5586_vm5 = vcmask 523264  }
0x57d7   :  { %vm5820_vm10 = vcmp.gt.f32.partialorder %v5818_v55, 0.0 }
0x57d8   :  { %v5822_v13 = vsel %vm5820_vm10, %v5784_v10, 1e-10 }
0x57d9   :  { %5825 = vst.msk [vmem:[#allocation11] sm:$0xff] %vm5824_vm0, %v5822_v13 }
0x58a8   :  { %v6534_v39 = vpop.f32.mrb[34].mxu1 }
0x58a9   :  { %v5568_v44 = vadd.f32 %v6534_v39, %v5931_v23  ;;  %v5551_v17 = vpop.f32.mrb[35].mxu1 }
0x58aa   :  { %v5567_v38 = vadd.f32 %v5931_v23, %v5551_v17 }
0x58ab   :  { %v5570_v26 = vmax.f32 %v5568_v44, 0.0 }
0x58ac   :  { %v5569_v35 = vmax.f32 %v5567_v38, 0.0 }
0x58ae   :  { %6551 = vmatprep.mubr.msk.f32.mxu0 %vm5586_vm5, %v5569_v35 }
0x58af   :  { %6552 = vmatmul.mubr.msk.f32.vlgmr.msra.gmra.mrb[36].mxu0 %vm5586_vm5, %v5570_v26 }
0x58b0   :  { %7223 = shalt.err (!%p7220_p8)
}
0x58b1   :  { %s7224_s6 = scalar_lea.hbm %s8882_s18, 256 }
0x58b2   :  { %p7225_p9 = scmp.ne.s32.totalorder %s8882_s18, %s7224_s6  ;;  %p7228_p10 = scmp.lt.u32.totalorder %s7224_s6, %s8882_s18 }
0x58b4   :  { %p7230_p11 = pnand %p7228_p10, %p7225_p9 }
0x58b6   :  { %7233 = shalt.err (!%p7230_p11)
}
0x58b7   :  { %5850 = dma.vmem_to_hbm [thread:$0]  %s5845_s7, 256, %s8882_s18, [#allocation12], %s7268_s25, %s7268_s25, %s7269_s26   ;;  %vm5683_vm11 = vcmp.gt.f32.partialorder %v8747_v52, 0.0  ;;  %vm5682_vm12 = vcmp.gt.f32.partialorder %v5674_v27, 0.0 }
0x58b8   :  { %s8894_s5 = sld [smem:[#allocation21_spill]]  ;;  %s7288_s1 = smov [#allocation10]  }
0x58b9   :  { %s5832_s12 = sshll.u32 %s7288_s1, 4  ;;  %s5833_s12 = int_to_ptr.vmem [resolvable:$true] %s5832_s12 }
0x58ba   :  { %s7234_s18 = scalar_lea.vmem %s5833_s12, 256  ;;  %p7239_p13 = scmp.lt.s32.totalorder %s5833_s12, %s5833_s12 }
0x58bb   :  { %p7235_p12 = scmp.ne.s32.totalorder %s5833_s12, %s7234_s18  ;;  %p7240_p0 = scmp.lt.s32.totalorder %s7234_s18, %s7234_s18 }
0x58bd   :  { %p7241_p1 = por %p7240_p0, %p7239_p13 }
0x58be   :  { %v5932_v50 = vld [vmem:[%s8894_s5] ss:$0 sm:$0xff] }
0x58bf   :  { %p7242_p2 = pnand %p7241_p1, %p7235_p12 }
0x5982   :  { %v6553_v8 = vpop.f32.mrb[36].mxu0 }
0x5983   :  { %v5665_v45 = vadd.f32 %v6553_v8, %v5932_v50  ;;  %v5659_v16 = vpop.f32.mrb[37].mxu0 }
0x5984   :  { %v5660_v28 = vadd.f32 %v5932_v50, %v5659_v16 }
0x5985   :  { %v5689_v34 = vsel %vm5683_vm11, %v5665_v45, 0.0 }
0x5986   :  { %5691 = vst.msk [vmem:[#allocation10 + $0x8] sm:$0xff] %vm131_vm1, %v5689_v34  ;;  %v5688_v2 = vsel %vm5682_vm12, %v5660_v28, 0.0 }
0x5987   :  { %5690 = vst.msk [vmem:[#allocation10] sm:$0xff] %vm131_vm1, %v5688_v2 }
0x5988   :  { %7245 = shalt.err (!%p7242_p2)
}
0x5989   :  { %s8895_s27 = sld [smem:[#allocation22_spill]] }
0x598f   :  { %s7246_s0 = scalar_lea.hbm %s8895_s27, 256 }
0x5990   :  { %p7247_p3 = scmp.ne.s32.totalorder %s8895_s27, %s7246_s0  ;;  %p7250_p4 = scmp.lt.u32.totalorder %s7246_s0, %s8895_s27 }
0x5992   :  { %p7252_p5 = pnand %p7250_p4, %p7247_p3 }
0x5994   :  { %7255 = shalt.err (!%p7252_p5)
}
0x5995   :  { %5838 = dma.vmem_to_hbm [thread:$0]  %s5833_s12, 256, %s8895_s27, [#allocation4], %s7268_s25, %s7268_s25, %s7269_s26  }
0x5996   :  { %7262 = dma.done.wait [#allocation4], 256  }
0x5997   :  { %7263 = vsyncadd [#allocation4], 4294967040 }
0x5998   :  { %7264 = dma.done.wait [#allocation12], 256  }
0x5999   :  { %7265 = vsyncadd [#allocation12], 4294967040 }
0x599a   :  { %5857 = vsyncpa [#allocation3], 1 }
0x599b   :  { %5858 = vsyncpa [#allocation6], 1 }
0x599c   :  { %5859 = vsyncpa [#allocation9], 1 }
0x599d   :  { %5860 = vsyncpa [#allocation4], 1 }
0x599e   :  { %5861 = vsyncpa [#allocation12], 1 }

</bundles_post_ra>
